<compile_context>
chip_gen: v7x
topology: tpu7x:2x2x1
jax: 0.10.0
libtpu: 0.0.40
codegen_flags: <defaults>
</compile_context>

<pallas_src>
import jax
import jax.numpy as jnp
from jax import lax
from jax.experimental import pallas as pl
from jax.experimental.pallas import tpu as pltpu

EPS = 1e-5
LANE = 128
VMEM_LIMIT = 32 * 1024 * 1024


# ------------------------------- helpers ----------------------------------- #
def _round_up(x, m):
    return ((x + m - 1) // m) * m


def _pad2d(a, rows, cols):
    r, c = a.shape
    if r == rows and c == cols:
        return a
    return jnp.pad(a, ((0, rows - r), (0, cols - c)))


def _pad1d(v, n):
    return v if v.shape[0] == n else jnp.pad(v, (0, n - v.shape[0]))


# ----------------------- matmul + fused BN partial stats ------------------- #
def _matmul_stats_kernel(x_ref, w_ref, y_ref, st_ref, acc_ref):
    k = pl.program_id(2)

    @pl.when(k == 0)
    def _():
        acc_ref[...] = jnp.zeros_like(acc_ref)

    acc_ref[...] += jnp.dot(x_ref[...], w_ref[...],
                            preferred_element_type=jnp.float32)

    @pl.when(k == pl.num_programs(2) - 1)
    def _():
        acc = acc_ref[...]
        y_ref[...] = acc
        st_ref[...] = jnp.concatenate(
            [jnp.sum(acc, axis=0, keepdims=True),
             jnp.sum(acc * acc, axis=0, keepdims=True)],
            axis=0).reshape(1, 2, acc.shape[1])


def pallas_matmul_stats(x, w):
    """(Mp, Kp) @ (Kp, Np) -> (y f32, per-M-block BN partial stats).

    All dims must already be padded to multiples of 128.  stats has shape
    (Mp//tm, 2, Np) holding per-channel [sum, sum_of_squares] partials.
    """
    Mp, Kp = x.shape
    Kp2, Np = w.shape
    assert Kp == Kp2
    tm = 256 if Mp % 256 == 0 else 128
    tn = 256 if Np % 256 == 0 else 128
    tk = 512 if Kp % 512 == 0 else (256 if Kp % 256 == 0 else 128)
    nm, nn, nk = Mp // tm, Np // tn, Kp // tk
    return pl.pallas_call(
        _matmul_stats_kernel,
        grid=(nm, nn, nk),
        in_specs=[
            pl.BlockSpec((tm, tk), lambda i, j, k: (i, k)),
            pl.BlockSpec((tk, tn), lambda i, j, k: (k, j)),
        ],
        out_specs=(
            pl.BlockSpec((tm, tn), lambda i, j, k: (i, j)),
            pl.BlockSpec((1, 2, tn), lambda i, j, k: (i, 0, j)),
        ),
        out_shape=(
            jax.ShapeDtypeStruct((Mp, Np), jnp.float32),
            jax.ShapeDtypeStruct((nm, 2, Np), jnp.float32),
        ),
        scratch_shapes=[pltpu.VMEM((tm, tn), jnp.float32)],
        compiler_params=pltpu.CompilerParams(
            dimension_semantics=("parallel", "parallel", "arbitrary"),
            vmem_limit_bytes=VMEM_LIMIT),
    )(x, w)


# --------------------- 3x3 conv (9 taps in VMEM) + BN stats ---------------- #
def _make_conv3x3_kernel(s, Ho, Wo, Pin, Pout):
    def kernel(*refs):
        phase_refs = refs[:s * s]
        w_ref, y_ref, st_ref = refs[s * s:]
        acc = jnp.zeros((Ho * Wo, Pout), jnp.float32)
        for ky in range(3):
            for kx in range(3):
                ph = phase_refs[(ky % s) * s + (kx % s)]
                tap = ph[0, pl.ds(ky // s, Ho), pl.ds(kx // s, Wo), :]
                acc = acc + jnp.dot(tap.reshape(Ho * Wo, Pin),
                                    w_ref[ky * 3 + kx],
                                    preferred_element_type=jnp.float32)
        y_ref[...] = acc.reshape(1, Ho * Wo, Pout)
        st_ref[...] = jnp.concatenate(
            [jnp.sum(acc, axis=0, keepdims=True),
             jnp.sum(acc * acc, axis=0, keepdims=True)],
            axis=0).reshape(1, 2, Pout)
    return kernel


def pallas_conv3x3_stats(x_img, w_taps, stride):
    """3x3 / pad 1 / stride s conv with fused per-channel BN partial stats.

    x_img: (N, H, W, Pin), w_taps: (9, Pin, Pout).  Returns
    (y (N, Ho*Wo, Pout) f32, stats (N, 2, Pout), Ho, Wo).  The 9 taps are
    accumulated in VMEM -- no (M, 9*Pin) im2col buffer in HBM.
    """
    N, H, W, Pin = x_img.shape
    Pout = w_taps.shape[2]
    s = stride
    Ho = (H + 2 - 3) // s + 1
    Wo = (W + 2 - 3) // s + 1
    Hp = _round_up(H + 2, s)
    Wp = _round_up(W + 2, s)
    xpad = jnp.pad(x_img, ((0, 0), (1, Hp - H - 1), (1, Wp - W - 1), (0, 0)))
    if s == 1:
        phases = (xpad,)
    else:
        # TODO(synk): the stride phase-split is one extra JAX copy of the padded
        # activation; an in-kernel strided DMA would remove it entirely.
        phases = tuple(xpad[:, pr::s, pc::s, :]
                       for pr in range(s) for pc in range(s))
    Hq, Wq = Hp // s, Wp // s
    kern = _make_conv3x3_kernel(s, Ho, Wo, Pin, Pout)
    in_specs = (
        [pl.BlockSpec((1, Hq, Wq, Pin), lambda n: (n, 0, 0, 0))] * (s * s)
        + [pl.BlockSpec((9, Pin, Pout), lambda n: (0, 0, 0))])
    y2, st = pl.pallas_call(
        kern,
        grid=(N,),
        in_specs=in_specs,
        out_specs=(
            pl.BlockSpec((1, Ho * Wo, Pout), lambda n: (n, 0, 0)),
            pl.BlockSpec((1, 2, Pout), lambda n: (n, 0, 0)),
        ),
        out_shape=(
            jax.ShapeDtypeStruct((N, Ho * Wo, Pout), jnp.float32),
            jax.ShapeDtypeStruct((N, 2, Pout), jnp.float32),
        ),
        compiler_params=pltpu.CompilerParams(
            dimension_semantics=("parallel",),
            vmem_limit_bytes=VMEM_LIMIT),
    )(*phases, w_taps)
    return y2, st, Ho, Wo


# ------------- fused BN apply (+ residual) + ReLU elementwise --------------- #
def _pick_row_tile(Mp, Cp):
    for tm in (1024, 512, 256, 128):
        if Mp % tm == 0 and tm * Cp * 4 <= (4 << 20):
            return tm
    return 128


def pallas_bn_act(y, scale, shift, residual=None, valid_rows=None):
    """relu(y * scale + shift [+ residual]); y is aliased to the output.

    If valid_rows is given, rows >= valid_rows are forced to zero so padded
    rows cannot bias downstream fused BN statistics.
    """
    Mp, Cp = y.shape
    tm = _pick_row_tile(Mp, Cp)
    nm = Mp // tm
    has_res = residual is not None

    def kernel(*refs):
        if has_res:
            x_ref, s_ref, b_ref, r_ref, o_ref = refs
            v = x_ref[...] * s_ref[...] + b_ref[...] + r_ref[...]
        else:
            x_ref, s_ref, b_ref, o_ref = refs
            v = x_ref[...] * s_ref[...] + b_ref[...]
        v = jnp.maximum(v, 0.0)
        if valid_rows is not None and valid_rows < Mp:
            rows = (lax.broadcasted_iota(jnp.int32, v.shape, 0)
                    + pl.program_id(0) * tm)
            v = jnp.where(rows < valid_rows, v, 0.0)
        o_ref[...] = v

    in_specs = [pl.BlockSpec((tm, Cp), lambda i: (i, 0)),
                pl.BlockSpec((1, Cp), lambda i: (0, 0)),
                pl.BlockSpec((1, Cp), lambda i: (0, 0))]
    args = [y, scale.reshape(1, Cp), shift.reshape(1, Cp)]
    if has_res:
        in_specs.append(pl.BlockSpec((tm, Cp), lambda i: (i, 0)))
        args.append(residual)
    return pl.pallas_call(
        kernel,
        grid=(nm,),
        in_specs=in_specs,
        out_specs=pl.BlockSpec((tm, Cp), lambda i: (i, 0)),
        out_shape=jax.ShapeDtypeStruct((Mp, Cp), jnp.float32),
        input_output_aliases={0: 0},
        compiler_params=pltpu.CompilerParams(
            dimension_semantics=("parallel",),
            vmem_limit_bytes=VMEM_LIMIT),
    )(*args)


# ------------------------------- JAX glue ---------------------------------- #
def _bn_scale_shift(stats, count, gamma_p, beta_p):
    """Training-mode BN folded to per-channel (scale, shift) from partial sums."""
    tot = jnp.sum(stats, axis=0)                        # (2, Cp)
    mean = tot[0] / count
    var = jnp.maximum(tot[1] / count - mean * mean, 0.0)   # biased variance
    scale = gamma_p * lax.rsqrt(var + EPS)
    shift = beta_p - mean * scale
    return scale, shift


def bottleneck_forward(x_nchw, params, stride, compute_dtype=jnp.bfloat16):
    N, Cin, H, W = x_nchw.shape
    P = params["w2"].shape[0]              # planes
    Cout = params["w3"].shape[0]           # planes * expansion
    cd = compute_dtype

    Cin_p = _round_up(Cin, LANE)
    P_p = _round_up(P, LANE)
    Cout_p = _round_up(Cout, LANE)

    # Weights folded to matmul layout, zero-padded to lane-dense channel dims.
    w1 = _pad2d(params["w1"][:, :, 0, 0].T, Cin_p, P_p).astype(cd)
    w2 = jnp.transpose(params["w2"], (2, 3, 1, 0)).reshape(9, P, P)
    w2 = jnp.pad(w2, ((0, 0), (0, P_p - P), (0, P_p - P))).astype(cd)
    w3 = _pad2d(params["w3"][:, :, 0, 0].T, P_p, Cout_p).astype(cd)
    g1 = _pad1d(params["g1"], P_p); b1 = _pad1d(params["b1"], P_p)
    g2 = _pad1d(params["g2"], P_p); b2 = _pad1d(params["b2"], P_p)
    g3 = _pad1d(params["g3"], Cout_p); b3 = _pad1d(params["b3"], Cout_p)

    x = jnp.transpose(x_nchw, (0, 2, 3, 1))             # NHWC
    M1 = N * H * W
    M1p = _round_up(M1, LANE)
    x_flat = _pad2d(x.reshape(M1, Cin), M1p, Cin_p)     # f32, zero padded

    # conv1x1 -> BN1 -> ReLU
    y1, st1 = pallas_matmul_stats(x_flat.astype(cd), w1)
    sc1, sh1 = _bn_scale_shift(st1, M1, g1, b1)
    y1 = pallas_bn_act(y1, sc1, sh1)                    # (M1p, P_p) f32

    # conv3x3 (stride) -> BN2 -> ReLU
    y1img = y1[:M1].reshape(N, H, W, P_p).astype(cd)
    y2, st2, Ho, Wo = pallas_conv3x3_stats(y1img, w2, stride)
    M2 = N * Ho * Wo
    M2p = _round_up(M2, LANE)
    y2 = y2.reshape(M2, P_p)
    if M2p != M2:
        y2 = jnp.pad(y2, ((0, M2p - M2), (0, 0)))
    sc2, sh2 = _bn_scale_shift(st2, M2, g2, b2)
    y2 = pallas_bn_act(y2, sc2, sh2, valid_rows=M2)     # (M2p, P_p) f32

    # conv1x1 -> BN3 stats
    y3, st3 = pallas_matmul_stats(y2.astype(cd), w3)
    sc3, sh3 = _bn_scale_shift(st3, M2, g3, b3)

    # identity branch
    if params.get("wid") is not None:
        wid = _pad2d(params["wid"][:, :, 0, 0].T, Cin_p, Cout_p).astype(cd)
        # TODO(synk): the stride-s spatial subsample is a JAX gather copy; it
        # could be folded into this matmul's DMA instead.
        xd = x[:, ::stride, ::stride, :].reshape(M2, Cin)
        xd = _pad2d(xd, M2p, Cin_p)
        idn, _ = pallas_matmul_stats(xd.astype(cd), wid)
    else:
        idn = x_flat                                    # stride==1, Cin==Cout

    # BN3 apply + residual add + ReLU (single fused epilogue)
    out = pallas_bn_act(y3, sc3, sh3, residual=idn)
    out = out[:M2, :Cout].reshape(N, Ho, Wo, Cout)
    return jnp.transpose(out, (0, 3, 1, 2))             # back to NCHW


# --------------------------- reference (pure JAX) --------------------------- #
def reference_forward(x_nchw, params, stride):
    def conv(x, w_oihw, strides, padding):
        w = jnp.transpose(w_oihw, (2, 3, 1, 0))         # HWIO
        return lax.conv_general_dilated(
            x, w, strides, padding,
            dimension_numbers=("NHWC", "HWIO", "NHWC"))

    def bn(x, gamma, beta):
        mean = jnp.mean(x, axis=(0, 1, 2))
        var = jnp.mean((x - mean) ** 2, axis=(0, 1, 2))
        return (x - mean) * lax.rsqrt(var + EPS) * gamma + beta

    x = jnp.transpose(x_nchw, (0, 2, 3, 1))
    y = jnp.maximum(bn(conv(x, params["w1"], (1, 1), ((0, 0), (0, 0))),
                       params["g1"], params["b1"]), 0.0)
    y = jnp.maximum(bn(conv(y, params["w2"], (stride, stride),
                            ((1, 1), (1, 1))),
                       params["g2"], params["b2"]), 0.0)
    y = bn(conv(y, params["w3"], (1, 1), ((0, 0), (0, 0))),
           params["g3"], params["b3"])
    if params.get("wid") is not None:
        idn = conv(x, params["wid"], (stride, stride), ((0, 0), (0, 0)))
    else:
        idn = x
    out = jnp.maximum(y + idn, 0.0)
    return jnp.transpose(out, (0, 3, 1, 2))


# --------------------------------- main ------------------------------------ #
def init_params(key, inplanes, planes, stride, expansion=4):
    out_c = planes * expansion
    ks = jax.random.split(key, 4)

    def w_init(k, shape):
        fan_in = shape[1] * shape[2] * shape[3]
        return (jax.random.normal(k, shape, jnp.float32) /
                jnp.sqrt(jnp.float32(fan_in)))

    params = {
        "w1": w_init(ks[0], (planes, inplanes, 1, 1)),
        "w2": w_init(ks[1], (planes, planes, 3, 3)),
        "w3": w_init(ks[2], (out_c, planes, 1, 1)),
        "g1": jnp.ones((planes,), jnp.float32),
        "b1": jnp.zeros((planes,), jnp.float32),
        "g2": jnp.ones((planes,), jnp.float32),
        "b2": jnp.zeros((planes,), jnp.float32),
        "g3": jnp.ones((out_c,), jnp.float32),
        "b3": jnp.zeros((out_c,), jnp.float32),
        "wid": None,
    }
    if stride != 1 or inplanes != out_c:
        params["wid"] = w_init(ks[3], (out_c, inplanes, 1, 1))
    return params


if __name__ == "__main__":
    key = jax.random.PRNGKey(0)
    k_x, k_p1, k_p2 = jax.random.split(key, 3)

    fwd = jax.jit(bottleneck_forward,
                  static_argnames=("stride", "compute_dtype"))

    # Config A: stride 2 with projection (downsample) identity branch.
    N, inplanes, H, W = 2, 4, 16, 16
    planes = 4
    x = jax.random.normal(k_x, (N, inplanes, H, W), jnp.float32)
    params = init_params(k_p1, inplanes, planes, stride=2)
    ref = reference_forward(x, params, 2)

    # Structural correctness check with f32 matmul inputs (tight tolerance).
    out_f32 = jax.block_until_ready(
        fwd(x, params, stride=2, compute_dtype=jnp.float32))
    assert out_f32.shape == ref.shape, (out_f32.shape, ref.shape)
    assert jnp.allclose(out_f32, ref, atol=2e-3, rtol=2e-3), \
        float(jnp.max(jnp.abs(out_f32 - ref)))

    # Production path: bf16 MXU inputs, f32 accumulation (looser tolerance).
    out_bf16 = jax.block_until_ready(
        fwd(x, params, stride=2, compute_dtype=jnp.bfloat16))
    rel = jnp.linalg.norm(out_bf16 - ref) / (jnp.linalg.norm(ref) + 1e-6)
    assert bool(jnp.all(jnp.isfinite(out_bf16)))
    assert float(rel) < 8e-2, float(rel)

    # Config B: stride 1 with identity pass-through (inplanes == planes*4).
    inplanes_b = planes * 4
    x_b = jax.random.normal(k_x, (N, inplanes_b, H, W), jnp.float32)
    params_b = init_params(k_p2, inplanes_b, planes, stride=1)
    out_b = jax.block_until_ready(
        fwd(x_b, params_b, stride=1, compute_dtype=jnp.float32))
    ref_b = reference_forward(x_b, params_b, 1)
    assert out_b.shape == ref_b.shape, (out_b.shape, ref_b.shape)
    assert jnp.allclose(out_b, ref_b, atol=2e-3, rtol=2e-3), \
        float(jnp.max(jnp.abs(out_b - ref_b)))

    print("KERNEL_OK")
</pallas_src>

<mosaic_0001>
module attributes {stable_mosaic.version = 11 : i64} {
  func.func @_matmul_stats_kernel(%arg0: i32, %arg1: i32, %arg2: i32, %arg3: memref<256x128xf32, #tpu.memory_space<vmem>>, %arg4: memref<128x128xf32, #tpu.memory_space<vmem>>, %arg5: memref<256x128xf32, #tpu.memory_space<vmem>>, %arg6: memref<1x2x128xf32, #tpu.memory_space<vmem>>, %arg7: memref<256x128xf32, #tpu.memory_space<vmem>>) attributes {dimension_semantics = [#tpu.dimension_semantics<parallel>, #tpu.dimension_semantics<parallel>, #tpu.dimension_semantics<arbitrary>], iteration_bounds = array<i64: 2, 1, 1>, scalar_prefetch = 0 : i64, scratch_operands = 1 : i64, tpu.core_type = #tpu.core_type<tc>, window_params = [{transform_indices = @transform_0, window_bounds = array<i64: 256, 128>}, {transform_indices = @transform_1, window_bounds = array<i64: 128, 128>}, {transform_indices = @transform_2, window_bounds = array<i64: 256, 128>}, {transform_indices = @transform_3, window_bounds = array<i64: 1, 2, 128>}]} {
    %c0_i32 = arith.constant 0 : i32
    %0 = arith.cmpi eq, %arg2, %c0_i32 : i32
    %1 = arith.extui %0 : i1 to i32
    %c0_i32_0 = arith.constant 0 : i32
    %2 = arith.cmpi ne, %1, %c0_i32_0 : i32
    scf.if %2 {
      %cst_10 = arith.constant 0.000000e+00 : f32
      %12 = vector.broadcast %cst_10 : f32 to vector<256x128xf32>
      %c0_11 = arith.constant 0 : index
      %c0_12 = arith.constant 0 : index
      %13 = vector.load %arg7[%c0_11, %c0_12] : memref<256x128xf32, #tpu.memory_space<vmem>>, vector<256x128xf32>
      tpu.vector_store %arg7[%c0_11, %c0_12], %12 {strides = array<i32>} : memref<256x128xf32, #tpu.memory_space<vmem>>, vector<256x128xf32>,
    } else {
    }
    %c0 = arith.constant 0 : index
    %c0_1 = arith.constant 0 : index
    %3 = vector.load %arg7[%c0, %c0_1] : memref<256x128xf32, #tpu.memory_space<vmem>>, vector<256x128xf32>
    %c0_2 = arith.constant 0 : index
    %c0_3 = arith.constant 0 : index
    %4 = vector.load %arg3[%c0_2, %c0_3] : memref<256x128xf32, #tpu.memory_space<vmem>>, vector<256x128xf32>
    %c0_4 = arith.constant 0 : index
    %c0_5 = arith.constant 0 : index
    %5 = vector.load %arg4[%c0_4, %c0_5] : memref<128x128xf32, #tpu.memory_space<vmem>>, vector<128x128xf32>
    %cst = arith.constant dense<0.000000e+00> : vector<256x128xf32>
    %6 = tpu.matmul %4, %5, %cst {dimension_numbers = #tpu.dot_dimension_numbers<[1], [0], [0], [1], [0, 0, 1, 1], [], []>} : vector<256x128xf32>, vector<128x128xf32>, vector<256x128xf32> -> vector<256x128xf32>
    %7 = arith.addf %3, %6 : vector<256x128xf32>
    %c0_6 = arith.constant 0 : index
    %c0_7 = arith.constant 0 : index
    %8 = vector.load %arg7[%c0_6, %c0_7] : memref<256x128xf32, #tpu.memory_space<vmem>>, vector<256x128xf32>
    tpu.vector_store %arg7[%c0_6, %c0_7], %7 {strides = array<i32>} : memref<256x128xf32, #tpu.memory_space<vmem>>, vector<256x128xf32>,
    %c0_i32_8 = arith.constant 0 : i32
    %9 = arith.cmpi eq, %arg2, %c0_i32_8 : i32
    %10 = arith.extui %9 : i1 to i32
    %c0_i32_9 = arith.constant 0 : i32
    %11 = arith.cmpi ne, %10, %c0_i32_9 : i32
    scf.if %11 {
      %c0_10 = arith.constant 0 : index
      %c0_11 = arith.constant 0 : index
      %12 = vector.load %arg7[%c0_10, %c0_11] : memref<256x128xf32, #tpu.memory_space<vmem>>, vector<256x128xf32>
      %c0_12 = arith.constant 0 : index
      %c0_13 = arith.constant 0 : index
      %13 = vector.load %arg5[%c0_12, %c0_13] : memref<256x128xf32, #tpu.memory_space<vmem>>, vector<256x128xf32>
      tpu.vector_store %arg5[%c0_12, %c0_13], %12 {strides = array<i32>} : memref<256x128xf32, #tpu.memory_space<vmem>>, vector<256x128xf32>,
      %cst_14 = arith.constant dense<0.000000e+00> : vector<128xf32>
      %14 = vector.multi_reduction <add>, %12, %cst_14 [0] : vector<256x128xf32> to vector<128xf32>
      %15 = vector.shape_cast %14 : vector<128xf32> to vector<1x128xf32>
      %16 = arith.mulf %12, %12 : vector<256x128xf32>
      %cst_15 = arith.constant dense<0.000000e+00> : vector<128xf32>
      %17 = vector.multi_reduction <add>, %16, %cst_15 [0] : vector<256x128xf32> to vector<128xf32>
      %18 = vector.shape_cast %17 : vector<128xf32> to vector<1x128xf32>
      %19 = tpu.concatenate %15, %18 in 0 : vector<1x128xf32>, vector<1x128xf32> -> vector<2x128xf32>
      %20 = vector.shape_cast %19 : vector<2x128xf32> to vector<1x2x128xf32>
      %c0_16 = arith.constant 0 : index
      %c0_17 = arith.constant 0 : index
      %c0_18 = arith.constant 0 : index
      %21 = vector.load %arg6[%c0_16, %c0_17, %c0_18] : memref<1x2x128xf32, #tpu.memory_space<vmem>>, vector<1x2x128xf32>
      tpu.vector_store %arg6[%c0_16, %c0_17, %c0_18], %20 {strides = array<i32>} : memref<1x2x128xf32, #tpu.memory_space<vmem>>, vector<1x2x128xf32>,
    } else {
    }
    return
  }
  func.func @transform_0(%arg0: i32, %arg1: i32, %arg2: i32) -> (i32, i32) {
    %c0_i32 = arith.constant 0 : i32
    return %arg0, %arg2 : i32, i32
  }
  func.func @transform_1(%arg0: i32, %arg1: i32, %arg2: i32) -> (i32, i32) {
    %c0_i32 = arith.constant 0 : i32
    return %arg2, %arg1 : i32, i32
  }
  func.func @transform_2(%arg0: i32, %arg1: i32, %arg2: i32) -> (i32, i32) {
    %c0_i32 = arith.constant 0 : i32
    return %arg0, %arg1 : i32, i32
  }
  func.func @transform_3(%arg0: i32, %arg1: i32, %arg2: i32) -> (i32, i32, i32) {
    %c0_i32 = arith.constant 0 : i32
    %c0_i32_0 = arith.constant 0 : i32
    return %arg0, %c0_i32, %arg1 : i32, i32, i32
  }
}

module attributes {stable_mosaic.version = 11 : i64} {
  func.func @kernel(%arg0: i32, %arg1: memref<512x128xf32, #tpu.memory_space<vmem>>, %arg2: memref<1x128xf32, #tpu.memory_space<vmem>>, %arg3: memref<1x128xf32, #tpu.memory_space<vmem>>, %arg4: memref<512x128xf32, #tpu.memory_space<vmem>>) attributes {dimension_semantics = [#tpu.dimension_semantics<parallel>], iteration_bounds = array<i64: 1>, scalar_prefetch = 0 : i64, scratch_operands = 0 : i64, tpu.core_type = #tpu.core_type<tc>, window_params = [{transform_indices = @transform_0, window_bounds = array<i64: 512, 128>}, {pipeline_mode = #tpu.pipeline_mode<synchronous>, transform_indices = @transform_1, window_bounds = array<i64: 1, 128>}, {pipeline_mode = #tpu.pipeline_mode<synchronous>, transform_indices = @transform_2, window_bounds = array<i64: 1, 128>}, {transform_indices = @transform_3, window_bounds = array<i64: 512, 128>}]} {
    %c0 = arith.constant 0 : index
    %c0_0 = arith.constant 0 : index
    %0 = vector.load %arg1[%c0, %c0_0] : memref<512x128xf32, #tpu.memory_space<vmem>>, vector<512x128xf32>
    %c0_1 = arith.constant 0 : index
    %c0_2 = arith.constant 0 : index
    %1 = vector.load %arg2[%c0_1, %c0_2] : memref<1x128xf32, #tpu.memory_space<vmem>>, vector<1x128xf32>
    %2 = vector.broadcast %1 : vector<1x128xf32> to vector<512x128xf32>
    %3 = arith.mulf %0, %2 : vector<512x128xf32>
    %c0_3 = arith.constant 0 : index
    %c0_4 = arith.constant 0 : index
    %4 = vector.load %arg3[%c0_3, %c0_4] : memref<1x128xf32, #tpu.memory_space<vmem>>, vector<1x128xf32>
    %5 = vector.broadcast %4 : vector<1x128xf32> to vector<512x128xf32>
    %6 = arith.addf %3, %5 : vector<512x128xf32>
    %cst = arith.constant 0.000000e+00 : f32
    %7 = vector.broadcast %cst : f32 to vector<512x128xf32>
    %8 = arith.maximumf %6, %7 : vector<512x128xf32>
    %c0_5 = arith.constant 0 : index
    %c0_6 = arith.constant 0 : index
    %9 = vector.load %arg4[%c0_5, %c0_6] : memref<512x128xf32, #tpu.memory_space<vmem>>, vector<512x128xf32>
    tpu.vector_store %arg4[%c0_5, %c0_6], %8 {strides = array<i32>} : memref<512x128xf32, #tpu.memory_space<vmem>>, vector<512x128xf32>,
    return
  }
  func.func @transform_0(%arg0: i32) -> (i32, i32) {
    %c0_i32 = arith.constant 0 : i32
    %c0_i32_0 = arith.constant 0 : i32
    return %arg0, %c0_i32 : i32, i32
  }
  func.func @transform_1(%arg0: i32) -> (i32, i32) {
    %c0_i32 = arith.constant 0 : i32
    %c0_i32_0 = arith.constant 0 : i32
    %c0_i32_1 = arith.constant 0 : i32
    return %c0_i32, %c0_i32_0 : i32, i32
  }
  func.func @transform_2(%arg0: i32) -> (i32, i32) {
    %c0_i32 = arith.constant 0 : i32
    %c0_i32_0 = arith.constant 0 : i32
    %c0_i32_1 = arith.constant 0 : i32
    return %c0_i32, %c0_i32_0 : i32, i32
  }
  func.func @transform_3(%arg0: i32) -> (i32, i32) {
    %c0_i32 = arith.constant 0 : i32
    %c0_i32_0 = arith.constant 0 : i32
    return %arg0, %c0_i32 : i32, i32
  }
}

module attributes {stable_mosaic.version = 11 : i64} {
  func.func @kernel(%arg0: i32, %arg1: memref<1x9x9x128xf32, #tpu.memory_space<vmem>>, %arg2: memref<1x9x9x128xf32, #tpu.memory_space<vmem>>, %arg3: memref<1x9x9x128xf32, #tpu.memory_space<vmem>>, %arg4: memref<1x9x9x128xf32, #tpu.memory_space<vmem>>, %arg5: memref<9x128x128xf32, #tpu.memory_space<vmem>>, %arg6: memref<1x64x128xf32, #tpu.memory_space<vmem>>, %arg7: memref<1x2x128xf32, #tpu.memory_space<vmem>>) attributes {dimension_semantics = [#tpu.dimension_semantics<parallel>], iteration_bounds = array<i64: 2>, scalar_prefetch = 0 : i64, scratch_operands = 0 : i64, tpu.core_type = #tpu.core_type<tc>, window_params = [{transform_indices = @transform_0, window_bounds = array<i64: 1, 9, 9, 128>}, {transform_indices = @transform_1, window_bounds = array<i64: 1, 9, 9, 128>}, {transform_indices = @transform_2, window_bounds = array<i64: 1, 9, 9, 128>}, {transform_indices = @transform_3, window_bounds = array<i64: 1, 9, 9, 128>}, {pipeline_mode = #tpu.pipeline_mode<synchronous>, transform_indices = @transform_4, window_bounds = array<i64: 9, 128, 128>}, {transform_indices = @transform_5, window_bounds = array<i64: 1, 64, 128>}, {transform_indices = @transform_6, window_bounds = array<i64: 1, 2, 128>}]} {
    %cst = arith.constant 0.000000e+00 : f32
    %0 = vector.broadcast %cst : f32 to vector<64x128xf32>
    %c0 = arith.constant 0 : index
    %c0_0 = arith.constant 0 : index
    %c0_1 = arith.constant 0 : index
    %c0_2 = arith.constant 0 : index
    %1 = vector.load %arg1[%c0, %c0_0, %c0_1, %c0_2] : memref<1x9x9x128xf32, #tpu.memory_space<vmem>>, vector<1x8x8x128xf32>
    %2 = vector.shape_cast %1 : vector<1x8x8x128xf32> to vector<8x8x128xf32>
    %3 = vector.shape_cast %2 : vector<8x8x128xf32> to vector<64x128xf32>
    %c0_3 = arith.constant 0 : index
    %c0_4 = arith.constant 0 : index
    %c0_5 = arith.constant 0 : index
    %4 = vector.load %arg5[%c0_3, %c0_4, %c0_5] : memref<9x128x128xf32, #tpu.memory_space<vmem>>, vector<1x128x128xf32>
    %5 = vector.shape_cast %4 : vector<1x128x128xf32> to vector<128x128xf32>
    %cst_6 = arith.constant dense<0.000000e+00> : vector<64x128xf32>
    %6 = tpu.matmul %3, %5, %cst_6 {dimension_numbers = #tpu.dot_dimension_numbers<[1], [0], [0], [1], [0, 0, 1, 1], [], []>} : vector<64x128xf32>, vector<128x128xf32>, vector<64x128xf32> -> vector<64x128xf32>
    %7 = arith.addf %0, %6 : vector<64x128xf32>
    %c0_7 = arith.constant 0 : index
    %c0_8 = arith.constant 0 : index
    %c0_9 = arith.constant 0 : index
    %c0_10 = arith.constant 0 : index
    %8 = vector.load %arg2[%c0_7, %c0_8, %c0_9, %c0_10] : memref<1x9x9x128xf32, #tpu.memory_space<vmem>>, vector<1x8x8x128xf32>
    %9 = vector.shape_cast %8 : vector<1x8x8x128xf32> to vector<8x8x128xf32>
    %10 = vector.shape_cast %9 : vector<8x8x128xf32> to vector<64x128xf32>
    %c1 = arith.constant 1 : index
    %c0_11 = arith.constant 0 : index
    %c0_12 = arith.constant 0 : index
    %11 = vector.load %arg5[%c1, %c0_11, %c0_12] : memref<9x128x128xf32, #tpu.memory_space<vmem>>, vector<1x128x128xf32>
    %12 = vector.shape_cast %11 : vector<1x128x128xf32> to vector<128x128xf32>
    %cst_13 = arith.constant dense<0.000000e+00> : vector<64x128xf32>
    %13 = tpu.matmul %10, %12, %cst_13 {dimension_numbers = #tpu.dot_dimension_numbers<[1], [0], [0], [1], [0, 0, 1, 1], [], []>} : vector<64x128xf32>, vector<128x128xf32>, vector<64x128xf32> -> vector<64x128xf32>
    %14 = arith.addf %7, %13 : vector<64x128xf32>
    %c0_14 = arith.constant 0 : index
    %c0_15 = arith.constant 0 : index
    %c1_16 = arith.constant 1 : index
    %c0_17 = arith.constant 0 : index
    %15 = vector.load %arg1[%c0_14, %c0_15, %c1_16, %c0_17] : memref<1x9x9x128xf32, #tpu.memory_space<vmem>>, vector<1x8x8x128xf32>
    %16 = vector.shape_cast %15 : vector<1x8x8x128xf32> to vector<8x8x128xf32>
    %17 = vector.shape_cast %16 : vector<8x8x128xf32> to vector<64x128xf32>
    %c2 = arith.constant 2 : index
    %c0_18 = arith.constant 0 : index
    %c0_19 = arith.constant 0 : index
    %18 = vector.load %arg5[%c2, %c0_18, %c0_19] : memref<9x128x128xf32, #tpu.memory_space<vmem>>, vector<1x128x128xf32>
    %19 = vector.shape_cast %18 : vector<1x128x128xf32> to vector<128x128xf32>
    %cst_20 = arith.constant dense<0.000000e+00> : vector<64x128xf32>
    %20 = tpu.matmul %17, %19, %cst_20 {dimension_numbers = #tpu.dot_dimension_numbers<[1], [0], [0], [1], [0, 0, 1, 1], [], []>} : vector<64x128xf32>, vector<128x128xf32>, vector<64x128xf32> -> vector<64x128xf32>
    %21 = arith.addf %14, %20 : vector<64x128xf32>
    %c0_21 = arith.constant 0 : index
    %c0_22 = arith.constant 0 : index
    %c0_23 = arith.constant 0 : index
    %c0_24 = arith.constant 0 : index
    %22 = vector.load %arg3[%c0_21, %c0_22, %c0_23, %c0_24] : memref<1x9x9x128xf32, #tpu.memory_space<vmem>>, vector<1x8x8x128xf32>
    %23 = vector.shape_cast %22 : vector<1x8x8x128xf32> to vector<8x8x128xf32>
    %24 = vector.shape_cast %23 : vector<8x8x128xf32> to vector<64x128xf32>
    %c3 = arith.constant 3 : index
    %c0_25 = arith.constant 0 : index
    %c0_26 = arith.constant 0 : index
    %25 = vector.load %arg5[%c3, %c0_25, %c0_26] : memref<9x128x128xf32, #tpu.memory_space<vmem>>, vector<1x128x128xf32>
    %26 = vector.shape_cast %25 : vector<1x128x128xf32> to vector<128x128xf32>
    %cst_27 = arith.constant dense<0.000000e+00> : vector<64x128xf32>
    %27 = tpu.matmul %24, %26, %cst_27 {dimension_numbers = #tpu.dot_dimension_numbers<[1], [0], [0], [1], [0, 0, 1, 1], [], []>} : vector<64x128xf32>, vector<128x128xf32>, vector<64x128xf32> -> vector<64x128xf32>
    %28 = arith.addf %21, %27 : vector<64x128xf32>
    %c0_28 = arith.constant 0 : index
    %c0_29 = arith.constant 0 : index
    %c0_30 = arith.constant 0 : index
    %c0_31 = arith.constant 0 : index
    %29 = vector.load %arg4[%c0_28, %c0_29, %c0_30, %c0_31] : memref<1x9x9x128xf32, #tpu.memory_space<vmem>>, vector<1x8x8x128xf32>
    %30 = vector.shape_cast %29 : vector<1x8x8x128xf32> to vector<8x8x128xf32>
    %31 = vector.shape_cast %30 : vector<8x8x128xf32> to vector<64x128xf32>
    %c4 = arith.constant 4 : index
    %c0_32 = arith.constant 0 : index
    %c0_33 = arith.constant 0 : index
    %32 = vector.load %arg5[%c4, %c0_32, %c0_33] : memref<9x128x128xf32, #tpu.memory_space<vmem>>, vector<1x128x128xf32>
    %33 = vector.shape_cast %32 : vector<1x128x128xf32> to vector<128x128xf32>
    %cst_34 = arith.constant dense<0.000000e+00> : vector<64x128xf32>
    %34 = tpu.matmul %31, %33, %cst_34 {dimension_numbers = #tpu.dot_dimension_numbers<[1], [0], [0], [1], [0, 0, 1, 1], [], []>} : vector<64x128xf32>, vector<128x128xf32>, vector<64x128xf32> -> vector<64x128xf32>
    %35 = arith.addf %28, %34 : vector<64x128xf32>
    %c0_35 = arith.constant 0 : index
    %c0_36 = arith.constant 0 : index
    %c1_37 = arith.constant 1 : index
    %c0_38 = arith.constant 0 : index
    %36 = vector.load %arg3[%c0_35, %c0_36, %c1_37, %c0_38] : memref<1x9x9x128xf32, #tpu.memory_space<vmem>>, vector<1x8x8x128xf32>
    %37 = vector.shape_cast %36 : vector<1x8x8x128xf32> to vector<8x8x128xf32>
    %38 = vector.shape_cast %37 : vector<8x8x128xf32> to vector<64x128xf32>
    %c5 = arith.constant 5 : index
    %c0_39 = arith.constant 0 : index
    %c0_40 = arith.constant 0 : index
    %39 = vector.load %arg5[%c5, %c0_39, %c0_40] : memref<9x128x128xf32, #tpu.memory_space<vmem>>, vector<1x128x128xf32>
    %40 = vector.shape_cast %39 : vector<1x128x128xf32> to vector<128x128xf32>
    %cst_41 = arith.constant dense<0.000000e+00> : vector<64x128xf32>
    %41 = tpu.matmul %38, %40, %cst_41 {dimension_numbers = #tpu.dot_dimension_numbers<[1], [0], [0], [1], [0, 0, 1, 1], [], []>} : vector<64x128xf32>, vector<128x128xf32>, vector<64x128xf32> -> vector<64x128xf32>
    %42 = arith.addf %35, %41 : vector<64x128xf32>
    %c0_42 = arith.constant 0 : index
    %c1_43 = arith.constant 1 : index
    %c0_44 = arith.constant 0 : index
    %c0_45 = arith.constant 0 : index
    %43 = vector.load %arg1[%c0_42, %c1_43, %c0_44, %c0_45] : memref<1x9x9x128xf32, #tpu.memory_space<vmem>>, vector<1x8x8x128xf32>
    %44 = vector.shape_cast %43 : vector<1x8x8x128xf32> to vector<8x8x128xf32>
    %45 = vector.shape_cast %44 : vector<8x8x128xf32> to vector<64x128xf32>
    %c6 = arith.constant 6 : index
    %c0_46 = arith.constant 0 : index
    %c0_47 = arith.constant 0 : index
    %46 = vector.load %arg5[%c6, %c0_46, %c0_47] : memref<9x128x128xf32, #tpu.memory_space<vmem>>, vector<1x128x128xf32>
    %47 = vector.shape_cast %46 : vector<1x128x128xf32> to vector<128x128xf32>
    %cst_48 = arith.constant dense<0.000000e+00> : vector<64x128xf32>
    %48 = tpu.matmul %45, %47, %cst_48 {dimension_numbers = #tpu.dot_dimension_numbers<[1], [0], [0], [1], [0, 0, 1, 1], [], []>} : vector<64x128xf32>, vector<128x128xf32>, vector<64x128xf32> -> vector<64x128xf32>
    %49 = arith.addf %42, %48 : vector<64x128xf32>
    %c0_49 = arith.constant 0 : index
    %c1_50 = arith.constant 1 : index
    %c0_51 = arith.constant 0 : index
    %c0_52 = arith.constant 0 : index
    %50 = vector.load %arg2[%c0_49, %c1_50, %c0_51, %c0_52] : memref<1x9x9x128xf32, #tpu.memory_space<vmem>>, vector<1x8x8x128xf32>
    %51 = vector.shape_cast %50 : vector<1x8x8x128xf32> to vector<8x8x128xf32>
    %52 = vector.shape_cast %51 : vector<8x8x128xf32> to vector<64x128xf32>
    %c7 = arith.constant 7 : index
    %c0_53 = arith.constant 0 : index
    %c0_54 = arith.constant 0 : index
    %53 = vector.load %arg5[%c7, %c0_53, %c0_54] : memref<9x128x128xf32, #tpu.memory_space<vmem>>, vector<1x128x128xf32>
    %54 = vector.shape_cast %53 : vector<1x128x128xf32> to vector<128x128xf32>
    %cst_55 = arith.constant dense<0.000000e+00> : vector<64x128xf32>
    %55 = tpu.matmul %52, %54, %cst_55 {dimension_numbers = #tpu.dot_dimension_numbers<[1], [0], [0], [1], [0, 0, 1, 1], [], []>} : vector<64x128xf32>, vector<128x128xf32>, vector<64x128xf32> -> vector<64x128xf32>
    %56 = arith.addf %49, %55 : vector<64x128xf32>
    %c0_56 = arith.constant 0 : index
    %c1_57 = arith.constant 1 : index
    %c1_58 = arith.constant 1 : index
    %c0_59 = arith.constant 0 : index
    %57 = vector.load %arg1[%c0_56, %c1_57, %c1_58, %c0_59] : memref<1x9x9x128xf32, #tpu.memory_space<vmem>>, vector<1x8x8x128xf32>
    %58 = vector.shape_cast %57 : vector<1x8x8x128xf32> to vector<8x8x128xf32>
    %59 = vector.shape_cast %58 : vector<8x8x128xf32> to vector<64x128xf32>
    %c8 = arith.constant 8 : index
    %c0_60 = arith.constant 0 : index
    %c0_61 = arith.constant 0 : index
    %60 = vector.load %arg5[%c8, %c0_60, %c0_61] : memref<9x128x128xf32, #tpu.memory_space<vmem>>, vector<1x128x128xf32>
    %61 = vector.shape_cast %60 : vector<1x128x128xf32> to vector<128x128xf32>
    %cst_62 = arith.constant dense<0.000000e+00> : vector<64x128xf32>
    %62 = tpu.matmul %59, %61, %cst_62 {dimension_numbers = #tpu.dot_dimension_numbers<[1], [0], [0], [1], [0, 0, 1, 1], [], []>} : vector<64x128xf32>, vector<128x128xf32>, vector<64x128xf32> -> vector<64x128xf32>
    %63 = arith.addf %56, %62 : vector<64x128xf32>
    %64 = vector.shape_cast %63 : vector<64x128xf32> to vector<1x64x128xf32>
    %c0_63 = arith.constant 0 : index
    %c0_64 = arith.constant 0 : index
    %c0_65 = arith.constant 0 : index
    %65 = vector.load %arg6[%c0_63, %c0_64, %c0_65] : memref<1x64x128xf32, #tpu.memory_space<vmem>>, vector<1x64x128xf32>
    tpu.vector_store %arg6[%c0_63, %c0_64, %c0_65], %64 {strides = array<i32>} : memref<1x64x128xf32, #tpu.memory_space<vmem>>, vector<1x64x128xf32>,
    %cst_66 = arith.constant dense<0.000000e+00> : vector<128xf32>
    %66 = vector.multi_reduction <add>, %63, %cst_66 [0] : vector<64x128xf32> to vector<128xf32>
    %67 = vector.shape_cast %66 : vector<128xf32> to vector<1x128xf32>
    %68 = arith.mulf %63, %63 : vector<64x128xf32>
    %cst_67 = arith.constant dense<0.000000e+00> : vector<128xf32>
    %69 = vector.multi_reduction <add>, %68, %cst_67 [0] : vector<64x128xf32> to vector<128xf32>
    %70 = vector.shape_cast %69 : vector<128xf32> to vector<1x128xf32>
    %71 = tpu.concatenate %67, %70 in 0 : vector<1x128xf32>, vector<1x128xf32> -> vector<2x128xf32>
    %72 = vector.shape_cast %71 : vector<2x128xf32> to vector<1x2x128xf32>
    %c0_68 = arith.constant 0 : index
    %c0_69 = arith.constant 0 : index
    %c0_70 = arith.constant 0 : index
    %73 = vector.load %arg7[%c0_68, %c0_69, %c0_70] : memref<1x2x128xf32, #tpu.memory_space<vmem>>, vector<1x2x128xf32>
    tpu.vector_store %arg7[%c0_68, %c0_69, %c0_70], %72 {strides = array<i32>} : memref<1x2x128xf32, #tpu.memory_space<vmem>>, vector<1x2x128xf32>,
    return
  }
  func.func @transform_0(%arg0: i32) -> (i32, i32, i32, i32) {
    %c0_i32 = arith.constant 0 : i32
    %c0_i32_0 = arith.constant 0 : i32
    %c0_i32_1 = arith.constant 0 : i32
    %c0_i32_2 = arith.constant 0 : i32
    return %arg0, %c0_i32, %c0_i32_0, %c0_i32_1 : i32, i32, i32, i32
  }
  func.func @transform_1(%arg0: i32) -> (i32, i32, i32, i32) {
    %c0_i32 = arith.constant 0 : i32
    %c0_i32_0 = arith.constant 0 : i32
    %c0_i32_1 = arith.constant 0 : i32
    %c0_i32_2 = arith.constant 0 : i32
    return %arg0, %c0_i32, %c0_i32_0, %c0_i32_1 : i32, i32, i32, i32
  }
  func.func @transform_2(%arg0: i32) -> (i32, i32, i32, i32) {
    %c0_i32 = arith.constant 0 : i32
    %c0_i32_0 = arith.constant 0 : i32
    %c0_i32_1 = arith.constant 0 : i32
    %c0_i32_2 = arith.constant 0 : i32
    return %arg0, %c0_i32, %c0_i32_0, %c0_i32_1 : i32, i32, i32, i32
  }
  func.func @transform_3(%arg0: i32) -> (i32, i32, i32, i32) {
    %c0_i32 = arith.constant 0 : i32
    %c0_i32_0 = arith.constant 0 : i32
    %c0_i32_1 = arith.constant 0 : i32
    %c0_i32_2 = arith.constant 0 : i32
    return %arg0, %c0_i32, %c0_i32_0, %c0_i32_1 : i32, i32, i32, i32
  }
  func.func @transform_4(%arg0: i32) -> (i32, i32, i32) {
    %c0_i32 = arith.constant 0 : i32
    %c0_i32_0 = arith.constant 0 : i32
    %c0_i32_1 = arith.constant 0 : i32
    %c0_i32_2 = arith.constant 0 : i32
    return %c0_i32, %c0_i32_0, %c0_i32_1 : i32, i32, i32
  }
  func.func @transform_5(%arg0: i32) -> (i32, i32, i32) {
    %c0_i32 = arith.constant 0 : i32
    %c0_i32_0 = arith.constant 0 : i32
    %c0_i32_1 = arith.constant 0 : i32
    return %arg0, %c0_i32, %c0_i32_0 : i32, i32, i32
  }
  func.func @transform_6(%arg0: i32) -> (i32, i32, i32) {
    %c0_i32 = arith.constant 0 : i32
    %c0_i32_0 = arith.constant 0 : i32
    %c0_i32_1 = arith.constant 0 : i32
    return %arg0, %c0_i32, %c0_i32_0 : i32, i32, i32
  }
}

module attributes {stable_mosaic.version = 11 : i64} {
  func.func @kernel(%arg0: i32, %arg1: memref<128x128xf32, #tpu.memory_space<vmem>>, %arg2: memref<1x128xf32, #tpu.memory_space<vmem>>, %arg3: memref<1x128xf32, #tpu.memory_space<vmem>>, %arg4: memref<128x128xf32, #tpu.memory_space<vmem>>) attributes {dimension_semantics = [#tpu.dimension_semantics<parallel>], iteration_bounds = array<i64: 1>, scalar_prefetch = 0 : i64, scratch_operands = 0 : i64, tpu.core_type = #tpu.core_type<tc>, window_params = [{transform_indices = @transform_0, window_bounds = array<i64: 128, 128>}, {pipeline_mode = #tpu.pipeline_mode<synchronous>, transform_indices = @transform_1, window_bounds = array<i64: 1, 128>}, {pipeline_mode = #tpu.pipeline_mode<synchronous>, transform_indices = @transform_2, window_bounds = array<i64: 1, 128>}, {transform_indices = @transform_3, window_bounds = array<i64: 128, 128>}]} {
    %c0 = arith.constant 0 : index
    %c0_0 = arith.constant 0 : index
    %0 = vector.load %arg1[%c0, %c0_0] : memref<128x128xf32, #tpu.memory_space<vmem>>, vector<128x128xf32>
    %c0_1 = arith.constant 0 : index
    %c0_2 = arith.constant 0 : index
    %1 = vector.load %arg2[%c0_1, %c0_2] : memref<1x128xf32, #tpu.memory_space<vmem>>, vector<1x128xf32>
    %2 = vector.broadcast %1 : vector<1x128xf32> to vector<128x128xf32>
    %3 = arith.mulf %0, %2 : vector<128x128xf32>
    %c0_3 = arith.constant 0 : index
    %c0_4 = arith.constant 0 : index
    %4 = vector.load %arg3[%c0_3, %c0_4] : memref<1x128xf32, #tpu.memory_space<vmem>>, vector<1x128xf32>
    %5 = vector.broadcast %4 : vector<1x128xf32> to vector<128x128xf32>
    %6 = arith.addf %3, %5 : vector<128x128xf32>
    %cst = arith.constant 0.000000e+00 : f32
    %7 = vector.broadcast %cst : f32 to vector<128x128xf32>
    %8 = arith.maximumf %6, %7 : vector<128x128xf32>
    %c0_5 = arith.constant 0 : index
    %c0_6 = arith.constant 0 : index
    %9 = vector.load %arg4[%c0_5, %c0_6] : memref<128x128xf32, #tpu.memory_space<vmem>>, vector<128x128xf32>
    tpu.vector_store %arg4[%c0_5, %c0_6], %8 {strides = array<i32>} : memref<128x128xf32, #tpu.memory_space<vmem>>, vector<128x128xf32>,
    return
  }
  func.func @transform_0(%arg0: i32) -> (i32, i32) {
    %c0_i32 = arith.constant 0 : i32
    %c0_i32_0 = arith.constant 0 : i32
    return %arg0, %c0_i32 : i32, i32
  }
  func.func @transform_1(%arg0: i32) -> (i32, i32) {
    %c0_i32 = arith.constant 0 : i32
    %c0_i32_0 = arith.constant 0 : i32
    %c0_i32_1 = arith.constant 0 : i32
    return %c0_i32, %c0_i32_0 : i32, i32
  }
  func.func @transform_2(%arg0: i32) -> (i32, i32) {
    %c0_i32 = arith.constant 0 : i32
    %c0_i32_0 = arith.constant 0 : i32
    %c0_i32_1 = arith.constant 0 : i32
    return %c0_i32, %c0_i32_0 : i32, i32
  }
  func.func @transform_3(%arg0: i32) -> (i32, i32) {
    %c0_i32 = arith.constant 0 : i32
    %c0_i32_0 = arith.constant 0 : i32
    return %arg0, %c0_i32 : i32, i32
  }
}

module attributes {stable_mosaic.version = 11 : i64} {
  func.func @_matmul_stats_kernel(%arg0: i32, %arg1: i32, %arg2: i32, %arg3: memref<128x128xf32, #tpu.memory_space<vmem>>, %arg4: memref<128x128xf32, #tpu.memory_space<vmem>>, %arg5: memref<128x128xf32, #tpu.memory_space<vmem>>, %arg6: memref<1x2x128xf32, #tpu.memory_space<vmem>>, %arg7: memref<128x128xf32, #tpu.memory_space<vmem>>) attributes {dimension_semantics = [#tpu.dimension_semantics<parallel>, #tpu.dimension_semantics<parallel>, #tpu.dimension_semantics<arbitrary>], iteration_bounds = array<i64: 1, 1, 1>, scalar_prefetch = 0 : i64, scratch_operands = 1 : i64, tpu.core_type = #tpu.core_type<tc>, window_params = [{transform_indices = @transform_0, window_bounds = array<i64: 128, 128>}, {transform_indices = @transform_1, window_bounds = array<i64: 128, 128>}, {transform_indices = @transform_2, window_bounds = array<i64: 128, 128>}, {transform_indices = @transform_3, window_bounds = array<i64: 1, 2, 128>}]} {
    %c0_i32 = arith.constant 0 : i32
    %0 = arith.cmpi eq, %arg2, %c0_i32 : i32
    %1 = arith.extui %0 : i1 to i32
    %c0_i32_0 = arith.constant 0 : i32
    %2 = arith.cmpi ne, %1, %c0_i32_0 : i32
    scf.if %2 {
      %cst_10 = arith.constant 0.000000e+00 : f32
      %12 = vector.broadcast %cst_10 : f32 to vector<128x128xf32>
      %c0_11 = arith.constant 0 : index
      %c0_12 = arith.constant 0 : index
      %13 = vector.load %arg7[%c0_11, %c0_12] : memref<128x128xf32, #tpu.memory_space<vmem>>, vector<128x128xf32>
      tpu.vector_store %arg7[%c0_11, %c0_12], %12 {strides = array<i32>} : memref<128x128xf32, #tpu.memory_space<vmem>>, vector<128x128xf32>,
    } else {
    }
    %c0 = arith.constant 0 : index
    %c0_1 = arith.constant 0 : index
    %3 = vector.load %arg7[%c0, %c0_1] : memref<128x128xf32, #tpu.memory_space<vmem>>, vector<128x128xf32>
    %c0_2 = arith.constant 0 : index
    %c0_3 = arith.constant 0 : index
    %4 = vector.load %arg3[%c0_2, %c0_3] : memref<128x128xf32, #tpu.memory_space<vmem>>, vector<128x128xf32>
    %c0_4 = arith.constant 0 : index
    %c0_5 = arith.constant 0 : index
    %5 = vector.load %arg4[%c0_4, %c0_5] : memref<128x128xf32, #tpu.memory_space<vmem>>, vector<128x128xf32>
    %cst = arith.constant dense<0.000000e+00> : vector<128x128xf32>
    %6 = tpu.matmul %4, %5, %cst {dimension_numbers = #tpu.dot_dimension_numbers<[1], [0], [0], [1], [0, 0, 1, 1], [], []>} : vector<128x128xf32>, vector<128x128xf32>, vector<128x128xf32> -> vector<128x128xf32>
    %7 = arith.addf %3, %6 : vector<128x128xf32>
    %c0_6 = arith.constant 0 : index
    %c0_7 = arith.constant 0 : index
    %8 = vector.load %arg7[%c0_6, %c0_7] : memref<128x128xf32, #tpu.memory_space<vmem>>, vector<128x128xf32>
    tpu.vector_store %arg7[%c0_6, %c0_7], %7 {strides = array<i32>} : memref<128x128xf32, #tpu.memory_space<vmem>>, vector<128x128xf32>,
    %c0_i32_8 = arith.constant 0 : i32
    %9 = arith.cmpi eq, %arg2, %c0_i32_8 : i32
    %10 = arith.extui %9 : i1 to i32
    %c0_i32_9 = arith.constant 0 : i32
    %11 = arith.cmpi ne, %10, %c0_i32_9 : i32
    scf.if %11 {
      %c0_10 = arith.constant 0 : index
      %c0_11 = arith.constant 0 : index
      %12 = vector.load %arg7[%c0_10, %c0_11] : memref<128x128xf32, #tpu.memory_space<vmem>>, vector<128x128xf32>
      %c0_12 = arith.constant 0 : index
      %c0_13 = arith.constant 0 : index
      %13 = vector.load %arg5[%c0_12, %c0_13] : memref<128x128xf32, #tpu.memory_space<vmem>>, vector<128x128xf32>
      tpu.vector_store %arg5[%c0_12, %c0_13], %12 {strides = array<i32>} : memref<128x128xf32, #tpu.memory_space<vmem>>, vector<128x128xf32>,
      %cst_14 = arith.constant dense<0.000000e+00> : vector<128xf32>
      %14 = vector.multi_reduction <add>, %12, %cst_14 [0] : vector<128x128xf32> to vector<128xf32>
      %15 = vector.shape_cast %14 : vector<128xf32> to vector<1x128xf32>
      %16 = arith.mulf %12, %12 : vector<128x128xf32>
      %cst_15 = arith.constant dense<0.000000e+00> : vector<128xf32>
      %17 = vector.multi_reduction <add>, %16, %cst_15 [0] : vector<128x128xf32> to vector<128xf32>
      %18 = vector.shape_cast %17 : vector<128xf32> to vector<1x128xf32>
      %19 = tpu.concatenate %15, %18 in 0 : vector<1x128xf32>, vector<1x128xf32> -> vector<2x128xf32>
      %20 = vector.shape_cast %19 : vector<2x128xf32> to vector<1x2x128xf32>
      %c0_16 = arith.constant 0 : index
      %c0_17 = arith.constant 0 : index
      %c0_18 = arith.constant 0 : index
      %21 = vector.load %arg6[%c0_16, %c0_17, %c0_18] : memref<1x2x128xf32, #tpu.memory_space<vmem>>, vector<1x2x128xf32>
      tpu.vector_store %arg6[%c0_16, %c0_17, %c0_18], %20 {strides = array<i32>} : memref<1x2x128xf32, #tpu.memory_space<vmem>>, vector<1x2x128xf32>,
    } else {
    }
    return
  }
  func.func @transform_0(%arg0: i32, %arg1: i32, %arg2: i32) -> (i32, i32) {
    %c0_i32 = arith.constant 0 : i32
    return %arg0, %arg2 : i32, i32
  }
  func.func @transform_1(%arg0: i32, %arg1: i32, %arg2: i32) -> (i32, i32) {
    %c0_i32 = arith.constant 0 : i32
    return %arg2, %arg1 : i32, i32
  }
  func.func @transform_2(%arg0: i32, %arg1: i32, %arg2: i32) -> (i32, i32) {
    %c0_i32 = arith.constant 0 : i32
    return %arg0, %arg1 : i32, i32
  }
  func.func @transform_3(%arg0: i32, %arg1: i32, %arg2: i32) -> (i32, i32, i32) {
    %c0_i32 = arith.constant 0 : i32
    %c0_i32_0 = arith.constant 0 : i32
    return %arg0, %c0_i32, %arg1 : i32, i32, i32
  }
}

module attributes {stable_mosaic.version = 11 : i64} {
  func.func @_matmul_stats_kernel(%arg0: i32, %arg1: i32, %arg2: i32, %arg3: memref<128x128xf32, #tpu.memory_space<vmem>>, %arg4: memref<128x128xf32, #tpu.memory_space<vmem>>, %arg5: memref<128x128xf32, #tpu.memory_space<vmem>>, %arg6: memref<1x2x128xf32, #tpu.memory_space<vmem>>, %arg7: memref<128x128xf32, #tpu.memory_space<vmem>>) attributes {dimension_semantics = [#tpu.dimension_semantics<parallel>, #tpu.dimension_semantics<parallel>, #tpu.dimension_semantics<arbitrary>], iteration_bounds = array<i64: 1, 1, 1>, scalar_prefetch = 0 : i64, scratch_operands = 1 : i64, tpu.core_type = #tpu.core_type<tc>, window_params = [{transform_indices = @transform_0, window_bounds = array<i64: 128, 128>}, {transform_indices = @transform_1, window_bounds = array<i64: 128, 128>}, {transform_indices = @transform_2, window_bounds = array<i64: 128, 128>}, {transform_indices = @transform_3, window_bounds = array<i64: 1, 2, 128>}]} {
    %c0_i32 = arith.constant 0 : i32
    %0 = arith.cmpi eq, %arg2, %c0_i32 : i32
    %1 = arith.extui %0 : i1 to i32
    %c0_i32_0 = arith.constant 0 : i32
    %2 = arith.cmpi ne, %1, %c0_i32_0 : i32
    scf.if %2 {
      %cst_10 = arith.constant 0.000000e+00 : f32
      %12 = vector.broadcast %cst_10 : f32 to vector<128x128xf32>
      %c0_11 = arith.constant 0 : index
      %c0_12 = arith.constant 0 : index
      %13 = vector.load %arg7[%c0_11, %c0_12] : memref<128x128xf32, #tpu.memory_space<vmem>>, vector<128x128xf32>
      tpu.vector_store %arg7[%c0_11, %c0_12], %12 {strides = array<i32>} : memref<128x128xf32, #tpu.memory_space<vmem>>, vector<128x128xf32>,
    } else {
    }
    %c0 = arith.constant 0 : index
    %c0_1 = arith.constant 0 : index
    %3 = vector.load %arg7[%c0, %c0_1] : memref<128x128xf32, #tpu.memory_space<vmem>>, vector<128x128xf32>
    %c0_2 = arith.constant 0 : index
    %c0_3 = arith.constant 0 : index
    %4 = vector.load %arg3[%c0_2, %c0_3] : memref<128x128xf32, #tpu.memory_space<vmem>>, vector<128x128xf32>
    %c0_4 = arith.constant 0 : index
    %c0_5 = arith.constant 0 : index
    %5 = vector.load %arg4[%c0_4, %c0_5] : memref<128x128xf32, #tpu.memory_space<vmem>>, vector<128x128xf32>
    %cst = arith.constant dense<0.000000e+00> : vector<128x128xf32>
    %6 = tpu.matmul %4, %5, %cst {dimension_numbers = #tpu.dot_dimension_numbers<[1], [0], [0], [1], [0, 0, 1, 1], [], []>} : vector<128x128xf32>, vector<128x128xf32>, vector<128x128xf32> -> vector<128x128xf32>
    %7 = arith.addf %3, %6 : vector<128x128xf32>
    %c0_6 = arith.constant 0 : index
    %c0_7 = arith.constant 0 : index
    %8 = vector.load %arg7[%c0_6, %c0_7] : memref<128x128xf32, #tpu.memory_space<vmem>>, vector<128x128xf32>
    tpu.vector_store %arg7[%c0_6, %c0_7], %7 {strides = array<i32>} : memref<128x128xf32, #tpu.memory_space<vmem>>, vector<128x128xf32>,
    %c0_i32_8 = arith.constant 0 : i32
    %9 = arith.cmpi eq, %arg2, %c0_i32_8 : i32
    %10 = arith.extui %9 : i1 to i32
    %c0_i32_9 = arith.constant 0 : i32
    %11 = arith.cmpi ne, %10, %c0_i32_9 : i32
    scf.if %11 {
      %c0_10 = arith.constant 0 : index
      %c0_11 = arith.constant 0 : index
      %12 = vector.load %arg7[%c0_10, %c0_11] : memref<128x128xf32, #tpu.memory_space<vmem>>, vector<128x128xf32>
      %c0_12 = arith.constant 0 : index
      %c0_13 = arith.constant 0 : index
      %13 = vector.load %arg5[%c0_12, %c0_13] : memref<128x128xf32, #tpu.memory_space<vmem>>, vector<128x128xf32>
      tpu.vector_store %arg5[%c0_12, %c0_13], %12 {strides = array<i32>} : memref<128x128xf32, #tpu.memory_space<vmem>>, vector<128x128xf32>,
      %cst_14 = arith.constant dense<0.000000e+00> : vector<128xf32>
      %14 = vector.multi_reduction <add>, %12, %cst_14 [0] : vector<128x128xf32> to vector<128xf32>
      %15 = vector.shape_cast %14 : vector<128xf32> to vector<1x128xf32>
      %16 = arith.mulf %12, %12 : vector<128x128xf32>
      %cst_15 = arith.constant dense<0.000000e+00> : vector<128xf32>
      %17 = vector.multi_reduction <add>, %16, %cst_15 [0] : vector<128x128xf32> to vector<128xf32>
      %18 = vector.shape_cast %17 : vector<128xf32> to vector<1x128xf32>
      %19 = tpu.concatenate %15, %18 in 0 : vector<1x128xf32>, vector<1x128xf32> -> vector<2x128xf32>
      %20 = vector.shape_cast %19 : vector<2x128xf32> to vector<1x2x128xf32>
      %c0_16 = arith.constant 0 : index
      %c0_17 = arith.constant 0 : index
      %c0_18 = arith.constant 0 : index
      %21 = vector.load %arg6[%c0_16, %c0_17, %c0_18] : memref<1x2x128xf32, #tpu.memory_space<vmem>>, vector<1x2x128xf32>
      tpu.vector_store %arg6[%c0_16, %c0_17, %c0_18], %20 {strides = array<i32>} : memref<1x2x128xf32, #tpu.memory_space<vmem>>, vector<1x2x128xf32>,
    } else {
    }
    return
  }
  func.func @transform_0(%arg0: i32, %arg1: i32, %arg2: i32) -> (i32, i32) {
    %c0_i32 = arith.constant 0 : i32
    return %arg0, %arg2 : i32, i32
  }
  func.func @transform_1(%arg0: i32, %arg1: i32, %arg2: i32) -> (i32, i32) {
    %c0_i32 = arith.constant 0 : i32
    return %arg2, %arg1 : i32, i32
  }
  func.func @transform_2(%arg0: i32, %arg1: i32, %arg2: i32) -> (i32, i32) {
    %c0_i32 = arith.constant 0 : i32
    return %arg0, %arg1 : i32, i32
  }
  func.func @transform_3(%arg0: i32, %arg1: i32, %arg2: i32) -> (i32, i32, i32) {
    %c0_i32 = arith.constant 0 : i32
    %c0_i32_0 = arith.constant 0 : i32
    return %arg0, %c0_i32, %arg1 : i32, i32, i32
  }
}

module attributes {stable_mosaic.version = 11 : i64} {
  func.func @kernel(%arg0: i32, %arg1: memref<128x128xf32, #tpu.memory_space<vmem>>, %arg2: memref<1x128xf32, #tpu.memory_space<vmem>>, %arg3: memref<1x128xf32, #tpu.memory_space<vmem>>, %arg4: memref<128x128xf32, #tpu.memory_space<vmem>>, %arg5: memref<128x128xf32, #tpu.memory_space<vmem>>) attributes {dimension_semantics = [#tpu.dimension_semantics<parallel>], iteration_bounds = array<i64: 1>, scalar_prefetch = 0 : i64, scratch_operands = 0 : i64, tpu.core_type = #tpu.core_type<tc>, window_params = [{transform_indices = @transform_0, window_bounds = array<i64: 128, 128>}, {pipeline_mode = #tpu.pipeline_mode<synchronous>, transform_indices = @transform_1, window_bounds = array<i64: 1, 128>}, {pipeline_mode = #tpu.pipeline_mode<synchronous>, transform_indices = @transform_2, window_bounds = array<i64: 1, 128>}, {transform_indices = @transform_3, window_bounds = array<i64: 128, 128>}, {transform_indices = @transform_4, window_bounds = array<i64: 128, 128>}]} {
    %c0 = arith.constant 0 : index
    %c0_0 = arith.constant 0 : index
    %0 = vector.load %arg1[%c0, %c0_0] : memref<128x128xf32, #tpu.memory_space<vmem>>, vector<128x128xf32>
    %c0_1 = arith.constant 0 : index
    %c0_2 = arith.constant 0 : index
    %1 = vector.load %arg2[%c0_1, %c0_2] : memref<1x128xf32, #tpu.memory_space<vmem>>, vector<1x128xf32>
    %2 = vector.broadcast %1 : vector<1x128xf32> to vector<128x128xf32>
    %3 = arith.mulf %0, %2 : vector<128x128xf32>
    %c0_3 = arith.constant 0 : index
    %c0_4 = arith.constant 0 : index
    %4 = vector.load %arg3[%c0_3, %c0_4] : memref<1x128xf32, #tpu.memory_space<vmem>>, vector<1x128xf32>
    %5 = vector.broadcast %4 : vector<1x128xf32> to vector<128x128xf32>
    %6 = arith.addf %3, %5 : vector<128x128xf32>
    %c0_5 = arith.constant 0 : index
    %c0_6 = arith.constant 0 : index
    %7 = vector.load %arg4[%c0_5, %c0_6] : memref<128x128xf32, #tpu.memory_space<vmem>>, vector<128x128xf32>
    %8 = arith.addf %6, %7 : vector<128x128xf32>
    %cst = arith.constant 0.000000e+00 : f32
    %9 = vector.broadcast %cst : f32 to vector<128x128xf32>
    %10 = arith.maximumf %8, %9 : vector<128x128xf32>
    %c0_7 = arith.constant 0 : index
    %c0_8 = arith.constant 0 : index
    %11 = vector.load %arg5[%c0_7, %c0_8] : memref<128x128xf32, #tpu.memory_space<vmem>>, vector<128x128xf32>
    tpu.vector_store %arg5[%c0_7, %c0_8], %10 {strides = array<i32>} : memref<128x128xf32, #tpu.memory_space<vmem>>, vector<128x128xf32>,
    return
  }
  func.func @transform_0(%arg0: i32) -> (i32, i32) {
    %c0_i32 = arith.constant 0 : i32
    %c0_i32_0 = arith.constant 0 : i32
    return %arg0, %c0_i32 : i32, i32
  }
  func.func @transform_1(%arg0: i32) -> (i32, i32) {
    %c0_i32 = arith.constant 0 : i32
    %c0_i32_0 = arith.constant 0 : i32
    %c0_i32_1 = arith.constant 0 : i32
    return %c0_i32, %c0_i32_0 : i32, i32
  }
  func.func @transform_2(%arg0: i32) -> (i32, i32) {
    %c0_i32 = arith.constant 0 : i32
    %c0_i32_0 = arith.constant 0 : i32
    %c0_i32_1 = arith.constant 0 : i32
    return %c0_i32, %c0_i32_0 : i32, i32
  }
  func.func @transform_3(%arg0: i32) -> (i32, i32) {
    %c0_i32 = arith.constant 0 : i32
    %c0_i32_0 = arith.constant 0 : i32
    return %arg0, %c0_i32 : i32, i32
  }
  func.func @transform_4(%arg0: i32) -> (i32, i32) {
    %c0_i32 = arith.constant 0 : i32
    %c0_i32_0 = arith.constant 0 : i32
    return %arg0, %c0_i32 : i32, i32
  }
}

</mosaic_0001>

<bundles_post_ra>
// kernel: bottleneck_forward.8
= control target key start
LH: loop header
LB: loop body
LE: loop exit
PB: predicated region body
PF: predicated region fallthrough
CT: control target
= control target key end

     0   :  { %s896_s0 = inlined_call_operand.vmem [shape: f32[512,128], index: 0, kind: input, shape index: {}, may-alias: {0,3}]   ;;  %s897_s1 = inlined_call_operand.vmem [shape: f32[1,128], index: 1, kind: input, shape index: {}]   ;;  %s898_s2 = inlined_call_operand.vmem [shape: f32[1,128], index: 2, kind: input, shape index: {}]   ;;  %s899_s3 = inlined_call_operand.vmem [shape: f32[512,128], index: 3, kind: output, shape index: {}, may-alias: {0,3}]  }
   0x1   :  { %v14_v0 = vld [vmem:[%s896_s0] sm:$0xff]  ;;  %v15_v4 = vld [vmem:[%s896_s0 + $0x8] sm:$0xff]  ;;  %v16_v5 = vld [vmem:[%s896_s0 + $0x10] sm:$0xff] }
   0x2   :  { %v380_v1 = vld [vmem:[%s897_s1] ss:$0 sm:$0xff]  ;;  %v17_v6 = vld [vmem:[%s896_s0 + $0x18] sm:$0xff]  ;;  %v19_v11 = vld [vmem:[%s896_s0 + $0x28] sm:$0xff] }
   0x3   :  { %v385_v2 = vld [vmem:[%s898_s2] ss:$0 sm:$0xff]  ;;  %v85_v3 = vmul.f32 %v380_v1, %v14_v0  ;;  %v86_v7 = vmul.f32 %v380_v1, %v15_v4  ;;  %v87_v8 = vmul.f32 %v380_v1, %v16_v5  ;;  %v88_v9 = vmul.f32 %v380_v1, %v17_v6  ;;  %v20_v12 = vld [vmem:[%s896_s0 + $0x30] sm:$0xff]  ;;  %v21_v17 = vld [vmem:[%s896_s0 + $0x38] sm:$0xff] }
   0x4   :  { %v18_v10 = vld [vmem:[%s896_s0 + $0x20] sm:$0xff]  ;;  %v90_v15 = vmul.f32 %v380_v1, %v19_v11  ;;  %v91_v16 = vmul.f32 %v380_v1, %v20_v12  ;;  %v92_v21 = vmul.f32 %v380_v1, %v21_v17  ;;  %v23_v27 = vld [vmem:[%s896_s0 + $0x48] sm:$0xff]  ;;  %v24_v28 = vld [vmem:[%s896_s0 + $0x50] sm:$0xff] }
   0x5   :  { %v156_v13 = vadd.f32 %v385_v2, %v85_v3  ;;  %v89_v14 = vmul.f32 %v380_v1, %v18_v10  ;;  %v157_v18 = vadd.f32 %v385_v2, %v86_v7  ;;  %v158_v19 = vadd.f32 %v385_v2, %v87_v8  ;;  %v22_v22 = vld [vmem:[%s896_s0 + $0x40] sm:$0xff]  ;;  %v25_v29 = vld [vmem:[%s896_s0 + $0x58] sm:$0xff]  ;;  %v27_v35 = vld [vmem:[%s896_s0 + $0x68] sm:$0xff] }
   0x6   :  { %v159_v20 = vadd.f32 %v385_v2, %v88_v9  ;;  %v161_v25 = vadd.f32 %v385_v2, %v90_v15  ;;  %v162_v26 = vadd.f32 %v385_v2, %v91_v16  ;;  %v163_v33 = vadd.f32 %v385_v2, %v92_v21  ;;  %v26_v34 = vld [vmem:[%s896_s0 + $0x60] sm:$0xff]  ;;  %v28_v36 = vld [vmem:[%s896_s0 + $0x70] sm:$0xff] }
   0x7   :  { %v220_v23 = vmax.f32 %v156_v13, 0.0  ;;  %v160_v24 = vadd.f32 %v385_v2, %v89_v14  ;;  %v221_v30 = vmax.f32 %v157_v18, 0.0  ;;  %v222_v31 = vmax.f32 %v158_v19, 0.0 }
   0x8   :  { %v223_v32 = vmax.f32 %v159_v20, 0.0  ;;  %v225_v38 = vmax.f32 %v161_v25, 0.0  ;;  %v226_v39 = vmax.f32 %v162_v26, 0.0  ;;  %v93_v40 = vmul.f32 %v380_v1, %v22_v22 }
   0x9   :  { %284 = vst [vmem:[%s899_s3] sm:$0xff] %v220_v23  ;;  %v224_v37 = vmax.f32 %v160_v24, 0.0  ;;  %v227_v42 = vmax.f32 %v163_v33, 0.0  ;;  %v94_v43 = vmul.f32 %v380_v1, %v23_v27  ;;  %v95_v44 = vmul.f32 %v380_v1, %v24_v28 }
   0xa   :  { %v96_v45 = vmul.f32 %v380_v1, %v25_v29  ;;  %v164_v46 = vadd.f32 %v385_v2, %v93_v40  ;;  %v97_v47 = vmul.f32 %v380_v1, %v26_v34  ;;  %v98_v48 = vmul.f32 %v380_v1, %v27_v35 }
   0xb   :  { %v99_v49 = vmul.f32 %v380_v1, %v28_v36  ;;  %v165_v50 = vadd.f32 %v385_v2, %v94_v43  ;;  %v166_v51 = vadd.f32 %v385_v2, %v95_v44 }
   0xc   :  { %v167_v52 = vadd.f32 %v385_v2, %v96_v45  ;;  %v228_v55 = vmax.f32 %v164_v46, 0.0  ;;  %v168_v56 = vadd.f32 %v385_v2, %v97_v47  ;;  %v169_v57 = vadd.f32 %v385_v2, %v98_v48 }
   0xd   :  { %v170_v58 = vadd.f32 %v385_v2, %v99_v49  ;;  %v229_v62 = vmax.f32 %v165_v50, 0.0  ;;  %v230_v63 = vmax.f32 %v166_v51, 0.0 }
   0xe   :  { %v231_v0 = vmax.f32 %v167_v52, 0.0  ;;  %v232_v7 = vmax.f32 %v168_v56, 0.0  ;;  %v233_v8 = vmax.f32 %v169_v57, 0.0 }
   0xf   :  { %v234_v9 = vmax.f32 %v170_v58, 0.0 }
  0x10   :  { %v29_v41 = vld [vmem:[%s896_s0 + $0x78] sm:$0xff] }
  0x11   :  { %285 = vst [vmem:[%s899_s3 + $0x8] sm:$0xff] %v221_v30  ;;  %286 = vst [vmem:[%s899_s3 + $0x10] sm:$0xff] %v222_v31  ;;  %v100_v53 = vmul.f32 %v380_v1, %v29_v41 }
  0x12   :  { %287 = vst [vmem:[%s899_s3 + $0x18] sm:$0xff] %v223_v32  ;;  %288 = vst [vmem:[%s899_s3 + $0x20] sm:$0xff] %v224_v37 }
  0x13   :  { %289 = vst [vmem:[%s899_s3 + $0x28] sm:$0xff] %v225_v38  ;;  %290 = vst [vmem:[%s899_s3 + $0x30] sm:$0xff] %v226_v39  ;;  %v171_v3 = vadd.f32 %v385_v2, %v100_v53 }
  0x14   :  { %291 = vst [vmem:[%s899_s3 + $0x38] sm:$0xff] %v227_v42 }
  0x15   :  { %v235_v12 = vmax.f32 %v171_v3, 0.0 }
  0x1b   :  { %v30_v54 = vld [vmem:[%s896_s0 + $0x80] sm:$0xff]  ;;  %v31_v59 = vld [vmem:[%s896_s0 + $0x88] sm:$0xff]  ;;  %v32_v60 = vld [vmem:[%s896_s0 + $0x90] sm:$0xff] }
  0x1c   :  { %v33_v61 = vld [vmem:[%s896_s0 + $0x98] sm:$0xff]  ;;  %v34_v4 = vld [vmem:[%s896_s0 + $0xa0] sm:$0xff]  ;;  %v35_v5 = vld [vmem:[%s896_s0 + $0xa8] sm:$0xff]  ;;  %v101_v10 = vmul.f32 %v380_v1, %v30_v54  ;;  %v102_v13 = vmul.f32 %v380_v1, %v31_v59  ;;  %v103_v14 = vmul.f32 %v380_v1, %v32_v60 }
  0x1d   :  { %v36_v6 = vld [vmem:[%s896_s0 + $0xb0] sm:$0xff]  ;;  %v104_v15 = vmul.f32 %v380_v1, %v33_v61  ;;  %v105_v17 = vmul.f32 %v380_v1, %v34_v4  ;;  %v106_v18 = vmul.f32 %v380_v1, %v35_v5 }
  0x1e   :  { %292 = vst [vmem:[%s899_s3 + $0x40] sm:$0xff] %v228_v55  ;;  %v172_v16 = vadd.f32 %v385_v2, %v101_v10  ;;  %v107_v19 = vmul.f32 %v380_v1, %v36_v6  ;;  %v173_v20 = vadd.f32 %v385_v2, %v102_v13  ;;  %v174_v21 = vadd.f32 %v385_v2, %v103_v14 }
  0x1f   :  { %v175_v22 = vadd.f32 %v385_v2, %v104_v15  ;;  %v176_v26 = vadd.f32 %v385_v2, %v105_v17  ;;  %v177_v27 = vadd.f32 %v385_v2, %v106_v18 }
  0x20   :  { %v236_v25 = vmax.f32 %v172_v16, 0.0  ;;  %v178_v28 = vadd.f32 %v385_v2, %v107_v19  ;;  %v237_v32 = vmax.f32 %v173_v20, 0.0  ;;  %v238_v33 = vmax.f32 %v174_v21, 0.0 }
  0x21   :  { %v239_v34 = vmax.f32 %v175_v22, 0.0  ;;  %v240_v39 = vmax.f32 %v176_v26, 0.0  ;;  %v241_v40 = vmax.f32 %v177_v27, 0.0 }
  0x22   :  { %v242_v41 = vmax.f32 %v178_v28, 0.0 }
  0x25   :  { %v37_v11 = vld [vmem:[%s896_s0 + $0xb8] sm:$0xff] }
  0x26   :  { %293 = vst [vmem:[%s899_s3 + $0x48] sm:$0xff] %v229_v62  ;;  %294 = vst [vmem:[%s899_s3 + $0x50] sm:$0xff] %v230_v63  ;;  %v108_v23 = vmul.f32 %v380_v1, %v37_v11 }
  0x27   :  { %295 = vst [vmem:[%s899_s3 + $0x58] sm:$0xff] %v231_v0  ;;  %296 = vst [vmem:[%s899_s3 + $0x60] sm:$0xff] %v232_v7 }
  0x28   :  { %297 = vst [vmem:[%s899_s3 + $0x68] sm:$0xff] %v233_v8  ;;  %298 = vst [vmem:[%s899_s3 + $0x70] sm:$0xff] %v234_v9  ;;  %v179_v35 = vadd.f32 %v385_v2, %v108_v23 }
  0x29   :  { %299 = vst [vmem:[%s899_s3 + $0x78] sm:$0xff] %v235_v12 }
  0x2a   :  { %v243_v44 = vmax.f32 %v179_v35, 0.0 }
  0x30   :  { %v38_v24 = vld [vmem:[%s896_s0 + $0xc0] sm:$0xff]  ;;  %v39_v29 = vld [vmem:[%s896_s0 + $0xc8] sm:$0xff]  ;;  %v40_v30 = vld [vmem:[%s896_s0 + $0xd0] sm:$0xff] }
  0x31   :  { %v41_v31 = vld [vmem:[%s896_s0 + $0xd8] sm:$0xff]  ;;  %v42_v36 = vld [vmem:[%s896_s0 + $0xe0] sm:$0xff]  ;;  %v43_v37 = vld [vmem:[%s896_s0 + $0xe8] sm:$0xff]  ;;  %v109_v42 = vmul.f32 %v380_v1, %v38_v24  ;;  %v110_v45 = vmul.f32 %v380_v1, %v39_v29  ;;  %v111_v46 = vmul.f32 %v380_v1, %v40_v30 }
  0x32   :  { %v44_v38 = vld [vmem:[%s896_s0 + $0xf0] sm:$0xff]  ;;  %v112_v47 = vmul.f32 %v380_v1, %v41_v31  ;;  %v113_v49 = vmul.f32 %v380_v1, %v42_v36  ;;  %v114_v50 = vmul.f32 %v380_v1, %v43_v37 }
  0x33   :  { %300 = vst [vmem:[%s899_s3 + $0x80] sm:$0xff] %v236_v25  ;;  %v180_v48 = vadd.f32 %v385_v2, %v109_v42  ;;  %v115_v51 = vmul.f32 %v380_v1, %v44_v38  ;;  %v181_v52 = vadd.f32 %v385_v2, %v110_v45  ;;  %v182_v53 = vadd.f32 %v385_v2, %v111_v46 }
  0x34   :  { %v183_v54 = vadd.f32 %v385_v2, %v112_v47  ;;  %v184_v58 = vadd.f32 %v385_v2, %v113_v49  ;;  %v185_v59 = vadd.f32 %v385_v2, %v114_v50 }
  0x35   :  { %v244_v57 = vmax.f32 %v180_v48, 0.0  ;;  %v186_v60 = vadd.f32 %v385_v2, %v115_v51  ;;  %v245_v0 = vmax.f32 %v181_v52, 0.0  ;;  %v246_v3 = vmax.f32 %v182_v53, 0.0 }
  0x36   :  { %v247_v4 = vmax.f32 %v183_v54, 0.0  ;;  %v248_v9 = vmax.f32 %v184_v58, 0.0  ;;  %v249_v10 = vmax.f32 %v185_v59, 0.0 }
  0x37   :  { %v250_v11 = vmax.f32 %v186_v60, 0.0 }
  0x3a   :  { %v45_v43 = vld [vmem:[%s896_s0 + $0xf8] sm:$0xff] }
  0x3b   :  { %301 = vst [vmem:[%s899_s3 + $0x88] sm:$0xff] %v237_v32  ;;  %302 = vst [vmem:[%s899_s3 + $0x90] sm:$0xff] %v238_v33  ;;  %v116_v55 = vmul.f32 %v380_v1, %v45_v43 }
  0x3c   :  { %303 = vst [vmem:[%s899_s3 + $0x98] sm:$0xff] %v239_v34  ;;  %304 = vst [vmem:[%s899_s3 + $0xa0] sm:$0xff] %v240_v39 }
  0x3d   :  { %305 = vst [vmem:[%s899_s3 + $0xa8] sm:$0xff] %v241_v40  ;;  %306 = vst [vmem:[%s899_s3 + $0xb0] sm:$0xff] %v242_v41  ;;  %v187_v5 = vadd.f32 %v385_v2, %v116_v55 }
  0x3e   :  { %307 = vst [vmem:[%s899_s3 + $0xb8] sm:$0xff] %v243_v44 }
  0x3f   :  { %v251_v14 = vmax.f32 %v187_v5, 0.0 }
  0x45   :  { %v46_v56 = vld [vmem:[%s896_s0 + $0x100] sm:$0xff]  ;;  %v47_v61 = vld [vmem:[%s896_s0 + $0x108] sm:$0xff]  ;;  %v48_v62 = vld [vmem:[%s896_s0 + $0x110] sm:$0xff] }
  0x46   :  { %v49_v63 = vld [vmem:[%s896_s0 + $0x118] sm:$0xff]  ;;  %v50_v6 = vld [vmem:[%s896_s0 + $0x120] sm:$0xff]  ;;  %v51_v7 = vld [vmem:[%s896_s0 + $0x128] sm:$0xff]  ;;  %v117_v12 = vmul.f32 %v380_v1, %v46_v56  ;;  %v118_v15 = vmul.f32 %v380_v1, %v47_v61  ;;  %v119_v16 = vmul.f32 %v380_v1, %v48_v62 }
  0x47   :  { %v52_v8 = vld [vmem:[%s896_s0 + $0x130] sm:$0xff]  ;;  %v120_v17 = vmul.f32 %v380_v1, %v49_v63  ;;  %v121_v19 = vmul.f32 %v380_v1, %v50_v6  ;;  %v122_v20 = vmul.f32 %v380_v1, %v51_v7 }
  0x48   :  { %308 = vst [vmem:[%s899_s3 + $0xc0] sm:$0xff] %v244_v57  ;;  %v188_v18 = vadd.f32 %v385_v2, %v117_v12  ;;  %v123_v21 = vmul.f32 %v380_v1, %v52_v8  ;;  %v189_v22 = vadd.f32 %v385_v2, %v118_v15  ;;  %v190_v23 = vadd.f32 %v385_v2, %v119_v16 }
  0x49   :  { %v191_v24 = vadd.f32 %v385_v2, %v120_v17  ;;  %v192_v28 = vadd.f32 %v385_v2, %v121_v19  ;;  %v193_v29 = vadd.f32 %v385_v2, %v122_v20 }
  0x4a   :  { %v252_v27 = vmax.f32 %v188_v18, 0.0  ;;  %v194_v30 = vadd.f32 %v385_v2, %v123_v21  ;;  %v253_v34 = vmax.f32 %v189_v22, 0.0  ;;  %v254_v35 = vmax.f32 %v190_v23, 0.0 }
  0x4b   :  { %v255_v36 = vmax.f32 %v191_v24, 0.0  ;;  %v256_v41 = vmax.f32 %v192_v28, 0.0  ;;  %v257_v42 = vmax.f32 %v193_v29, 0.0 }
  0x4c   :  { %v258_v43 = vmax.f32 %v194_v30, 0.0 }
  0x4f   :  { %v53_v13 = vld [vmem:[%s896_s0 + $0x138] sm:$0xff] }
  0x50   :  { %309 = vst [vmem:[%s899_s3 + $0xc8] sm:$0xff] %v245_v0  ;;  %310 = vst [vmem:[%s899_s3 + $0xd0] sm:$0xff] %v246_v3  ;;  %v124_v25 = vmul.f32 %v380_v1, %v53_v13 }
  0x51   :  { %311 = vst [vmem:[%s899_s3 + $0xd8] sm:$0xff] %v247_v4  ;;  %312 = vst [vmem:[%s899_s3 + $0xe0] sm:$0xff] %v248_v9 }
  0x52   :  { %313 = vst [vmem:[%s899_s3 + $0xe8] sm:$0xff] %v249_v10  ;;  %314 = vst [vmem:[%s899_s3 + $0xf0] sm:$0xff] %v250_v11  ;;  %v195_v37 = vadd.f32 %v385_v2, %v124_v25 }
  0x53   :  { %315 = vst [vmem:[%s899_s3 + $0xf8] sm:$0xff] %v251_v14 }
  0x54   :  { %v259_v46 = vmax.f32 %v195_v37, 0.0 }
  0x5a   :  { %v54_v26 = vld [vmem:[%s896_s0 + $0x140] sm:$0xff]  ;;  %v55_v31 = vld [vmem:[%s896_s0 + $0x148] sm:$0xff]  ;;  %v56_v32 = vld [vmem:[%s896_s0 + $0x150] sm:$0xff] }
  0x5b   :  { %v57_v33 = vld [vmem:[%s896_s0 + $0x158] sm:$0xff]  ;;  %v58_v38 = vld [vmem:[%s896_s0 + $0x160] sm:$0xff]  ;;  %v59_v39 = vld [vmem:[%s896_s0 + $0x168] sm:$0xff]  ;;  %v125_v44 = vmul.f32 %v380_v1, %v54_v26  ;;  %v126_v47 = vmul.f32 %v380_v1, %v55_v31  ;;  %v127_v48 = vmul.f32 %v380_v1, %v56_v32 }
  0x5c   :  { %v60_v40 = vld [vmem:[%s896_s0 + $0x170] sm:$0xff]  ;;  %v128_v49 = vmul.f32 %v380_v1, %v57_v33  ;;  %v129_v51 = vmul.f32 %v380_v1, %v58_v38  ;;  %v130_v52 = vmul.f32 %v380_v1, %v59_v39 }
  0x5d   :  { %316 = vst [vmem:[%s899_s3 + $0x100] sm:$0xff] %v252_v27  ;;  %v196_v50 = vadd.f32 %v385_v2, %v125_v44  ;;  %v131_v53 = vmul.f32 %v380_v1, %v60_v40  ;;  %v197_v54 = vadd.f32 %v385_v2, %v126_v47  ;;  %v198_v55 = vadd.f32 %v385_v2, %v127_v48 }
  0x5e   :  { %v199_v56 = vadd.f32 %v385_v2, %v128_v49  ;;  %v200_v60 = vadd.f32 %v385_v2, %v129_v51  ;;  %v201_v61 = vadd.f32 %v385_v2, %v130_v52 }
  0x5f   :  { %v260_v59 = vmax.f32 %v196_v50, 0.0  ;;  %v202_v62 = vadd.f32 %v385_v2, %v131_v53  ;;  %v261_v4 = vmax.f32 %v197_v54, 0.0  ;;  %v262_v5 = vmax.f32 %v198_v55, 0.0 }
  0x60   :  { %v263_v6 = vmax.f32 %v199_v56, 0.0  ;;  %v264_v11 = vmax.f32 %v200_v60, 0.0  ;;  %v265_v12 = vmax.f32 %v201_v61, 0.0 }
  0x61   :  { %v266_v13 = vmax.f32 %v202_v62, 0.0 }
  0x64   :  { %v61_v45 = vld [vmem:[%s896_s0 + $0x178] sm:$0xff] }
  0x65   :  { %317 = vst [vmem:[%s899_s3 + $0x108] sm:$0xff] %v253_v34  ;;  %318 = vst [vmem:[%s899_s3 + $0x110] sm:$0xff] %v254_v35  ;;  %v132_v57 = vmul.f32 %v380_v1, %v61_v45 }
  0x66   :  { %319 = vst [vmem:[%s899_s3 + $0x118] sm:$0xff] %v255_v36  ;;  %320 = vst [vmem:[%s899_s3 + $0x120] sm:$0xff] %v256_v41 }
  0x67   :  { %321 = vst [vmem:[%s899_s3 + $0x128] sm:$0xff] %v257_v42  ;;  %322 = vst [vmem:[%s899_s3 + $0x130] sm:$0xff] %v258_v43  ;;  %v203_v7 = vadd.f32 %v385_v2, %v132_v57 }
  0x68   :  { %323 = vst [vmem:[%s899_s3 + $0x138] sm:$0xff] %v259_v46 }
  0x69   :  { %v267_v16 = vmax.f32 %v203_v7, 0.0 }
  0x6f   :  { %v62_v58 = vld [vmem:[%s896_s0 + $0x180] sm:$0xff]  ;;  %v63_v63 = vld [vmem:[%s896_s0 + $0x188] sm:$0xff]  ;;  %v64_v0 = vld [vmem:[%s896_s0 + $0x190] sm:$0xff] }
  0x70   :  { %v65_v3 = vld [vmem:[%s896_s0 + $0x198] sm:$0xff]  ;;  %v66_v8 = vld [vmem:[%s896_s0 + $0x1a0] sm:$0xff]  ;;  %v67_v9 = vld [vmem:[%s896_s0 + $0x1a8] sm:$0xff]  ;;  %v133_v14 = vmul.f32 %v380_v1, %v62_v58  ;;  %v134_v17 = vmul.f32 %v380_v1, %v63_v63  ;;  %v135_v18 = vmul.f32 %v380_v1, %v64_v0 }
  0x71   :  { %v68_v10 = vld [vmem:[%s896_s0 + $0x1b0] sm:$0xff]  ;;  %v136_v19 = vmul.f32 %v380_v1, %v65_v3  ;;  %v137_v21 = vmul.f32 %v380_v1, %v66_v8  ;;  %v138_v22 = vmul.f32 %v380_v1, %v67_v9 }
  0x72   :  { %324 = vst [vmem:[%s899_s3 + $0x140] sm:$0xff] %v260_v59  ;;  %v204_v20 = vadd.f32 %v385_v2, %v133_v14  ;;  %v139_v23 = vmul.f32 %v380_v1, %v68_v10  ;;  %v205_v24 = vadd.f32 %v385_v2, %v134_v17  ;;  %v206_v25 = vadd.f32 %v385_v2, %v135_v18 }
  0x73   :  { %v207_v26 = vadd.f32 %v385_v2, %v136_v19  ;;  %v208_v30 = vadd.f32 %v385_v2, %v137_v21  ;;  %v209_v31 = vadd.f32 %v385_v2, %v138_v22 }
  0x74   :  { %v268_v29 = vmax.f32 %v204_v20, 0.0  ;;  %v210_v32 = vadd.f32 %v385_v2, %v139_v23  ;;  %v269_v36 = vmax.f32 %v205_v24, 0.0  ;;  %v270_v37 = vmax.f32 %v206_v25, 0.0 }
  0x75   :  { %v271_v38 = vmax.f32 %v207_v26, 0.0  ;;  %v272_v43 = vmax.f32 %v208_v30, 0.0  ;;  %v273_v44 = vmax.f32 %v209_v31, 0.0 }
  0x76   :  { %v274_v45 = vmax.f32 %v210_v32, 0.0 }
  0x79   :  { %v69_v15 = vld [vmem:[%s896_s0 + $0x1b8] sm:$0xff] }
  0x7a   :  { %325 = vst [vmem:[%s899_s3 + $0x148] sm:$0xff] %v261_v4  ;;  %326 = vst [vmem:[%s899_s3 + $0x150] sm:$0xff] %v262_v5  ;;  %v140_v27 = vmul.f32 %v380_v1, %v69_v15 }
  0x7b   :  { %327 = vst [vmem:[%s899_s3 + $0x158] sm:$0xff] %v263_v6  ;;  %328 = vst [vmem:[%s899_s3 + $0x160] sm:$0xff] %v264_v11 }
  0x7c   :  { %329 = vst [vmem:[%s899_s3 + $0x168] sm:$0xff] %v265_v12  ;;  %330 = vst [vmem:[%s899_s3 + $0x170] sm:$0xff] %v266_v13  ;;  %v211_v39 = vadd.f32 %v385_v2, %v140_v27 }
  0x7d   :  { %331 = vst [vmem:[%s899_s3 + $0x178] sm:$0xff] %v267_v16 }
  0x7e   :  { %v275_v48 = vmax.f32 %v211_v39, 0.0 }
  0x84   :  { %v70_v28 = vld [vmem:[%s896_s0 + $0x1c0] sm:$0xff]  ;;  %v71_v33 = vld [vmem:[%s896_s0 + $0x1c8] sm:$0xff]  ;;  %v72_v34 = vld [vmem:[%s896_s0 + $0x1d0] sm:$0xff] }
  0x85   :  { %v73_v35 = vld [vmem:[%s896_s0 + $0x1d8] sm:$0xff]  ;;  %v74_v40 = vld [vmem:[%s896_s0 + $0x1e0] sm:$0xff]  ;;  %v75_v41 = vld [vmem:[%s896_s0 + $0x1e8] sm:$0xff]  ;;  %v141_v46 = vmul.f32 %v380_v1, %v70_v28  ;;  %v142_v49 = vmul.f32 %v380_v1, %v71_v33  ;;  %v143_v50 = vmul.f32 %v380_v1, %v72_v34 }
  0x86   :  { %v76_v42 = vld [vmem:[%s896_s0 + $0x1f0] sm:$0xff]  ;;  %v144_v51 = vmul.f32 %v380_v1, %v73_v35  ;;  %v145_v53 = vmul.f32 %v380_v1, %v74_v40  ;;  %v146_v54 = vmul.f32 %v380_v1, %v75_v41 }
  0x87   :  { %332 = vst [vmem:[%s899_s3 + $0x180] sm:$0xff] %v268_v29  ;;  %v212_v52 = vadd.f32 %v385_v2, %v141_v46  ;;  %v147_v55 = vmul.f32 %v380_v1, %v76_v42  ;;  %v213_v56 = vadd.f32 %v385_v2, %v142_v49  ;;  %v214_v57 = vadd.f32 %v385_v2, %v143_v50 }
  0x88   :  { %v215_v58 = vadd.f32 %v385_v2, %v144_v51  ;;  %v216_v61 = vadd.f32 %v385_v2, %v145_v53  ;;  %v217_v62 = vadd.f32 %v385_v2, %v146_v54 }
  0x89   :  { %v276_v60 = vmax.f32 %v212_v52, 0.0  ;;  %v218_v63 = vadd.f32 %v385_v2, %v147_v55  ;;  %v277_v0 = vmax.f32 %v213_v56, 0.0  ;;  %v278_v3 = vmax.f32 %v214_v57, 0.0 }
  0x8a   :  { %v279_v4 = vmax.f32 %v215_v58, 0.0  ;;  %v280_v6 = vmax.f32 %v216_v61, 0.0  ;;  %v281_v7 = vmax.f32 %v217_v62, 0.0 }
  0x8b   :  { %v282_v8 = vmax.f32 %v218_v63, 0.0 }
  0x8e   :  { %v77_v47 = vld [vmem:[%s896_s0 + $0x1f8] sm:$0xff] }
  0x8f   :  { %333 = vst [vmem:[%s899_s3 + $0x188] sm:$0xff] %v269_v36  ;;  %334 = vst [vmem:[%s899_s3 + $0x190] sm:$0xff] %v270_v37  ;;  %v148_v59 = vmul.f32 %v380_v1, %v77_v47 }
  0x90   :  { %335 = vst [vmem:[%s899_s3 + $0x198] sm:$0xff] %v271_v38  ;;  %336 = vst [vmem:[%s899_s3 + $0x1a0] sm:$0xff] %v272_v43 }
  0x91   :  { %337 = vst [vmem:[%s899_s3 + $0x1a8] sm:$0xff] %v273_v44  ;;  %338 = vst [vmem:[%s899_s3 + $0x1b0] sm:$0xff] %v274_v45  ;;  %v219_v5 = vadd.f32 %v385_v2, %v148_v59 }
  0x92   :  { %339 = vst [vmem:[%s899_s3 + $0x1b8] sm:$0xff] %v275_v48  ;;  %340 = vst [vmem:[%s899_s3 + $0x1c0] sm:$0xff] %v276_v60 }
  0x93   :  { %341 = vst [vmem:[%s899_s3 + $0x1c8] sm:$0xff] %v277_v0  ;;  %342 = vst [vmem:[%s899_s3 + $0x1d0] sm:$0xff] %v278_v3  ;;  %v283_v1 = vmax.f32 %v219_v5, 0.0 }
  0x94   :  { %343 = vst [vmem:[%s899_s3 + $0x1d8] sm:$0xff] %v279_v4  ;;  %344 = vst [vmem:[%s899_s3 + $0x1e0] sm:$0xff] %v280_v6 }
  0x95   :  { %345 = vst [vmem:[%s899_s3 + $0x1e8] sm:$0xff] %v281_v7  ;;  %346 = vst [vmem:[%s899_s3 + $0x1f0] sm:$0xff] %v282_v8 }
  0x96   :  { %347 = vst [vmem:[%s899_s3 + $0x1f8] sm:$0xff] %v283_v1 }

// kernel: bottleneck_forward.7
= control target key start
LH: loop header
LB: loop body
LE: loop exit
PB: predicated region body
PF: predicated region fallthrough
CT: control target
= control target key end

     0   :  { %s1242_s12 = smov 0   ;;  %s1244_s13 = smov 0   ;;  %s1484_s0 = inlined_call_operand.vmem [shape: f32[512,128], index: 0, kind: input, shape index: {}]   ;;  %s1485_s1 = inlined_call_operand.vmem [shape: f32[128,128], index: 1, kind: input, shape index: {}]   ;;  %s1486_s2 = inlined_call_operand.vmem [shape: f32[512,128], index: 2, kind: output, shape index: {0}]   ;;  %s1487_s3 = inlined_call_operand.vmem [shape: f32[2,2,128], index: 3, kind: output, shape index: {1}]  }
   0x1   :  { %s1246_s14 = smov 0  }
   0x2 LB: > { %s33_s15 = sadd.s32 1, %s1216_s13  ;;  %p990_p0 = scmp.ge.s32.totalorder %s1220_s14, 1  ;;  %s1220_s14 = sphi %s1246_s14, %s14_s14   ;;  %s1216_s13 = sphi %s1244_s13, %s1489_s13   ;;  %s1212_s12 = sphi %s1242_s12, %s1488_s12  }
   0x3   : > { %p35_p1 = scmp.ge.s32.totalorder %s33_s15, 2  ;;  %p185_p2 = scmp.lt.s32.totalorder %s1220_s14, 3 }
   0x5   : > { %s1491_s15 = smov (%p35_p1, %s33_s15), 0  ;;  %p186_p3 = pnand %p990_p0, %p185_p2 }
   0x6   : > { %v364_v0 = vld [vmem:[%s1485_s1] sm:$0xff] (!%p186_p3)  ;;  %v365_v1 = vld [vmem:[%s1485_s1 + $0x8] sm:$0xff] (!%p186_p3)  ;;  %v366_v2 = vld [vmem:[%s1485_s1 + $0x10] sm:$0xff] (!%p186_p3)  ;;  %s991_s22 = sshll.u32 (!%p186_p3), %s1212_s12, 5  ;;  %p257_p5 = scmp.lt.s32.totalorder (!%p186_p3), %s1212_s12, 1  ;;  %vm842_vm0 = vcmask (!%p186_p3), 1040384  }
   0x7   : > { %189 = sbr.rel (%p186_p3) target bundleno = 334 (0x14e), region = 28  ;;  %v1126_v3 = vpack.c.bf16 (!%p186_p3), %v365_v1, %v364_v0  ;;  %v367_v4 = vld [vmem:[%s1485_s1 + $0x18] sm:$0xff] (!%p186_p3)  ;;  %p231_p4 = scmp.lt.s32.totalorder (!%p186_p3), %s991_s22, 63  ;;  %v368_v6 = vld [vmem:[%s1485_s1 + $0x20] sm:$0xff] (!%p186_p3)  ;;  %v369_v7 = vld [vmem:[%s1485_s1 + $0x28] sm:$0xff] (!%p186_p3) }
   0x8   : > { %v1130_v5 = vpack.c.bf16 (!%p186_p3), %v367_v4, %v366_v2  ;;  %v1134_v8 = vpack.c.bf16 (!%p186_p3), %v369_v7, %v368_v6  ;;  %v370_v9 = vld [vmem:[%s1485_s1 + $0x30] sm:$0xff] (!%p186_p3)  ;;  %v371_v10 = vld [vmem:[%s1485_s1 + $0x38] sm:$0xff] (!%p186_p3)  ;;  %v372_v13 = vld [vmem:[%s1485_s1 + $0x40] sm:$0xff] (!%p186_p3) }
   0x9   : > { %1127 = vmatprep.subr.bf16.mxu0 (!%p186_p3), %v1126_v3  ;;  %1158 = vmatprep.subr.bf16.mxu1 (!%p186_p3), %v1126_v3  ;;  %v1138_v12 = vpack.c.bf16 (!%p186_p3), %v371_v10, %v370_v9  ;;  %v373_v14 = vld [vmem:[%s1485_s1 + $0x48] sm:$0xff] (!%p186_p3)  ;;  %v374_v17 = vld [vmem:[%s1485_s1 + $0x50] sm:$0xff] (!%p186_p3)  ;;  %v375_v18 = vld [vmem:[%s1485_s1 + $0x58] sm:$0xff] (!%p186_p3) }
   0xa   : > { %1129 = vmatpush3.bf16.msra.mxu0 (!%p186_p3), %v1126_v3  ;;  %1166 = vmatpush3.bf16.msra.mxu1 (!%p186_p3), %v1126_v3  ;;  %v1142_v16 = vpack.c.bf16 (!%p186_p3), %v373_v14, %v372_v13  ;;  %v1146_v19 = vpack.c.bf16 (!%p186_p3), %v375_v18, %v374_v17  ;;  %v376_v20 = vld [vmem:[%s1485_s1 + $0x60] sm:$0xff] (!%p186_p3)  ;;  %v377_v21 = vld [vmem:[%s1485_s1 + $0x68] sm:$0xff] (!%p186_p3)  ;;  %v378_v23 = vld [vmem:[%s1485_s1 + $0x70] sm:$0xff] (!%p186_p3) }
   0xb   : > { %1131 = vmatprep.subr.bf16.mxu0 (!%p186_p3), %v1130_v5  ;;  %1159 = vmatprep.subr.bf16.mxu1 (!%p186_p3), %v1130_v5  ;;  %v1150_v22 = vpack.c.bf16 (!%p186_p3), %v377_v21, %v376_v20  ;;  %v379_v24 = vld [vmem:[%s1485_s1 + $0x78] sm:$0xff] (!%p186_p3) }
   0xc   : > { %v1154_v25 = vpack.c.bf16 (!%p186_p3), %v379_v24, %v378_v23 }
   0xe   : > { %s1493_s22 = smov (!%p231_p4, %s991_s22), 63  ;;  %1133 = vmatpush3.bf16.msra.mxu0 %v1130_v5  ;;  %1167 = vmatpush3.bf16.msra.mxu1 %v1130_v5  ;;  %s1495_s12 = smov (!%p257_p5, %s1212_s12), 1 }
   0xf   : > { %s992_s29 = sshll.u32 %s1493_s22, 3  ;;  %1135 = vmatprep.subr.bf16.mxu0 %v1134_v8  ;;  %1160 = vmatprep.subr.bf16.mxu1 %v1134_v8  ;;  %s995_s22 = sshll.u32 %s1495_s12, 1 }
  0x10   : > { %s1295_s9 = scalar_lea.vmem %s1484_s0, %s992_s29  ;;  %s1358_s7 = scalar_lea.vmem %s1486_s2, %s992_s29 }
  0x11   : > { %v332_v11 = vld [vmem:[%s1295_s9] sm:$0xff]  ;;  %v333_v26 = vld [vmem:[%s1295_s9 + $0x8] sm:$0xff]  ;;  %v334_v27 = vld [vmem:[%s1295_s9 + $0x10] sm:$0xff] }
  0x12   : > { %1078 = vmatprep.mubr.f32.mxu0 %v332_v11  ;;  %1137 = vmatpush3.bf16.msra.mxu0 %v1134_v8  ;;  %v348_v15 = vld [vmem:[%s1295_s9 + $0x80] sm:$0xff]  ;;  %v349_v28 = vld [vmem:[%s1295_s9 + $0x88] sm:$0xff]  ;;  %v350_v29 = vld [vmem:[%s1295_s9 + $0x90] sm:$0xff] }
  0x13   : > { %1139 = vmatprep.subr.bf16.mxu0 %v1138_v12  ;;  %1168 = vmatpush3.bf16.msra.mxu1 %v1134_v8  ;;  %v335_v30 = vld [vmem:[%s1295_s9 + $0x18] sm:$0xff]  ;;  %v336_v31 = vld [vmem:[%s1295_s9 + $0x20] sm:$0xff]  ;;  %v337_v34 = vld [vmem:[%s1295_s9 + $0x28] sm:$0xff] }
  0x14   : > { %1161 = vmatprep.subr.bf16.mxu1 %v1138_v12  ;;  %1102 = vmatprep.mubr.f32.mxu1 %v348_v15  ;;  %v351_v32 = vld [vmem:[%s1295_s9 + $0x98] sm:$0xff]  ;;  %v352_v33 = vld [vmem:[%s1295_s9 + $0xa0] sm:$0xff]  ;;  %v338_v35 = vld [vmem:[%s1295_s9 + $0x30] sm:$0xff] }
  0x15   : > { %v353_v36 = vld [vmem:[%s1295_s9 + $0xa8] sm:$0xff]  ;;  %v354_v37 = vld [vmem:[%s1295_s9 + $0xb0] sm:$0xff]  ;;  %v339_v38 = vld [vmem:[%s1295_s9 + $0x38] sm:$0xff] }
  0x16   : > { %1141 = vmatpush3.bf16.msra.mxu0 %v1138_v12  ;;  %v340_v39 = vld [vmem:[%s1295_s9 + $0x40] sm:$0xff]  ;;  %v355_v40 = vld [vmem:[%s1295_s9 + $0xb8] sm:$0xff]  ;;  %v341_v42 = vld [vmem:[%s1295_s9 + $0x48] sm:$0xff] }
  0x17   : > { %1143 = vmatprep.subr.bf16.mxu0 %v1142_v16  ;;  %1169 = vmatpush3.bf16.msra.mxu1 %v1138_v12  ;;  %v356_v41 = vld [vmem:[%s1295_s9 + $0xc0] sm:$0xff]  ;;  %v342_v43 = vld [vmem:[%s1295_s9 + $0x50] sm:$0xff]  ;;  %v357_v44 = vld [vmem:[%s1295_s9 + $0xc8] sm:$0xff] }
  0x18   : > { %1162 = vmatprep.subr.bf16.mxu1 %v1142_v16  ;;  %v358_v45 = vld [vmem:[%s1295_s9 + $0xd0] sm:$0xff]  ;;  %v343_v46 = vld [vmem:[%s1295_s9 + $0x58] sm:$0xff]  ;;  %v344_v47 = vld [vmem:[%s1295_s9 + $0x60] sm:$0xff] }
  0x19   : > { %v359_v48 = vld [vmem:[%s1295_s9 + $0xd8] sm:$0xff]  ;;  %v360_v49 = vld [vmem:[%s1295_s9 + $0xe0] sm:$0xff]  ;;  %v345_v50 = vld [vmem:[%s1295_s9 + $0x68] sm:$0xff] }
  0x1a   : > { %1145 = vmatpush3.bf16.msra.mxu0 %v1142_v16  ;;  %v346_v51 = vld [vmem:[%s1295_s9 + $0x70] sm:$0xff]  ;;  %v361_v52 = vld [vmem:[%s1295_s9 + $0xe8] sm:$0xff]  ;;  %v347_v54 = vld [vmem:[%s1295_s9 + $0x78] sm:$0xff] }
  0x1b   : > { %1147 = vmatprep.subr.bf16.mxu0 %v1146_v19  ;;  %1170 = vmatpush3.bf16.msra.mxu1 %v1142_v16  ;;  %v362_v53 = vld [vmem:[%s1295_s9 + $0xf0] sm:$0xff]  ;;  %v363_v55 = vld [vmem:[%s1295_s9 + $0xf8] sm:$0xff]  ;;  %s263_s9 = scalar_lea.vmem %s1487_s3, %s995_s22 }
  0x1c   : > { %1163 = vmatprep.subr.bf16.mxu1 %v1146_v19 }
  0x1e   : > { %1149 = vmatpush3.bf16.msra.mxu0 %v1146_v19 }
  0x1f   : > { %1151 = vmatprep.subr.bf16.mxu0 %v1150_v22  ;;  %1171 = vmatpush3.bf16.msra.mxu1 %v1146_v19 }
  0x20   : > { %1164 = vmatprep.subr.bf16.mxu1 %v1150_v22 }
  0x22   : > { %1153 = vmatpush3.bf16.msra.mxu0 %v1150_v22 }
  0x23   : > { %1155 = vmatprep.subr.bf16.mxu0 %v1154_v25  ;;  %1172 = vmatpush3.bf16.msra.mxu1 %v1150_v22 }
  0x24   : > { %1165 = vmatprep.subr.bf16.mxu1 %v1154_v25 }
  0x26   : > { %1157 = vmatpush3.bf16.msra.mxu0 %v1154_v25 }
  0x27   : > { %1173 = vmatpush3.bf16.msra.mxu1 %v1154_v25 }
  0x29   : > { %1079 = vmatmul.mubr.f32.vlgmr.msra.gmra.mrb[0].mxu0 %v333_v26 }
  0x2a   : > { %1081 = vmatprep.mubr.f32.mxu0 %v334_v27  ;;  %1103 = vmatmul.mubr.f32.vlgmr.msra.gmra.mrb[0].mxu1 %v349_v28 }
  0x2b   : > { %1105 = vmatprep.mubr.f32.mxu1 %v350_v29 }
  0x2d   : > { %1082 = vmatmul.mubr.f32.gmra.mrb[2].mxu0 %v335_v30 }
  0x2e   : > { %1084 = vmatprep.mubr.f32.mxu0 %v336_v31  ;;  %1106 = vmatmul.mubr.f32.gmra.mrb[2].mxu1 %v351_v32 }
  0x2f   : > { %1108 = vmatprep.mubr.f32.mxu1 %v352_v33 }
  0x31   : > { %1085 = vmatmul.mubr.f32.gmra.mrb[4].mxu0 %v337_v34 }
  0x32   : > { %1087 = vmatprep.mubr.f32.mxu0 %v338_v35  ;;  %1109 = vmatmul.mubr.f32.gmra.mrb[4].mxu1 %v353_v36 }
  0x33   : > { %1111 = vmatprep.mubr.f32.mxu1 %v354_v37 }
  0x35   : > { %1088 = vmatmul.mubr.f32.gmra.mrb[6].mxu0 %v339_v38 }
  0x36   : > { %1090 = vmatprep.mubr.f32.mxu0 %v340_v39  ;;  %1112 = vmatmul.mubr.f32.gmra.mrb[6].mxu1 %v355_v40 }
  0x37   : > { %1114 = vmatprep.mubr.f32.mxu1 %v356_v41 }
  0x39   : > { %1091 = vmatmul.mubr.f32.gmra.mrb[8].mxu0 %v341_v42 }
  0x3a   : > { %1093 = vmatprep.mubr.f32.mxu0 %v342_v43  ;;  %1115 = vmatmul.mubr.f32.gmra.mrb[8].mxu1 %v357_v44 }
  0x3b   : > { %1117 = vmatprep.mubr.f32.mxu1 %v358_v45 }
  0x3d   : > { %1094 = vmatmul.mubr.f32.gmra.mrb[10].mxu0 %v343_v46 }
  0x3e   : > { %1096 = vmatprep.mubr.f32.mxu0 %v344_v47  ;;  %1118 = vmatmul.mubr.f32.gmra.mrb[10].mxu1 %v359_v48 }
  0x3f   : > { %1120 = vmatprep.mubr.f32.mxu1 %v360_v49 }
  0x41   : > { %1097 = vmatmul.mubr.f32.gmra.mrb[12].mxu0 %v345_v50 }
  0x42   : > { %1099 = vmatprep.mubr.f32.mxu0 %v346_v51  ;;  %1121 = vmatmul.mubr.f32.gmra.mrb[12].mxu1 %v361_v52 }
  0x43   : > { %1123 = vmatprep.mubr.f32.mxu1 %v362_v53 }
  0x45   : > { %1100 = vmatmul.mubr.f32.gmra.mrb[14].mxu0 %v347_v54 }
  0x46   : > { %1124 = vmatmul.mubr.f32.gmra.mrb[14].mxu1 %v363_v55 }
  0xfc   : > { %v1080_v56 = vpop.f32.mrb[0].mxu0 }
  0xfd   : > { %705 = vst [vmem:[%s1358_s7 + $0x8] sm:$0xff] %v1080_v56  ;;  %v774_v57 = vmul.f32 %v1080_v56, %v1080_v56  ;;  %v446_v58 = vpop.f32.mrb[1].mxu0  ;;  %v1361_v59 = vpop.f32.mrb[0].mxu1 }
  0xfe   : > { %704 = vst [vmem:[%s1358_s7] sm:$0xff] %v446_v58  ;;  %v736_v60 = vadd.f32 %v1080_v56, %v446_v58  ;;  %v773_v61 = vmul.f32 %v446_v58, %v446_v58  ;;  %721 = vst [vmem:[%s1358_s7 + $0x88] sm:$0xff] %v1361_v59  ;;  %v1366_v62 = vpop.f32.mrb[1].mxu1 }
  0xff   : > { %720 = vst [vmem:[%s1358_s7 + $0x80] sm:$0xff] %v1366_v62 }
 0x100   : > { %v805_v63 = vadd.f32 %v774_v57, %v773_v61  ;;  %v1083_v0 = vpop.f32.mrb[2].mxu0 }
 0x101   : > { %707 = vst [vmem:[%s1358_s7 + $0x18] sm:$0xff] %v1083_v0  ;;  %v456_v1 = vpop.f32.mrb[3].mxu0  ;;  %v1371_v2 = vpop.f32.mrb[2].mxu1  ;;  %v776_v6 = vmul.f32 %v1083_v0, %v1083_v0 }
 0x102   : > { %706 = vst [vmem:[%s1358_s7 + $0x10] sm:$0xff] %v456_v1  ;;  %v737_v3 = vadd.f32 %v736_v60, %v456_v1  ;;  %v775_v4 = vmul.f32 %v456_v1, %v456_v1  ;;  %723 = vst [vmem:[%s1358_s7 + $0x98] sm:$0xff] %v1371_v2  ;;  %v1376_v5 = vpop.f32.mrb[3].mxu1 }
 0x103   : > { %722 = vst [vmem:[%s1358_s7 + $0x90] sm:$0xff] %v1376_v5 }
 0x104   : > { %v806_v7 = vadd.f32 %v805_v63, %v775_v4  ;;  %v1086_v8 = vpop.f32.mrb[4].mxu0  ;;  %v738_v9 = vadd.f32 %v1083_v0, %v737_v3 }
 0x105   : > { %709 = vst [vmem:[%s1358_s7 + $0x28] sm:$0xff] %v1086_v8  ;;  %v466_v10 = vpop.f32.mrb[5].mxu0  ;;  %v1381_v11 = vpop.f32.mrb[4].mxu1  ;;  %v778_v16 = vmul.f32 %v1086_v8, %v1086_v8 }
 0x106   : > { %708 = vst [vmem:[%s1358_s7 + $0x20] sm:$0xff] %v466_v10  ;;  %v739_v12 = vadd.f32 %v738_v9, %v466_v10  ;;  %v777_v13 = vmul.f32 %v466_v10, %v466_v10  ;;  %v807_v14 = vadd.f32 %v806_v7, %v776_v6  ;;  %725 = vst [vmem:[%s1358_s7 + $0xa8] sm:$0xff] %v1381_v11  ;;  %v1386_v15 = vpop.f32.mrb[5].mxu1 }
 0x107   : > { %724 = vst [vmem:[%s1358_s7 + $0xa0] sm:$0xff] %v1386_v15  ;;  %v789_v9 = vmul.f32 %v1366_v62, %v1366_v62 }
 0x108   : > { %v808_v17 = vadd.f32 %v807_v14, %v777_v13  ;;  %v1089_v18 = vpop.f32.mrb[6].mxu0  ;;  %v740_v19 = vadd.f32 %v1086_v8, %v739_v12  ;;  %v790_v13 = vmul.f32 %v1361_v59, %v1361_v59 }
 0x109   : > { %711 = vst [vmem:[%s1358_s7 + $0x38] sm:$0xff] %v1089_v18  ;;  %v476_v20 = vpop.f32.mrb[7].mxu0  ;;  %v1391_v21 = vpop.f32.mrb[6].mxu1  ;;  %v780_v26 = vmul.f32 %v1089_v18, %v1089_v18 }
 0x10a   : > { %710 = vst [vmem:[%s1358_s7 + $0x30] sm:$0xff] %v476_v20  ;;  %v741_v22 = vadd.f32 %v740_v19, %v476_v20  ;;  %v779_v23 = vmul.f32 %v476_v20, %v476_v20  ;;  %v809_v24 = vadd.f32 %v808_v17, %v778_v16  ;;  %727 = vst [vmem:[%s1358_s7 + $0xb8] sm:$0xff] %v1391_v21  ;;  %v1396_v25 = vpop.f32.mrb[7].mxu1 }
 0x10b   : > { %726 = vst [vmem:[%s1358_s7 + $0xb0] sm:$0xff] %v1396_v25  ;;  %v791_v17 = vmul.f32 %v1376_v5, %v1376_v5  ;;  %v792_v20 = vmul.f32 %v1371_v2, %v1371_v2 }
 0x10c   : > { %v810_v27 = vadd.f32 %v809_v24, %v779_v23  ;;  %v1092_v28 = vpop.f32.mrb[8].mxu0  ;;  %v742_v29 = vadd.f32 %v1089_v18, %v741_v22 }
 0x10d   : > { %713 = vst [vmem:[%s1358_s7 + $0x48] sm:$0xff] %v1092_v28  ;;  %v486_v30 = vpop.f32.mrb[9].mxu0  ;;  %v1401_v31 = vpop.f32.mrb[8].mxu1  ;;  %v782_v36 = vmul.f32 %v1092_v28, %v1092_v28 }
 0x10e   : > { %712 = vst [vmem:[%s1358_s7 + $0x40] sm:$0xff] %v486_v30  ;;  %v743_v32 = vadd.f32 %v742_v29, %v486_v30  ;;  %v781_v33 = vmul.f32 %v486_v30, %v486_v30  ;;  %v811_v34 = vadd.f32 %v810_v27, %v780_v26  ;;  %729 = vst [vmem:[%s1358_s7 + $0xc8] sm:$0xff] %v1401_v31  ;;  %v1406_v35 = vpop.f32.mrb[9].mxu1 }
 0x10f   : > { %728 = vst [vmem:[%s1358_s7 + $0xc0] sm:$0xff] %v1406_v35 }
 0x110   : > { %v812_v37 = vadd.f32 %v811_v34, %v781_v33  ;;  %v1095_v38 = vpop.f32.mrb[10].mxu0  ;;  %v744_v39 = vadd.f32 %v1092_v28, %v743_v32 }
 0x111   : > { %715 = vst [vmem:[%s1358_s7 + $0x58] sm:$0xff] %v1095_v38  ;;  %v496_v40 = vpop.f32.mrb[11].mxu0  ;;  %v1411_v41 = vpop.f32.mrb[10].mxu1  ;;  %v784_v46 = vmul.f32 %v1095_v38, %v1095_v38 }
 0x112   : > { %714 = vst [vmem:[%s1358_s7 + $0x50] sm:$0xff] %v496_v40  ;;  %v745_v42 = vadd.f32 %v744_v39, %v496_v40  ;;  %v783_v43 = vmul.f32 %v496_v40, %v496_v40  ;;  %v813_v44 = vadd.f32 %v812_v37, %v782_v36  ;;  %731 = vst [vmem:[%s1358_s7 + $0xd8] sm:$0xff] %v1411_v41  ;;  %v1416_v45 = vpop.f32.mrb[11].mxu1 }
 0x113   : > { %730 = vst [vmem:[%s1358_s7 + $0xd0] sm:$0xff] %v1416_v45 }
 0x114   : > { %v814_v47 = vadd.f32 %v813_v44, %v783_v43  ;;  %v1098_v48 = vpop.f32.mrb[12].mxu0  ;;  %v746_v49 = vadd.f32 %v1095_v38, %v745_v42 }
 0x115   : > { %717 = vst [vmem:[%s1358_s7 + $0x68] sm:$0xff] %v1098_v48  ;;  %v506_v50 = vpop.f32.mrb[13].mxu0  ;;  %v1421_v51 = vpop.f32.mrb[12].mxu1  ;;  %v786_v56 = vmul.f32 %v1098_v48, %v1098_v48 }
 0x116   : > { %716 = vst [vmem:[%s1358_s7 + $0x60] sm:$0xff] %v506_v50  ;;  %v747_v52 = vadd.f32 %v746_v49, %v506_v50  ;;  %v785_v53 = vmul.f32 %v506_v50, %v506_v50  ;;  %v815_v54 = vadd.f32 %v814_v47, %v784_v46  ;;  %733 = vst [vmem:[%s1358_s7 + $0xe8] sm:$0xff] %v1421_v51  ;;  %v586_v55 = vpop.f32.mrb[13].mxu1 }
 0x117   : > { %732 = vst [vmem:[%s1358_s7 + $0xe0] sm:$0xff] %v586_v55  ;;  %v801_v43 = vmul.f32 %v586_v55, %v586_v55  ;;  %v802_v47 = vmul.f32 %v1421_v51, %v1421_v51 }
 0x118   : > { %v816_v57 = vadd.f32 %v815_v54, %v785_v53  ;;  %v1101_v58 = vpop.f32.mrb[14].mxu0  ;;  %v748_v60 = vadd.f32 %v1098_v48, %v747_v52 }
 0x119   : > { %719 = vst [vmem:[%s1358_s7 + $0x78] sm:$0xff] %v1101_v58  ;;  %v516_v61 = vpop.f32.mrb[15].mxu0  ;;  %v1125_v63 = vpop.f32.mrb[14].mxu1  ;;  %v788_v6 = vmul.f32 %v1101_v58, %v1101_v58 }
 0x11a   : > { %718 = vst [vmem:[%s1358_s7 + $0x70] sm:$0xff] %v516_v61  ;;  %v749_v0 = vadd.f32 %v748_v60, %v516_v61  ;;  %v787_v1 = vmul.f32 %v516_v61, %v516_v61  ;;  %v817_v3 = vadd.f32 %v816_v57, %v786_v56  ;;  %735 = vst [vmem:[%s1358_s7 + $0xf8] sm:$0xff] %v1125_v63  ;;  %v596_v4 = vpop.f32.mrb[15].mxu1 }
 0x11b   : > { %734 = vst [vmem:[%s1358_s7 + $0xf0] sm:$0xff] %v596_v4  ;;  %v803_v49 = vmul.f32 %v596_v4, %v596_v4  ;;  %v804_v52 = vmul.f32 %v1125_v63, %v1125_v63 }
 0x11c   : > { %v750_v7 = vadd.f32 %v1101_v58, %v749_v0  ;;  %v818_v8 = vadd.f32 %v817_v3, %v787_v1 }
 0x11e   : > { %v819_v10 = vadd.f32 %v818_v8, %v788_v6  ;;  %v751_v12 = vadd.f32 %v750_v7, %v1366_v62  ;;  %v793_v62 = vmul.f32 %v1386_v15, %v1386_v15 }
 0x120   : > { %v820_v14 = vadd.f32 %v819_v10, %v789_v9  ;;  %v752_v16 = vadd.f32 %v1361_v59, %v751_v12  ;;  %v794_v59 = vmul.f32 %v1381_v11, %v1381_v11 }
 0x122   : > { %v753_v18 = vadd.f32 %v752_v16, %v1376_v5  ;;  %v821_v19 = vadd.f32 %v820_v14, %v790_v13  ;;  %v795_v5 = vmul.f32 %v1396_v25, %v1396_v25 }
 0x124   : > { %v822_v22 = vadd.f32 %v821_v19, %v791_v17  ;;  %v754_v23 = vadd.f32 %v1371_v2, %v753_v18  ;;  %v796_v2 = vmul.f32 %v1391_v21, %v1391_v21 }
 0x126   : > { %v755_v24 = vadd.f32 %v754_v23, %v1386_v15  ;;  %v823_v26 = vadd.f32 %v822_v22, %v792_v20  ;;  %v797_v15 = vmul.f32 %v1406_v35, %v1406_v35 }
 0x128   : > { %v824_v27 = vadd.f32 %v823_v26, %v793_v62  ;;  %v756_v28 = vadd.f32 %v1381_v11, %v755_v24  ;;  %v798_v11 = vmul.f32 %v1401_v31, %v1401_v31 }
 0x12a   : > { %v757_v29 = vadd.f32 %v756_v28, %v1396_v25  ;;  %v825_v30 = vadd.f32 %v824_v27, %v794_v59  ;;  %v799_v25 = vmul.f32 %v1416_v45, %v1416_v45 }
 0x12c   : > { %v826_v32 = vadd.f32 %v825_v30, %v795_v5  ;;  %v758_v33 = vadd.f32 %v1391_v21, %v757_v29  ;;  %v800_v21 = vmul.f32 %v1411_v41, %v1411_v41 }
 0x12e   : > { %v759_v34 = vadd.f32 %v758_v33, %v1406_v35  ;;  %v827_v36 = vadd.f32 %v826_v32, %v796_v2 }
 0x130   : > { %v828_v37 = vadd.f32 %v827_v36, %v797_v15  ;;  %v760_v38 = vadd.f32 %v1401_v31, %v759_v34 }
 0x132   : > { %v761_v39 = vadd.f32 %v760_v38, %v1416_v45  ;;  %v829_v40 = vadd.f32 %v828_v37, %v798_v11 }
 0x134   : > { %v830_v42 = vadd.f32 %v829_v40, %v799_v25  ;;  %v762_v35 = vadd.f32 %v1411_v41, %v761_v39 }
 0x136   : > { %v763_v44 = vadd.f32 %v762_v35, %v586_v55  ;;  %v831_v46 = vadd.f32 %v830_v42, %v800_v21 }
 0x138   : > { %v832_v31 = vadd.f32 %v831_v46, %v801_v43  ;;  %v764_v48 = vadd.f32 %v1421_v51, %v763_v44 }
 0x13a   : > { %v765_v45 = vadd.f32 %v764_v48, %v596_v4  ;;  %v833_v50 = vadd.f32 %v832_v31, %v802_v47 }
 0x13c   : > { %v766_v53 = vadd.f32 %v1125_v63, %v765_v45  ;;  %v834_v54 = vadd.f32 %v833_v50, %v803_v49 }
 0x13e   : > { %v767_v56 = vrot.slane %v766_v53, 4  ;;  %v835_v57 = vadd.f32 %v834_v54, %v804_v52 }
 0x140   : > { %v768_v41 = vadd.f32 %v767_v56, %v766_v53  ;;  %v836_v58 = vrot.slane %v835_v57, 4 }
 0x142   : > { %v769_v55 = vrot.slane %v768_v41, 2  ;;  %v837_v60 = vadd.f32 %v836_v58, %v835_v57 }
 0x144   : > { %v770_v61 = vadd.f32 %v769_v55, %v768_v41  ;;  %v838_v0 = vrot.slane %v837_v60, 2 }
 0x146   : > { %v771_v1 = vrot.slane %v770_v61, 1  ;;  %v839_v3 = vadd.f32 %v838_v0, %v837_v60 }
 0x148   : > { %v840_v51 = vrot.slane %v839_v3, 1  ;;  %v772_v63 = vadd.f32 %v771_v1, %v770_v61 }
 0x14a   : > { %v841_v4 = vadd.f32 %v840_v51, %v839_v3 }
 0x14c   : > { %v843_v6 = vsel %vm842_vm0, %v772_v63, %v841_v4 }
 0x14d   : > { %844 = vst [vmem:[%s263_s9] sm:$0x3] %v843_v6 }
 0x14e PF: > { %s14_s14 = sadd.s32 1, %s1220_s14   ;;  %s1488_s12 = smov %s1216_s13 }
 0x14f   : > { %p11_p6 = scmp.ge.s32.totalorder %s14_s14, 4   ;;  %s1489_s13 = smov %s1491_s15 }
 0x151   :  { %13 = sbr.rel (!%p11_p6) target bundleno = 2 (0x2), region = 81 }

// kernel: bottleneck_forward.10
= control target key start
LH: loop header
LB: loop body
LE: loop exit
PB: predicated region body
PF: predicated region fallthrough
CT: control target
= control target key end

     0   :  { %s254_s0 = inlined_call_operand.vmem [shape: f32[128,128], index: 0, kind: input, shape index: {}, may-alias: {0,3}]   ;;  %s255_s1 = inlined_call_operand.vmem [shape: f32[1,128], index: 1, kind: input, shape index: {}]   ;;  %s256_s2 = inlined_call_operand.vmem [shape: f32[1,128], index: 2, kind: input, shape index: {}]   ;;  %s257_s3 = inlined_call_operand.vmem [shape: f32[128,128], index: 3, kind: output, shape index: {}, may-alias: {0,3}]  }
   0x1   :  { %v14_v0 = vld [vmem:[%s254_s0] sm:$0xff]  ;;  %v15_v4 = vld [vmem:[%s254_s0 + $0x8] sm:$0xff]  ;;  %v16_v5 = vld [vmem:[%s254_s0 + $0x10] sm:$0xff] }
   0x2   :  { %v112_v1 = vld [vmem:[%s255_s1] ss:$0 sm:$0xff]  ;;  %v17_v6 = vld [vmem:[%s254_s0 + $0x18] sm:$0xff]  ;;  %v19_v11 = vld [vmem:[%s254_s0 + $0x28] sm:$0xff] }
   0x3   :  { %v143_v2 = vld [vmem:[%s256_s2] ss:$0 sm:$0xff]  ;;  %v37_v3 = vmul.f32 %v112_v1, %v14_v0  ;;  %v38_v7 = vmul.f32 %v112_v1, %v15_v4  ;;  %v39_v8 = vmul.f32 %v112_v1, %v16_v5  ;;  %v40_v9 = vmul.f32 %v112_v1, %v17_v6  ;;  %v20_v12 = vld [vmem:[%s254_s0 + $0x30] sm:$0xff]  ;;  %v21_v17 = vld [vmem:[%s254_s0 + $0x38] sm:$0xff] }
   0x4   :  { %v18_v10 = vld [vmem:[%s254_s0 + $0x20] sm:$0xff]  ;;  %v42_v15 = vmul.f32 %v112_v1, %v19_v11  ;;  %v43_v16 = vmul.f32 %v112_v1, %v20_v12  ;;  %v44_v21 = vmul.f32 %v112_v1, %v21_v17  ;;  %v23_v27 = vld [vmem:[%s254_s0 + $0x48] sm:$0xff]  ;;  %v24_v28 = vld [vmem:[%s254_s0 + $0x50] sm:$0xff] }
   0x5   :  { %v60_v13 = vadd.f32 %v143_v2, %v37_v3  ;;  %v41_v14 = vmul.f32 %v112_v1, %v18_v10  ;;  %v61_v18 = vadd.f32 %v143_v2, %v38_v7  ;;  %v62_v19 = vadd.f32 %v143_v2, %v39_v8  ;;  %v22_v22 = vld [vmem:[%s254_s0 + $0x40] sm:$0xff]  ;;  %v25_v29 = vld [vmem:[%s254_s0 + $0x58] sm:$0xff]  ;;  %v27_v35 = vld [vmem:[%s254_s0 + $0x68] sm:$0xff] }
   0x6   :  { %v63_v20 = vadd.f32 %v143_v2, %v40_v9  ;;  %v65_v25 = vadd.f32 %v143_v2, %v42_v15  ;;  %v66_v26 = vadd.f32 %v143_v2, %v43_v16  ;;  %v67_v33 = vadd.f32 %v143_v2, %v44_v21  ;;  %v26_v34 = vld [vmem:[%s254_s0 + $0x60] sm:$0xff]  ;;  %v28_v36 = vld [vmem:[%s254_s0 + $0x70] sm:$0xff] }
   0x7   :  { %v76_v23 = vmax.f32 %v60_v13, 0.0  ;;  %v64_v24 = vadd.f32 %v143_v2, %v41_v14  ;;  %v77_v30 = vmax.f32 %v61_v18, 0.0  ;;  %v78_v31 = vmax.f32 %v62_v19, 0.0 }
   0x8   :  { %v79_v32 = vmax.f32 %v63_v20, 0.0  ;;  %v81_v38 = vmax.f32 %v65_v25, 0.0  ;;  %v82_v39 = vmax.f32 %v66_v26, 0.0  ;;  %v45_v40 = vmul.f32 %v112_v1, %v22_v22 }
   0x9   :  { %92 = vst [vmem:[%s257_s3] sm:$0xff] %v76_v23  ;;  %v80_v37 = vmax.f32 %v64_v24, 0.0  ;;  %v83_v42 = vmax.f32 %v67_v33, 0.0  ;;  %v46_v43 = vmul.f32 %v112_v1, %v23_v27  ;;  %v47_v44 = vmul.f32 %v112_v1, %v24_v28 }
   0xa   :  { %v48_v45 = vmul.f32 %v112_v1, %v25_v29  ;;  %v68_v46 = vadd.f32 %v143_v2, %v45_v40  ;;  %v49_v47 = vmul.f32 %v112_v1, %v26_v34  ;;  %v50_v48 = vmul.f32 %v112_v1, %v27_v35 }
   0xb   :  { %v51_v49 = vmul.f32 %v112_v1, %v28_v36  ;;  %v69_v50 = vadd.f32 %v143_v2, %v46_v43  ;;  %v70_v51 = vadd.f32 %v143_v2, %v47_v44 }
   0xc   :  { %v71_v52 = vadd.f32 %v143_v2, %v48_v45  ;;  %v84_v54 = vmax.f32 %v68_v46, 0.0  ;;  %v72_v55 = vadd.f32 %v143_v2, %v49_v47  ;;  %v73_v56 = vadd.f32 %v143_v2, %v50_v48 }
   0xd   :  { %v74_v57 = vadd.f32 %v143_v2, %v51_v49  ;;  %v85_v58 = vmax.f32 %v69_v50, 0.0  ;;  %v86_v59 = vmax.f32 %v70_v51, 0.0 }
   0xe   :  { %v87_v60 = vmax.f32 %v71_v52, 0.0  ;;  %v88_v62 = vmax.f32 %v72_v55, 0.0  ;;  %v89_v63 = vmax.f32 %v73_v56, 0.0 }
   0xf   :  { %v90_v0 = vmax.f32 %v74_v57, 0.0 }
  0x10   :  { %v29_v41 = vld [vmem:[%s254_s0 + $0x78] sm:$0xff] }
  0x11   :  { %93 = vst [vmem:[%s257_s3 + $0x8] sm:$0xff] %v77_v30  ;;  %94 = vst [vmem:[%s257_s3 + $0x10] sm:$0xff] %v78_v31  ;;  %v52_v53 = vmul.f32 %v112_v1, %v29_v41 }
  0x12   :  { %95 = vst [vmem:[%s257_s3 + $0x18] sm:$0xff] %v79_v32  ;;  %96 = vst [vmem:[%s257_s3 + $0x20] sm:$0xff] %v80_v37 }
  0x13   :  { %97 = vst [vmem:[%s257_s3 + $0x28] sm:$0xff] %v81_v38  ;;  %98 = vst [vmem:[%s257_s3 + $0x30] sm:$0xff] %v82_v39  ;;  %v75_v61 = vadd.f32 %v143_v2, %v52_v53 }
  0x14   :  { %99 = vst [vmem:[%s257_s3 + $0x38] sm:$0xff] %v83_v42  ;;  %100 = vst [vmem:[%s257_s3 + $0x40] sm:$0xff] %v84_v54 }
  0x15   :  { %101 = vst [vmem:[%s257_s3 + $0x48] sm:$0xff] %v85_v58  ;;  %102 = vst [vmem:[%s257_s3 + $0x50] sm:$0xff] %v86_v59  ;;  %v91_v1 = vmax.f32 %v75_v61, 0.0 }
  0x16   :  { %103 = vst [vmem:[%s257_s3 + $0x58] sm:$0xff] %v87_v60  ;;  %104 = vst [vmem:[%s257_s3 + $0x60] sm:$0xff] %v88_v62 }
  0x17   :  { %105 = vst [vmem:[%s257_s3 + $0x68] sm:$0xff] %v89_v63  ;;  %106 = vst [vmem:[%s257_s3 + $0x70] sm:$0xff] %v90_v0 }
  0x18   :  { %107 = vst [vmem:[%s257_s3 + $0x78] sm:$0xff] %v91_v1 }

// kernel: bottleneck_forward.9
= control target key start
LH: loop header
LB: loop body
LE: loop exit
PB: predicated region body
PF: predicated region fallthrough
CT: control target
= control target key end

     0   :  { %s2916_s21 = smov 0   ;;  %s3531_s0 = inlined_call_operand.vmem [shape: f32[2,9,9,128], index: 0, kind: input, shape index: {}]   ;;  %s3532_s1 = inlined_call_operand.vmem [shape: f32[2,9,9,128], index: 1, kind: input, shape index: {}]   ;;  %s3533_s2 = inlined_call_operand.vmem [shape: f32[2,9,9,128], index: 2, kind: input, shape index: {}]   ;;  %s3534_s3 = inlined_call_operand.vmem [shape: f32[2,9,9,128], index: 3, kind: input, shape index: {}]   ;;  %s3535_s4 = inlined_call_operand.vmem [shape: f32[9,128,128], index: 4, kind: input, shape index: {}]   ;;  %s3536_s5 = inlined_call_operand.vmem [shape: f32[2,64,128], index: 5, kind: output, shape index: {0}]   ;;  %s3537_s6 = inlined_call_operand.vmem [shape: f32[2,2,128], index: 6, kind: output, shape index: {1}]  }
   0x1 LB: > { %s1717_s22 = sadd.s32 4294967295, %s2879_s21   ;;  %p1721_p0 = scmp.ge.s32.totalorder %s2879_s21, 1  ;;  %s2879_s21 = sphi %s2916_s21, %s17_s21  }
   0x2   : > { %p245_p1 = scmp.lt.s32.totalorder %s2879_s21, 3 }
   0x4   : > { %p246_p2 = pnand %p1721_p0, %p245_p1 }
   0x5   : > { %v1729_v0 = vld [vmem:[%s3535_s4 + $0x80] sm:$0xff] (!%p246_p2)  ;;  %v1730_v1 = vld [vmem:[%s3535_s4 + $0x88] sm:$0xff] (!%p246_p2)  ;;  %p294_p3 = scmp.lt.s32.totalorder (!%p246_p2), %s1717_s22, 1  ;;  %v1731_v5 = vld [vmem:[%s3535_s4 + $0x90] sm:$0xff] (!%p246_p2)  ;;  %vm1592_vm0 = vcmask (!%p246_p2), 1040384  }
   0x6   : > { %249 = sbr.rel (%p246_p2) target bundleno = 416 (0x1a0), region = 40  ;;  %v1777_v2 = vld [vmem:[%s3535_s4 + $0x200] sm:$0xff] (!%p246_p2)  ;;  %v2496_v3 = vpack.c.bf16 (!%p246_p2), %v1730_v1, %v1729_v0  ;;  %v1778_v4 = vld [vmem:[%s3535_s4 + $0x208] sm:$0xff] (!%p246_p2)  ;;  %v1732_v6 = vld [vmem:[%s3535_s4 + $0x98] sm:$0xff] (!%p246_p2) }
   0x7   : > { %v2624_v7 = vpack.c.bf16 (!%p246_p2), %v1778_v4, %v1777_v2  ;;  %v2500_v8 = vpack.c.bf16 (!%p246_p2), %v1732_v6, %v1731_v5  ;;  %v1779_v9 = vld [vmem:[%s3535_s4 + $0x210] sm:$0xff] (!%p246_p2)  ;;  %v1780_v10 = vld [vmem:[%s3535_s4 + $0x218] sm:$0xff] (!%p246_p2)  ;;  %v1733_v11 = vld [vmem:[%s3535_s4 + $0xa0] sm:$0xff] (!%p246_p2) }
   0x8   : > { %2497 = vmatprep.subr.bf16.mxu1 (!%p246_p2), %v2496_v3  ;;  %v2628_v12 = vpack.c.bf16 (!%p246_p2), %v1780_v10, %v1779_v9  ;;  %v1734_v13 = vld [vmem:[%s3535_s4 + $0xa8] sm:$0xff] (!%p246_p2)  ;;  %v1781_v14 = vld [vmem:[%s3535_s4 + $0x220] sm:$0xff] (!%p246_p2)  ;;  %v1735_v18 = vld [vmem:[%s3535_s4 + $0xb0] sm:$0xff] (!%p246_p2) }
   0x9   : > { %v1782_v15 = vld [vmem:[%s3535_s4 + $0x228] sm:$0xff] (!%p246_p2)  ;;  %2625 = vmatprep.subr.bf16.mxu0 (!%p246_p2), %v2624_v7  ;;  %2499 = vmatpush3.bf16.msra.mxu1 (!%p246_p2), %v2496_v3  ;;  %v2504_v16 = vpack.c.bf16 (!%p246_p2), %v1734_v13, %v1733_v11  ;;  %v1736_v19 = vld [vmem:[%s3535_s4 + $0xb8] sm:$0xff] (!%p246_p2)  ;;  %v1783_v20 = vld [vmem:[%s3535_s4 + $0x230] sm:$0xff] (!%p246_p2) }
   0xa   : > { %2627 = vmatpush3.bf16.msra.mxu0 (!%p246_p2), %v2624_v7  ;;  %2501 = vmatprep.subr.bf16.mxu1 (!%p246_p2), %v2500_v8  ;;  %v2632_v17 = vpack.c.bf16 (!%p246_p2), %v1782_v15, %v1781_v14  ;;  %v1784_v21 = vld [vmem:[%s3535_s4 + $0x238] sm:$0xff] (!%p246_p2)  ;;  %v2508_v22 = vpack.c.bf16 (!%p246_p2), %v1736_v19, %v1735_v18  ;;  %v1737_v24 = vld [vmem:[%s3535_s4 + $0xc0] sm:$0xff] (!%p246_p2)  ;;  %v1738_v25 = vld [vmem:[%s3535_s4 + $0xc8] sm:$0xff] (!%p246_p2) }
   0xb   : > { %2629 = vmatprep.subr.bf16.mxu0 (!%p246_p2), %v2628_v12  ;;  %v2636_v23 = vpack.c.bf16 (!%p246_p2), %v1784_v21, %v1783_v20  ;;  %v1785_v27 = vld [vmem:[%s3535_s4 + $0x240] sm:$0xff] (!%p246_p2)  ;;  %v1786_v28 = vld [vmem:[%s3535_s4 + $0x248] sm:$0xff] (!%p246_p2)  ;;  %v2512_v30 = vpack.c.bf16 (!%p246_p2), %v1738_v25, %v1737_v24  ;;  %v1739_v32 = vld [vmem:[%s3535_s4 + $0xd0] sm:$0xff] (!%p246_p2) }
   0xc   : > { %v2640_v31 = vpack.c.bf16 (!%p246_p2), %v1786_v28, %v1785_v27  ;;  %v1740_v33 = vld [vmem:[%s3535_s4 + $0xd8] sm:$0xff] (!%p246_p2)  ;;  %v1787_v34 = vld [vmem:[%s3535_s4 + $0x250] sm:$0xff] (!%p246_p2)  ;;  %v1741_v38 = vld [vmem:[%s3535_s4 + $0xe0] sm:$0xff] (!%p246_p2) }
   0xd   : > { %s3539_s22 = smov (!%p294_p3, %s1717_s22), 1  ;;  %2503 = vmatpush3.bf16.msra.mxu1 %v2500_v8  ;;  %v1788_v35 = vld [vmem:[%s3535_s4 + $0x258] sm:$0xff]  ;;  %v2516_v36 = vpack.c.bf16 %v1740_v33, %v1739_v32  ;;  %v1742_v39 = vld [vmem:[%s3535_s4 + $0xe8] sm:$0xff]  ;;  %v1789_v40 = vld [vmem:[%s3535_s4 + $0x260] sm:$0xff] }
   0xe   : > { %s2963_s25 = smul.u32 144, %s3539_s22  ;;  %2631 = vmatpush3.bf16.msra.mxu0 %v2628_v12  ;;  %2505 = vmatprep.subr.bf16.mxu1 %v2504_v16  ;;  %v2644_v37 = vpack.c.bf16 %v1788_v35, %v1787_v34  ;;  %v1790_v41 = vld [vmem:[%s3535_s4 + $0x268] sm:$0xff]  ;;  %v2520_v42 = vpack.c.bf16 %v1742_v39, %v1741_v38  ;;  %v1743_v44 = vld [vmem:[%s3535_s4 + $0xf0] sm:$0xff]  ;;  %v1744_v45 = vld [vmem:[%s3535_s4 + $0xf8] sm:$0xff]  ;;  %s1728_s9 = sshll.u32 %s3539_s22, 1 }
   0xf   : > { %2633 = vmatprep.subr.bf16.mxu0 %v2632_v17  ;;  %v2648_v43 = vpack.c.bf16 %v1790_v41, %v1789_v40  ;;  %v1791_v46 = vld [vmem:[%s3535_s4 + $0x270] sm:$0xff]  ;;  %v1792_v47 = vld [vmem:[%s3535_s4 + $0x278] sm:$0xff]  ;;  %v2524_v48 = vpack.c.bf16 %v1744_v45, %v1743_v44  ;;  %v331_v50 = vld [vmem:[%s3535_s4] sm:$0xff]  ;;  %s322_s14 = scalar_lea.vmem %s3537_s6, %s1728_s9 }
  0x10   : > { %s2981_s12 = scalar_lea.vmem %s3532_s1, %s2963_s25  ;;  %s2987_s15 = scalar_lea.vmem %s3534_s3, %s2963_s25  ;;  %v2652_v49 = vpack.c.bf16 %v1792_v47, %v1791_v46  ;;  %v332_v51 = vld [vmem:[%s3535_s4 + $0x8] sm:$0xff]  ;;  %v1793_v52 = vld [vmem:[%s3535_s4 + $0x280] sm:$0xff]  ;;  %v333_v56 = vld [vmem:[%s3535_s4 + $0x10] sm:$0xff] }
  0x11   : > { %v347_v26 = vld [vmem:[%s2981_s12] sm:$0xff]  ;;  %2507 = vmatpush3.bf16.msra.mxu1 %v2504_v16  ;;  %v1794_v53 = vld [vmem:[%s3535_s4 + $0x288] sm:$0xff]  ;;  %v2528_v54 = vpack.c.bf16 %v332_v51, %v331_v50  ;;  %v334_v57 = vld [vmem:[%s3535_s4 + $0x18] sm:$0xff]  ;;  %s3131_s13 = scalar_lea.vmem %s3531_s0, %s2963_s25  ;;  %s3142_s17 = scalar_lea.vmem %s3533_s2, %s2963_s25 }
  0x12   : > { %2132 = vmatprep.mubr.f32.mxu1 %v347_v26  ;;  %v858_v29 = vld [vmem:[%s2987_s15] sm:$0xff]  ;;  %2635 = vmatpush3.bf16.msra.mxu0 %v2632_v17  ;;  %v2656_v55 = vpack.c.bf16 %v1794_v53, %v1793_v52  ;;  %v1795_v58 = vld [vmem:[%s3535_s4 + $0x290] sm:$0xff]  ;;  %v1796_v59 = vld [vmem:[%s3535_s4 + $0x298] sm:$0xff]  ;;  %v2532_v62 = vpack.c.bf16 %v334_v57, %v333_v56 }
  0x13   : > { %2308 = vmatprep.mubr.f32.mxu0 %v858_v29  ;;  %2509 = vmatprep.subr.bf16.mxu1 %v2508_v22  ;;  %v3064_v60 = vld [vmem:[%s2981_s12 + $0x10] sm:$0xff]  ;;  %v2660_v63 = vpack.c.bf16 %v1796_v59, %v1795_v58  ;;  %v335_v0 = vld [vmem:[%s3535_s4 + $0x20] sm:$0xff]  ;;  %v336_v1 = vld [vmem:[%s3535_s4 + $0x28] sm:$0xff] }
  0x14   : > { %2637 = vmatprep.subr.bf16.mxu0 %v2636_v23  ;;  %v859_v61 = vld [vmem:[%s2987_s15 + $0x10] sm:$0xff]  ;;  %v1797_v2 = vld [vmem:[%s3535_s4 + $0x2a0] sm:$0xff]  ;;  %v1798_v3 = vld [vmem:[%s3535_s4 + $0x2a8] sm:$0xff]  ;;  %v2536_v7 = vpack.c.bf16 %v336_v1, %v335_v0 }
  0x15   : > { %2511 = vmatpush3.bf16.msra.mxu1 %v2508_v22  ;;  %v3081_v4 = vld [vmem:[%s2981_s12 + $0x20] sm:$0xff]  ;;  %v3085_v6 = vld [vmem:[%s2981_s12 + $0x30] sm:$0xff]  ;;  %v2664_v9 = vpack.c.bf16 %v1798_v3, %v1797_v2  ;;  %v338_v11 = vld [vmem:[%s3535_s4 + $0x38] sm:$0xff] }
  0x16   : > { %2639 = vmatpush3.bf16.msra.mxu0 %v2636_v23  ;;  %2513 = vmatprep.subr.bf16.mxu1 %v2512_v30  ;;  %v860_v5 = vld [vmem:[%s2987_s15 + $0x20] sm:$0xff]  ;;  %v861_v8 = vld [vmem:[%s2987_s15 + $0x30] sm:$0xff]  ;;  %v1800_v13 = vld [vmem:[%s3535_s4 + $0x2b8] sm:$0xff] }
  0x17   : > { %2641 = vmatprep.subr.bf16.mxu0 %v2640_v31  ;;  %v337_v10 = vld [vmem:[%s3535_s4 + $0x30] sm:$0xff]  ;;  %v3103_v14 = vld [vmem:[%s2981_s12 + $0x40] sm:$0xff]  ;;  %v340_v21 = vld [vmem:[%s3535_s4 + $0x48] sm:$0xff] }
  0x18   : > { %v1799_v12 = vld [vmem:[%s3535_s4 + $0x2b0] sm:$0xff]  ;;  %v862_v15 = vld [vmem:[%s2987_s15 + $0x40] sm:$0xff]  ;;  %v2540_v17 = vpack.c.bf16 %v338_v11, %v337_v10  ;;  %v1802_v23 = vld [vmem:[%s3535_s4 + $0x2c8] sm:$0xff] }
  0x19   : > { %2515 = vmatpush3.bf16.msra.mxu1 %v2512_v30  ;;  %v3107_v16 = vld [vmem:[%s2981_s12 + $0x50] sm:$0xff]  ;;  %v2668_v19 = vpack.c.bf16 %v1800_v13, %v1799_v12  ;;  %v339_v20 = vld [vmem:[%s3535_s4 + $0x40] sm:$0xff]  ;;  %v1804_v33 = vld [vmem:[%s3535_s4 + $0x2d8] sm:$0xff] }
  0x1a   : > { %2643 = vmatpush3.bf16.msra.mxu0 %v2640_v31  ;;  %2517 = vmatprep.subr.bf16.mxu1 %v2516_v36  ;;  %v863_v18 = vld [vmem:[%s2987_s15 + $0x50] sm:$0xff]  ;;  %v1801_v22 = vld [vmem:[%s3535_s4 + $0x2c0] sm:$0xff]  ;;  %v2544_v27 = vpack.c.bf16 %v340_v21, %v339_v20  ;;  %v342_v31 = vld [vmem:[%s3535_s4 + $0x58] sm:$0xff] }
  0x1b   : > { %2645 = vmatprep.subr.bf16.mxu0 %v2644_v37  ;;  %v3125_v24 = vld [vmem:[%s2981_s12 + $0x60] sm:$0xff]  ;;  %v3135_v26 = vld [vmem:[%s2981_s12 + $0x70] sm:$0xff]  ;;  %v2672_v29 = vpack.c.bf16 %v1802_v23, %v1801_v22  ;;  %v344_v39 = vld [vmem:[%s3535_s4 + $0x68] sm:$0xff] }
  0x1c   : > { %v864_v25 = vld [vmem:[%s2987_s15 + $0x60] sm:$0xff]  ;;  %v865_v28 = vld [vmem:[%s2987_s15 + $0x70] sm:$0xff]  ;;  %v1806_v41 = vld [vmem:[%s3535_s4 + $0x2e8] sm:$0xff] }
  0x1d   : > { %2519 = vmatpush3.bf16.msra.mxu1 %v2516_v36  ;;  %v341_v30 = vld [vmem:[%s3535_s4 + $0x50] sm:$0xff]  ;;  %v323_v34 = vld [vmem:[%s3131_s13] sm:$0xff]  ;;  %v346_v45 = vld [vmem:[%s3535_s4 + $0x78] sm:$0xff] }
  0x1e   : > { %2647 = vmatpush3.bf16.msra.mxu0 %v2644_v37  ;;  %2521 = vmatprep.subr.bf16.mxu1 %v2520_v42  ;;  %v1803_v32 = vld [vmem:[%s3535_s4 + $0x2d0] sm:$0xff]  ;;  %v996_v35 = vld [vmem:[%s3142_s17 + $0x1] sm:$0xff]  ;;  %v2548_v36 = vpack.c.bf16 %v342_v31, %v341_v30  ;;  %v1808_v47 = vld [vmem:[%s3535_s4 + $0x2f8] sm:$0xff] }
  0x1f   : > { %2649 = vmatprep.subr.bf16.mxu0 %v2648_v43  ;;  %v2676_v37 = vpack.c.bf16 %v1804_v33, %v1803_v32  ;;  %v343_v38 = vld [vmem:[%s3535_s4 + $0x60] sm:$0xff]  ;;  %v345_v44 = vld [vmem:[%s3535_s4 + $0x70] sm:$0xff]  ;;  %v1746_v51 = vld [vmem:[%s3535_s4 + $0x108] sm:$0xff] }
  0x20   : > { %v1805_v40 = vld [vmem:[%s3535_s4 + $0x2e0] sm:$0xff]  ;;  %v1807_v46 = vld [vmem:[%s3535_s4 + $0x2f0] sm:$0xff]  ;;  %v1818_v53 = vld [vmem:[%s3535_s4 + $0x308] sm:$0xff] }
  0x21   : > { %2523 = vmatpush3.bf16.msra.mxu1 %v2520_v42  ;;  %v2552_v42 = vpack.c.bf16 %v344_v39, %v343_v38  ;;  %v1745_v50 = vld [vmem:[%s3535_s4 + $0x100] sm:$0xff]  ;;  %v1747_v56 = vld [vmem:[%s3535_s4 + $0x110] sm:$0xff]  ;;  %v1748_v57 = vld [vmem:[%s3535_s4 + $0x118] sm:$0xff] }
  0x22   : > { %2651 = vmatpush3.bf16.msra.mxu0 %v2648_v43  ;;  %2525 = vmatprep.subr.bf16.mxu1 %v2524_v48  ;;  %v2680_v43 = vpack.c.bf16 %v1806_v41, %v1805_v40  ;;  %v1817_v52 = vld [vmem:[%s3535_s4 + $0x300] sm:$0xff]  ;;  %v1819_v58 = vld [vmem:[%s3535_s4 + $0x310] sm:$0xff]  ;;  %v1820_v59 = vld [vmem:[%s3535_s4 + $0x318] sm:$0xff] }
  0x23   : > { %2653 = vmatprep.subr.bf16.mxu0 %v2652_v49  ;;  %v2692_v0 = vpack.c.bf16 %v1820_v59, %v1819_v58  ;;  %v1749_v1 = vld [vmem:[%s3535_s4 + $0x120] sm:$0xff]  ;;  %v1750_v2 = vld [vmem:[%s3535_s4 + $0x128] sm:$0xff]  ;;  %v999_v11 = vld [vmem:[%s3142_s17 + $0x31] sm:$0xff] }
  0x24   : > { %v1821_v3 = vld [vmem:[%s3535_s4 + $0x320] sm:$0xff]  ;;  %v2568_v10 = vpack.c.bf16 %v1750_v2, %v1749_v1  ;;  %v1751_v13 = vld [vmem:[%s3535_s4 + $0x130] sm:$0xff]  ;;  %v1826_v30 = vld [vmem:[%s3535_s4 + $0x348] sm:$0xff] }
  0x25   : > { %2527 = vmatpush3.bf16.msra.mxu1 %v2524_v48  ;;  %v2556_v48 = vpack.c.bf16 %v346_v45, %v345_v44  ;;  %v1000_v20 = vld [vmem:[%s3142_s17 + $0x41] sm:$0xff]  ;;  %v3252_v21 = vld [vmem:[%s3131_s13 + $0x50] sm:$0xff]  ;;  %v1756_v38 = vld [vmem:[%s3535_s4 + $0x158] sm:$0xff] }
  0x26   : > { %2655 = vmatpush3.bf16.msra.mxu0 %v2652_v49  ;;  %2529 = vmatprep.subr.bf16.mxu1 %v2528_v54  ;;  %v2684_v49 = vpack.c.bf16 %v1808_v47, %v1807_v46  ;;  %v1001_v23 = vld [vmem:[%s3142_s17 + $0x51] sm:$0xff]  ;;  %v3270_v31 = vld [vmem:[%s3131_s13 + $0x60] sm:$0xff]  ;;  %v1758_v45 = vld [vmem:[%s3535_s4 + $0x168] sm:$0xff] }
  0x27   : > { %2657 = vmatprep.subr.bf16.mxu0 %v2656_v55  ;;  %v1002_v32 = vld [vmem:[%s3142_s17 + $0x61] sm:$0xff]  ;;  %v3274_v33 = vld [vmem:[%s3131_s13 + $0x70] sm:$0xff]  ;;  %v1828_v40 = vld [vmem:[%s3535_s4 + $0x358] sm:$0xff] }
  0x28   : > { %2133 = vmatmul.mubr.f32.vlgmr.msra.gmra.mrb[0].mxu1 %v3064_v60  ;;  %v1827_v39 = vld [vmem:[%s3535_s4 + $0x350] sm:$0xff]  ;;  %v582_v41 = vld [vmem:[%s3131_s13 + $0x1] sm:$0xff]  ;;  %v1844_v2 = vld [vmem:[%s3535_s4 + $0x398] sm:$0xff] }
  0x29   : > { %2531 = vmatpush3.bf16.msra.mxu1 %v2528_v54  ;;  %2309 = vmatmul.mubr.f32.vlgmr.msra.gmra.mrb[0].mxu0 %v859_v61  ;;  %v2560_v54 = vpack.c.bf16 %v1746_v51, %v1745_v50  ;;  %v3209_v61 = vld [vmem:[%s3131_s13 + $0x10] sm:$0xff]  ;;  %v1757_v44 = vld [vmem:[%s3535_s4 + $0x160] sm:$0xff]  ;;  %v1830_v47 = vld [vmem:[%s3535_s4 + $0x368] sm:$0xff] }
  0x2a   : > { %2659 = vmatpush3.bf16.msra.mxu0 %v2656_v55  ;;  %2533 = vmatprep.subr.bf16.mxu1 %v2532_v62  ;;  %v2688_v55 = vpack.c.bf16 %v1818_v53, %v1817_v52  ;;  %v1829_v46 = vld [vmem:[%s3535_s4 + $0x360] sm:$0xff]  ;;  %v1759_v50 = vld [vmem:[%s3535_s4 + $0x170] sm:$0xff]  ;;  %v1760_v51 = vld [vmem:[%s3535_s4 + $0x178] sm:$0xff] }
  0x2b   : > { %2661 = vmatprep.subr.bf16.mxu0 %v2660_v63  ;;  %2135 = vmatprep.mubr.f32.mxu1 %v3081_v4  ;;  %v1831_v52 = vld [vmem:[%s3535_s4 + $0x370] sm:$0xff]  ;;  %v1832_v53 = vld [vmem:[%s3535_s4 + $0x378] sm:$0xff]  ;;  %v1841_v58 = vld [vmem:[%s3535_s4 + $0x380] sm:$0xff] }
  0x2c   : > { %2311 = vmatprep.mubr.f32.mxu0 %v860_v5  ;;  %2136 = vmatmul.mubr.f32.gmra.mrb[2].mxu1 %v3085_v6  ;;  %v1822_v5 = vld [vmem:[%s3535_s4 + $0x328] sm:$0xff]  ;;  %v1843_v1 = vld [vmem:[%s3535_s4 + $0x390] sm:$0xff] }
  0x2d   : > { %2535 = vmatpush3.bf16.msra.mxu1 %v2532_v62  ;;  %2312 = vmatmul.mubr.f32.gmra.mrb[2].mxu0 %v861_v8  ;;  %v997_v62 = vld [vmem:[%s3142_s17 + $0x11] sm:$0xff]  ;;  %v998_v8 = vld [vmem:[%s3142_s17 + $0x21] sm:$0xff]  ;;  %v2696_v12 = vpack.c.bf16 %v1822_v5, %v1821_v3 }
  0x2e   : > { %2663 = vmatpush3.bf16.msra.mxu0 %v2660_v63  ;;  %2537 = vmatprep.subr.bf16.mxu1 %v2536_v7  ;;  %v2564_v63 = vpack.c.bf16 %v1748_v57, %v1747_v56  ;;  %v1761_v56 = vld [vmem:[%s3535_s4 + $0x180] sm:$0xff]  ;;  %v1762_v57 = vld [vmem:[%s3535_s4 + $0x188] sm:$0xff]  ;;  %v3342_v3 = vld [vmem:[%s3131_s13 + $0x11] sm:$0xff] }
  0x2f   : > { %2665 = vmatprep.subr.bf16.mxu0 %v2664_v9  ;;  %2138 = vmatprep.mubr.f32.mxu1 %v3103_v14  ;;  %v1842_v59 = vld [vmem:[%s3535_s4 + $0x388] sm:$0xff] }
  0x30   : > { %2314 = vmatprep.mubr.f32.mxu0 %v862_v15  ;;  %2139 = vmatmul.mubr.f32.gmra.mrb[4].mxu1 %v3107_v16  ;;  %v1752_v15 = vld [vmem:[%s3535_s4 + $0x138] sm:$0xff] }
  0x31   : > { %2539 = vmatpush3.bf16.msra.mxu1 %v2536_v7  ;;  %2315 = vmatmul.mubr.f32.gmra.mrb[4].mxu0 %v863_v18  ;;  %v3226_v7 = vld [vmem:[%s3131_s13 + $0x20] sm:$0xff]  ;;  %v1824_v18 = vld [vmem:[%s3535_s4 + $0x338] sm:$0xff]  ;;  %v2572_v22 = vpack.c.bf16 %v1752_v15, %v1751_v13  ;;  %v1846_v13 = vld [vmem:[%s3535_s4 + $0x3a8] sm:$0xff] }
  0x32   : > { %2667 = vmatpush3.bf16.msra.mxu0 %v2664_v9  ;;  %2541 = vmatprep.subr.bf16.mxu1 %v2540_v17  ;;  %v3230_v9 = vld [vmem:[%s3131_s13 + $0x30] sm:$0xff]  ;;  %v3358_v15 = vld [vmem:[%s3131_s13 + $0x21] sm:$0xff] }
  0x33   : > { %2669 = vmatprep.subr.bf16.mxu0 %v2668_v19  ;;  %2141 = vmatprep.mubr.f32.mxu1 %v3125_v24 }
  0x34   : > { %2317 = vmatprep.mubr.f32.mxu0 %v864_v25  ;;  %2142 = vmatmul.mubr.f32.gmra.mrb[6].mxu1 %v3135_v26 }
  0x35   : > { %2543 = vmatpush3.bf16.msra.mxu1 %v2540_v17  ;;  %2318 = vmatmul.mubr.f32.gmra.mrb[6].mxu0 %v865_v28  ;;  %v1823_v17 = vld [vmem:[%s3535_s4 + $0x330] sm:$0xff]  ;;  %v1754_v28 = vld [vmem:[%s3535_s4 + $0x148] sm:$0xff] }
  0x36   : > { %2671 = vmatpush3.bf16.msra.mxu0 %v2668_v19  ;;  %2545 = vmatprep.subr.bf16.mxu1 %v2544_v27  ;;  %v3248_v19 = vld [vmem:[%s3131_s13 + $0x40] sm:$0xff]  ;;  %v2700_v25 = vpack.c.bf16 %v1824_v18, %v1823_v17  ;;  %v3362_v17 = vld [vmem:[%s3131_s13 + $0x31] sm:$0xff] }
  0x37   : > { %2673 = vmatprep.subr.bf16.mxu0 %v2672_v29  ;;  %2176 = vmatprep.mubr.f32.mxu1 %v323_v34 }
  0x38   : > { %2352 = vmatprep.mubr.f32.mxu0 %v996_v35  ;;  %v1003_v35 = vld [vmem:[%s3142_s17 + $0x71] sm:$0xff] }
  0x39   : > { %2547 = vmatpush3.bf16.msra.mxu1 %v2544_v27  ;;  %v1753_v27 = vld [vmem:[%s3535_s4 + $0x140] sm:$0xff] }
  0x3a   : > { %2675 = vmatpush3.bf16.msra.mxu0 %v2672_v29  ;;  %2549 = vmatprep.subr.bf16.mxu1 %v2548_v36  ;;  %v1825_v29 = vld [vmem:[%s3535_s4 + $0x340] sm:$0xff]  ;;  %v2576_v34 = vpack.c.bf16 %v1754_v28, %v1753_v27  ;;  %v3384_v28 = vld [vmem:[%s3131_s13 + $0x51] sm:$0xff] }
  0x3b   : > { %2677 = vmatprep.subr.bf16.mxu0 %v2676_v37  ;;  %v3380_v27 = vld [vmem:[%s3131_s13 + $0x41] sm:$0xff] }
  0x3d   : > { %2551 = vmatpush3.bf16.msra.mxu1 %v2548_v36  ;;  %v2704_v36 = vpack.c.bf16 %v1826_v30, %v1825_v29 }
  0x3e   : > { %2679 = vmatpush3.bf16.msra.mxu0 %v2676_v37  ;;  %2553 = vmatprep.subr.bf16.mxu1 %v2552_v42  ;;  %v1755_v37 = vld [vmem:[%s3535_s4 + $0x150] sm:$0xff] }
  0x3f   : > { %2681 = vmatprep.subr.bf16.mxu0 %v2680_v43 }
  0x41   : > { %2555 = vmatpush3.bf16.msra.mxu1 %v2552_v42  ;;  %v2580_v42 = vpack.c.bf16 %v1756_v38, %v1755_v37  ;;  %v1816_v38 = vld [vmem:[%s3131_s13 + $0x80] sm:$0xff] }
  0x42   : > { %2683 = vmatpush3.bf16.msra.mxu0 %v2680_v43  ;;  %2557 = vmatprep.subr.bf16.mxu1 %v2556_v48  ;;  %v2708_v43 = vpack.c.bf16 %v1828_v40, %v1827_v39  ;;  %v1772_v40 = vld [vmem:[%s3535_s4 + $0x1d8] sm:$0xff] }
  0x43   : > { %2685 = vmatprep.subr.bf16.mxu0 %v2684_v49 }
  0x45   : > { %2559 = vmatpush3.bf16.msra.mxu1 %v2556_v48  ;;  %v2584_v48 = vpack.c.bf16 %v1758_v45, %v1757_v44  ;;  %v1773_v45 = vld [vmem:[%s3535_s4 + $0x1e0] sm:$0xff] }
  0x46   : > { %2687 = vmatpush3.bf16.msra.mxu0 %v2684_v49  ;;  %2561 = vmatprep.subr.bf16.mxu1 %v2560_v54  ;;  %v2712_v49 = vpack.c.bf16 %v1830_v47, %v1829_v46  ;;  %v1774_v46 = vld [vmem:[%s3535_s4 + $0x1e8] sm:$0xff] }
  0x47   : > { %2689 = vmatprep.subr.bf16.mxu0 %v2688_v55  ;;  %v1854_v47 = vld [vmem:[%s3535_s4 + $0x3e8] sm:$0xff] }
  0x48   : > { %2177 = vmatmul.mubr.f32.vlgmr.msra.gmra.mrb[0].mxu1 %v3209_v61 }
  0x49   : > { %2563 = vmatpush3.bf16.msra.mxu1 %v2560_v54  ;;  %2353 = vmatmul.mubr.f32.vlgmr.msra.gmra.mrb[0].mxu0 %v997_v62  ;;  %v2588_v54 = vpack.c.bf16 %v1760_v51, %v1759_v50  ;;  %v2720_v62 = vpack.c.bf16 %v1842_v59, %v1841_v58  ;;  %v1775_v50 = vld [vmem:[%s3535_s4 + $0x1f0] sm:$0xff]  ;;  %v1776_v51 = vld [vmem:[%s3535_s4 + $0x1f8] sm:$0xff] }
  0x4a   : > { %2691 = vmatpush3.bf16.msra.mxu0 %v2688_v55  ;;  %2565 = vmatprep.subr.bf16.mxu1 %v2564_v63  ;;  %v2716_v55 = vpack.c.bf16 %v1832_v53, %v1831_v52  ;;  %v1855_v52 = vld [vmem:[%s3535_s4 + $0x3f0] sm:$0xff]  ;;  %v2620_v53 = vpack.c.bf16 %v1776_v51, %v1775_v50  ;;  %v1868_v59 = vld [vmem:[%s3535_s4 + $0x418] sm:$0xff] }
  0x4b   : > { %2693 = vmatprep.subr.bf16.mxu0 %v2692_v0  ;;  %2179 = vmatprep.mubr.f32.mxu1 %v3226_v7  ;;  %v1867_v58 = vld [vmem:[%s3535_s4 + $0x410] sm:$0xff] }
  0x4c   : > { %2355 = vmatprep.mubr.f32.mxu0 %v998_v8  ;;  %2180 = vmatmul.mubr.f32.gmra.mrb[2].mxu1 %v3230_v9  ;;  %v2724_v8 = vpack.c.bf16 %v1844_v2, %v1843_v1  ;;  %v1870_v1 = vld [vmem:[%s3535_s4 + $0x428] sm:$0xff]  ;;  %v723_v2 = vld [vmem:[%s3142_s17 + $0x30] sm:$0xff] }
  0x4d   : > { %2567 = vmatpush3.bf16.msra.mxu1 %v2564_v63  ;;  %2356 = vmatmul.mubr.f32.gmra.mrb[2].mxu0 %v999_v11  ;;  %v1763_v63 = vld [vmem:[%s3535_s4 + $0x190] sm:$0xff]  ;;  %v1766_v11 = vld [vmem:[%s3535_s4 + $0x1a8] sm:$0xff] }
  0x4e   : > { %2695 = vmatpush3.bf16.msra.mxu0 %v2692_v0  ;;  %2569 = vmatprep.subr.bf16.mxu1 %v2568_v10  ;;  %v1764_v0 = vld [vmem:[%s3535_s4 + $0x198] sm:$0xff] }
  0x4f   : > { %2697 = vmatprep.subr.bf16.mxu0 %v2696_v12  ;;  %2182 = vmatprep.mubr.f32.mxu1 %v3248_v19  ;;  %v2596_v5 = vpack.c.bf16 %v1764_v0, %v1763_v63  ;;  %v2756_v63 = vpack.c.bf16 %v1868_v59, %v1867_v58  ;;  %v1869_v0 = vld [vmem:[%s3535_s4 + $0x420] sm:$0xff] }
  0x50   : > { %2358 = vmatprep.mubr.f32.mxu0 %v1000_v20  ;;  %2183 = vmatmul.mubr.f32.gmra.mrb[4].mxu1 %v3252_v21 }
  0x51   : > { %2571 = vmatpush3.bf16.msra.mxu1 %v2568_v10  ;;  %2359 = vmatmul.mubr.f32.gmra.mrb[4].mxu0 %v1001_v23  ;;  %v1765_v10 = vld [vmem:[%s3535_s4 + $0x1a0] sm:$0xff]  ;;  %v1768_v23 = vld [vmem:[%s3535_s4 + $0x1b8] sm:$0xff] }
  0x52   : > { %2699 = vmatpush3.bf16.msra.mxu0 %v2696_v12  ;;  %2573 = vmatprep.subr.bf16.mxu1 %v2572_v22  ;;  %v1845_v12 = vld [vmem:[%s3535_s4 + $0x3a0] sm:$0xff]  ;;  %v2600_v18 = vpack.c.bf16 %v1766_v11, %v1765_v10  ;;  %v1871_v10 = vld [vmem:[%s3535_s4 + $0x430] sm:$0xff] }
  0x53   : > { %2701 = vmatprep.subr.bf16.mxu0 %v2700_v25  ;;  %2185 = vmatprep.mubr.f32.mxu1 %v3270_v31  ;;  %v2728_v20 = vpack.c.bf16 %v1846_v13, %v1845_v12  ;;  %v725_v11 = vld [vmem:[%s3142_s17 + $0x50] sm:$0xff]  ;;  %v1873_v13 = vld [vmem:[%s3535_s4 + $0x440] sm:$0xff] }
  0x54   : > { %2361 = vmatprep.mubr.f32.mxu0 %v1002_v32  ;;  %2186 = vmatmul.mubr.f32.gmra.mrb[6].mxu1 %v3274_v33  ;;  %v1770_v32 = vld [vmem:[%s3535_s4 + $0x1c8] sm:$0xff] }
  0x55   : > { %2575 = vmatpush3.bf16.msra.mxu1 %v2572_v22  ;;  %2362 = vmatmul.mubr.f32.gmra.mrb[6].mxu0 %v1003_v35  ;;  %v1767_v22 = vld [vmem:[%s3535_s4 + $0x1b0] sm:$0xff]  ;;  %v3402_v35 = vld [vmem:[%s3131_s13 + $0x61] sm:$0xff] }
  0x56   : > { %2703 = vmatpush3.bf16.msra.mxu0 %v2700_v25  ;;  %2577 = vmatprep.subr.bf16.mxu1 %v2576_v34  ;;  %v1848_v25 = vld [vmem:[%s3535_s4 + $0x3b8] sm:$0xff]  ;;  %v2604_v29 = vpack.c.bf16 %v1768_v23, %v1767_v22  ;;  %v1875_v22 = vld [vmem:[%s3535_s4 + $0x450] sm:$0xff] }
  0x57   : > { %2705 = vmatprep.subr.bf16.mxu0 %v2704_v36  ;;  %2220 = vmatprep.mubr.f32.mxu1 %v582_v41  ;;  %v1852_v41 = vld [vmem:[%s3535_s4 + $0x3d8] sm:$0xff] }
  0x58   : > { %2396 = vmatprep.mubr.f32.mxu0 %v3209_v61  ;;  %v2592_v61 = vpack.c.bf16 %v1762_v57, %v1761_v56  ;;  %v1866_v56 = vld [vmem:[%s3535_s4 + $0x408] sm:$0xff]  ;;  %v1876_v23 = vld [vmem:[%s3535_s4 + $0x458] sm:$0xff] }
  0x59   : > { %2579 = vmatpush3.bf16.msra.mxu1 %v2576_v34  ;;  %v1850_v34 = vld [vmem:[%s3535_s4 + $0x3c8] sm:$0xff] }
  0x5a   : > { %2707 = vmatpush3.bf16.msra.mxu0 %v2704_v36  ;;  %2581 = vmatprep.subr.bf16.mxu1 %v2580_v42  ;;  %v3406_v36 = vld [vmem:[%s3131_s13 + $0x71] sm:$0xff] }
  0x5b   : > { %2709 = vmatprep.subr.bf16.mxu0 %v2708_v43 }
  0x5d   : > { %2583 = vmatpush3.bf16.msra.mxu1 %v2580_v42  ;;  %v720_v42 = vld [vmem:[%s3142_s17] sm:$0xff] }
  0x5e   : > { %2711 = vmatpush3.bf16.msra.mxu0 %v2708_v43  ;;  %2585 = vmatprep.subr.bf16.mxu1 %v2584_v48 }
  0x5f   : > { %2713 = vmatprep.subr.bf16.mxu0 %v2712_v49 }
  0x61   : > { %2587 = vmatpush3.bf16.msra.mxu1 %v2584_v48  ;;  %v2616_v48 = vpack.c.bf16 %v1774_v46, %v1773_v45 }
  0x62   : > { %2715 = vmatpush3.bf16.msra.mxu0 %v2712_v49  ;;  %2589 = vmatprep.subr.bf16.mxu1 %v2588_v54 }
  0x63   : > { %2717 = vmatprep.subr.bf16.mxu0 %v2716_v55 }
  0x65   : > { %2591 = vmatpush3.bf16.msra.mxu1 %v2588_v54 }
  0x66   : > { %2719 = vmatpush3.bf16.msra.mxu0 %v2716_v55  ;;  %2593 = vmatprep.subr.bf16.mxu1 %v2592_v61  ;;  %v1865_v55 = vld [vmem:[%s3535_s4 + $0x400] sm:$0xff] }
  0x67   : > { %2721 = vmatprep.subr.bf16.mxu0 %v2720_v62  ;;  %v2752_v57 = vpack.c.bf16 %v1866_v56, %v1865_v55 }
  0x68   : > { %2221 = vmatmul.mubr.f32.vlgmr.msra.gmra.mrb[0].mxu1 %v3342_v3 }
  0x69   : > { %2595 = vmatpush3.bf16.msra.mxu1 %v2592_v61  ;;  %2397 = vmatmul.mubr.f32.vlgmr.msra.gmra.mrb[0].mxu0 %v3226_v7  ;;  %v1847_v7 = vld [vmem:[%s3535_s4 + $0x3b0] sm:$0xff] }
  0x6a   : > { %2723 = vmatpush3.bf16.msra.mxu0 %v2720_v62  ;;  %2597 = vmatprep.subr.bf16.mxu1 %v2596_v5  ;;  %v2732_v30 = vpack.c.bf16 %v1848_v25, %v1847_v7  ;;  %v721_v61 = vld [vmem:[%s3142_s17 + $0x10] sm:$0xff]  ;;  %v722_v62 = vld [vmem:[%s3142_s17 + $0x20] sm:$0xff]  ;;  %v1878_v7 = vld [vmem:[%s3535_s4 + $0x468] sm:$0xff] }
  0x6b   : > { %2725 = vmatprep.subr.bf16.mxu0 %v2724_v8  ;;  %2223 = vmatprep.mubr.f32.mxu1 %v3358_v15 }
  0x6c   : > { %2399 = vmatprep.mubr.f32.mxu0 %v3230_v9  ;;  %2224 = vmatmul.mubr.f32.gmra.mrb[2].mxu1 %v3362_v17  ;;  %v1769_v9 = vld [vmem:[%s3535_s4 + $0x1c0] sm:$0xff] }
  0x6d   : > { %2599 = vmatpush3.bf16.msra.mxu1 %v2596_v5  ;;  %2400 = vmatmul.mubr.f32.gmra.mrb[2].mxu0 %v3248_v19  ;;  %v1849_v19 = vld [vmem:[%s3535_s4 + $0x3c0] sm:$0xff]  ;;  %v2608_v37 = vpack.c.bf16 %v1770_v32, %v1769_v9 }
  0x6e   : > { %2727 = vmatpush3.bf16.msra.mxu0 %v2724_v8  ;;  %2601 = vmatprep.subr.bf16.mxu1 %v2600_v18  ;;  %v2736_v39 = vpack.c.bf16 %v1850_v34, %v1849_v19  ;;  %v724_v5 = vld [vmem:[%s3142_s17 + $0x40] sm:$0xff]  ;;  %v2760_v8 = vpack.c.bf16 %v1870_v1, %v1869_v0 }
  0x6f   : > { %2729 = vmatprep.subr.bf16.mxu0 %v2728_v20  ;;  %2226 = vmatprep.mubr.f32.mxu1 %v3380_v27 }
  0x70   : > { %2402 = vmatprep.mubr.f32.mxu0 %v3252_v21  ;;  %2227 = vmatmul.mubr.f32.gmra.mrb[4].mxu1 %v3384_v28  ;;  %v1771_v21 = vld [vmem:[%s3535_s4 + $0x1d0] sm:$0xff] }
  0x71   : > { %2603 = vmatpush3.bf16.msra.mxu1 %v2600_v18  ;;  %2403 = vmatmul.mubr.f32.gmra.mrb[4].mxu0 %v3270_v31  ;;  %v1851_v31 = vld [vmem:[%s3535_s4 + $0x3d0] sm:$0xff]  ;;  %v2612_v43 = vpack.c.bf16 %v1772_v40, %v1771_v21  ;;  %v1874_v18 = vld [vmem:[%s3535_s4 + $0x448] sm:$0xff] }
  0x72   : > { %2731 = vmatpush3.bf16.msra.mxu0 %v2728_v20  ;;  %2605 = vmatprep.subr.bf16.mxu1 %v2604_v29  ;;  %v2740_v44 = vpack.c.bf16 %v1852_v41, %v1851_v31  ;;  %v2768_v20 = vpack.c.bf16 %v1874_v18, %v1873_v13 }
  0x73   : > { %2733 = vmatprep.subr.bf16.mxu0 %v2732_v30  ;;  %2229 = vmatprep.mubr.f32.mxu1 %v3402_v35 }
  0x74   : > { %2405 = vmatprep.mubr.f32.mxu0 %v3274_v33  ;;  %2230 = vmatmul.mubr.f32.gmra.mrb[6].mxu1 %v3406_v36  ;;  %v1853_v33 = vld [vmem:[%s3535_s4 + $0x3e0] sm:$0xff] }
  0x75   : > { %2607 = vmatpush3.bf16.msra.mxu1 %v2604_v29  ;;  %2406 = vmatmul.mubr.f32.gmra.mrb[6].mxu0 %v1816_v38  ;;  %v2744_v49 = vpack.c.bf16 %v1854_v47, %v1853_v33  ;;  %v1879_v29 = vld [vmem:[%s3535_s4 + $0x470] sm:$0xff] }
  0x76   : > { %2735 = vmatpush3.bf16.msra.mxu0 %v2732_v30  ;;  %2609 = vmatprep.subr.bf16.mxu1 %v2608_v37  ;;  %v1880_v30 = vld [vmem:[%s3535_s4 + $0x478] sm:$0xff] }
  0x77   : > { %2737 = vmatprep.subr.bf16.mxu0 %v2736_v39  ;;  %2264 = vmatprep.mubr.f32.mxu1 %v720_v42 }
  0x78   : > { %2440 = vmatprep.mubr.f32.mxu0 %v3064_v60  ;;  %v1856_v60 = vld [vmem:[%s3535_s4 + $0x3f8] sm:$0xff] }
  0x79   : > { %2611 = vmatpush3.bf16.msra.mxu1 %v2608_v37  ;;  %v2748_v54 = vpack.c.bf16 %v1856_v60, %v1855_v52 }
  0x7a   : > { %2739 = vmatpush3.bf16.msra.mxu0 %v2736_v39  ;;  %2613 = vmatprep.subr.bf16.mxu1 %v2612_v43 }
  0x7b   : > { %2741 = vmatprep.subr.bf16.mxu0 %v2740_v44 }
  0x7d   : > { %2615 = vmatpush3.bf16.msra.mxu1 %v2612_v43 }
  0x7e   : > { %2743 = vmatpush3.bf16.msra.mxu0 %v2740_v44  ;;  %2617 = vmatprep.subr.bf16.mxu1 %v2616_v48 }
  0x7f   : > { %2745 = vmatprep.subr.bf16.mxu0 %v2744_v49 }
  0x81   : > { %2619 = vmatpush3.bf16.msra.mxu1 %v2616_v48 }
  0x82   : > { %2747 = vmatpush3.bf16.msra.mxu0 %v2744_v49  ;;  %2621 = vmatprep.subr.bf16.mxu1 %v2620_v53 }
  0x83   : > { %2749 = vmatprep.subr.bf16.mxu0 %v2748_v54 }
  0x85   : > { %2623 = vmatpush3.bf16.msra.mxu1 %v2620_v53 }
  0x86   : > { %2751 = vmatpush3.bf16.msra.mxu0 %v2748_v54  ;;  %2784 = vmatprep.subr.bf16.mxu1 %v2752_v57 }
  0x87   : > { %2753 = vmatprep.subr.bf16.mxu0 %v2752_v57 }
  0x88   : > { %2265 = vmatmul.mubr.f32.vlgmr.msra.gmra.mrb[0].mxu1 %v721_v61 }
  0x89   : > { %2441 = vmatmul.mubr.f32.vlgmr.msra.gmra.mrb[0].mxu0 %v3081_v4  ;;  %2792 = vmatpush3.bf16.msra.mxu1 %v2752_v57  ;;  %v1872_v4 = vld [vmem:[%s3535_s4 + $0x438] sm:$0xff] }
  0x8a   : > { %2755 = vmatpush3.bf16.msra.mxu0 %v2752_v57  ;;  %2267 = vmatprep.mubr.f32.mxu1 %v722_v62  ;;  %v2764_v12 = vpack.c.bf16 %v1872_v4, %v1871_v10 }
  0x8b   : > { %2443 = vmatprep.mubr.f32.mxu0 %v3085_v6  ;;  %2757 = vmatprep.subr.bf16.mxu0 %v2756_v63  ;;  %v726_v6 = vld [vmem:[%s3142_s17 + $0x60] sm:$0xff] }
  0x8c   : > { %2268 = vmatmul.mubr.f32.gmra.mrb[2].mxu1 %v723_v2  ;;  %2785 = vmatprep.subr.bf16.mxu1 %v2756_v63 }
  0x8d   : > { %2444 = vmatmul.mubr.f32.gmra.mrb[2].mxu0 %v3103_v14  ;;  %2793 = vmatpush3.bf16.msra.mxu1 %v2756_v63  ;;  %v727_v14 = vld [vmem:[%s3142_s17 + $0x70] sm:$0xff] }
  0x8e   : > { %2759 = vmatpush3.bf16.msra.mxu0 %v2756_v63  ;;  %2270 = vmatprep.mubr.f32.mxu1 %v724_v5 }
  0x8f   : > { %2446 = vmatprep.mubr.f32.mxu0 %v3107_v16  ;;  %2761 = vmatprep.subr.bf16.mxu0 %v2760_v8  ;;  %v1840_v16 = vld [vmem:[%s2981_s12 + $0x80] sm:$0xff] }
  0x90   : > { %2271 = vmatmul.mubr.f32.gmra.mrb[4].mxu1 %v725_v11  ;;  %2786 = vmatprep.subr.bf16.mxu1 %v2760_v8 }
  0x91   : > { %2447 = vmatmul.mubr.f32.gmra.mrb[4].mxu0 %v3125_v24  ;;  %2794 = vmatpush3.bf16.msra.mxu1 %v2760_v8  ;;  %v2772_v24 = vpack.c.bf16 %v1876_v23, %v1875_v22 }
  0x92   : > { %2763 = vmatpush3.bf16.msra.mxu0 %v2760_v8  ;;  %2273 = vmatprep.mubr.f32.mxu1 %v726_v6 }
  0x93   : > { %2449 = vmatprep.mubr.f32.mxu0 %v3135_v26  ;;  %2765 = vmatprep.subr.bf16.mxu0 %v2764_v12  ;;  %v1877_v26 = vld [vmem:[%s3535_s4 + $0x460] sm:$0xff] }
  0x94   : > { %2274 = vmatmul.mubr.f32.gmra.mrb[6].mxu1 %v727_v14  ;;  %2787 = vmatprep.subr.bf16.mxu1 %v2764_v12  ;;  %v2776_v25 = vpack.c.bf16 %v1878_v7, %v1877_v26 }
  0x95   : > { %2450 = vmatmul.mubr.f32.gmra.mrb[6].mxu0 %v1840_v16  ;;  %2795 = vmatpush3.bf16.msra.mxu1 %v2764_v12 }
  0x96   : > { %2767 = vmatpush3.bf16.msra.mxu0 %v2764_v12  ;;  %2788 = vmatprep.subr.bf16.mxu1 %v2768_v20 }
  0x97   : > { %2769 = vmatprep.subr.bf16.mxu0 %v2768_v20  ;;  %2484 = vmatprep.mubr.f32.mxu0 %v3342_v3  ;;  %v2780_v3 = vpack.c.bf16 %v1880_v30, %v1879_v29 }
  0x98   : > { %2490 = vmatprep.mubr.f32.mxu1 %v3384_v28  ;;  %v1864_v28 = vld [vmem:[%s3131_s13 + $0x81] sm:$0xff]  ;;  %s1883_s13 = sshll.u32 %s3539_s22, 6 }
  0x99   : > { %2796 = vmatpush3.bf16.msra.mxu1 %v2768_v20  ;;  %s318_s8 = scalar_lea.vmem %s3536_s5, %s1883_s13 }
  0x9a   : > { %2771 = vmatpush3.bf16.msra.mxu0 %v2768_v20  ;;  %2789 = vmatprep.subr.bf16.mxu1 %v2772_v24 }
  0x9b   : > { %2773 = vmatprep.subr.bf16.mxu0 %v2772_v24 }
  0x9d   : > { %2797 = vmatpush3.bf16.msra.mxu1 %v2772_v24 }
  0x9e   : > { %2775 = vmatpush3.bf16.msra.mxu0 %v2772_v24  ;;  %2790 = vmatprep.subr.bf16.mxu1 %v2776_v25 }
  0x9f   : > { %2777 = vmatprep.subr.bf16.mxu0 %v2776_v25 }
  0xa1   : > { %2798 = vmatpush3.bf16.msra.mxu1 %v2776_v25 }
  0xa2   : > { %2779 = vmatpush3.bf16.msra.mxu0 %v2776_v25  ;;  %2791 = vmatprep.subr.bf16.mxu1 %v2780_v3 }
  0xa3   : > { %2781 = vmatprep.subr.bf16.mxu0 %v2780_v3 }
  0xa5   : > { %2799 = vmatpush3.bf16.msra.mxu1 %v2780_v3 }
  0xa6   : > { %2783 = vmatpush3.bf16.msra.mxu0 %v2780_v3 }
  0xa8   : > { %2491 = vmatmul.mubr.f32.vlgmr.msra.gmra.mrb[8].mxu1 %v3402_v35 }
  0xa9   : > { %2485 = vmatmul.mubr.f32.vlgmr.msra.gmra.mrb[0].mxu0 %v3358_v15  ;;  %2493 = vmatprep.mubr.f32.mxu1 %v3406_v36 }
  0xaa   : > { %2487 = vmatprep.mubr.f32.mxu0 %v3362_v17 }
  0xac   : > { %2494 = vmatmul.mubr.f32.gmra.mrb[10].mxu1 %v1864_v28 }
  0xad   : > { %2488 = vmatmul.mubr.f32.gmra.mrb[2].mxu0 %v3380_v27 }
 0x15b   : > { %v2266_v9 = vpop.f32.mrb[0].mxu1 }
 0x15c   : > { %v811_v32 = vpop.f32.mrb[1].mxu1 }
 0x15f   : > { %v2269_v19 = vpop.f32.mrb[2].mxu1 }
 0x160   : > { %v821_v34 = vpop.f32.mrb[3].mxu1 }
 0x163   : > { %v2272_v37 = vpop.f32.mrb[4].mxu1 }
 0x164   : > { %v2448_v38 = vpop.f32.mrb[4].mxu0  ;;  %v831_v39 = vpop.f32.mrb[5].mxu1 }
 0x165   : > { %v2804_v21 = vadd.f32 %v2448_v38, %v2272_v37  ;;  %v1385_v35 = vpop.f32.mrb[5].mxu0 }
 0x166   : > { %v2806_v40 = vadd.f32 %v1385_v35, %v831_v39 }
 0x167   : > { %v2275_v15 = vpop.f32.mrb[6].mxu1 }
 0x168   : > { %v2451_v31 = vpop.f32.mrb[6].mxu0  ;;  %v841_v36 = vpop.f32.mrb[7].mxu1 }
 0x169   : > { %v2808_v41 = vadd.f32 %v2451_v31, %v2275_v15  ;;  %v1395_v42 = vpop.f32.mrb[7].mxu0 }
 0x16a   : > { %v2810_v17 = vadd.f32 %v1395_v42, %v841_v36 }
 0x17b   : > { %v2492_v27 = vpop.f32.mrb[8].mxu1 }
 0x17c   : > { %v2486_v43 = vpop.f32.mrb[0].mxu0  ;;  %v2805_v44 = vadd.f32 %v2804_v21, %v2492_v27  ;;  %v1523_v45 = vpop.f32.mrb[9].mxu1 }
 0x17d   : > { %v2800_v46 = vadd.f32 %v2486_v43, %v2266_v9  ;;  %v1503_v33 = vpop.f32.mrb[1].mxu0  ;;  %v2807_v47 = vadd.f32 %v2806_v40, %v1523_v45 }
 0x17e   : > { %1555 = vst [vmem:[%s318_s8 + $0x28] sm:$0xff] %v2805_v44  ;;  %v2801_v48 = vadd.f32 %v1503_v33, %v811_v32  ;;  %v1576_v10 = vmul.f32 %v2805_v44, %v2805_v44 }
 0x17f   : > { %1551 = vst [vmem:[%s318_s8 + $0x8] sm:$0xff] %v2800_v46  ;;  %v1572_v49 = vmul.f32 %v2800_v46, %v2800_v46  ;;  %1554 = vst [vmem:[%s318_s8 + $0x20] sm:$0xff] %v2807_v47  ;;  %v2495_v50 = vpop.f32.mrb[10].mxu1  ;;  %v1575_v2 = vmul.f32 %v2807_v47, %v2807_v47 }
 0x180   : > { %1550 = vst [vmem:[%s318_s8] sm:$0xff] %v2801_v48  ;;  %v1558_v51 = vadd.f32 %v2801_v48, %v2800_v46  ;;  %v1571_v52 = vmul.f32 %v2801_v48, %v2801_v48  ;;  %v2489_v60 = vpop.f32.mrb[2].mxu0  ;;  %v2809_v53 = vadd.f32 %v2808_v41, %v2495_v50  ;;  %v1533_v54 = vpop.f32.mrb[11].mxu1 }
 0x181   : > { %v2802_v55 = vadd.f32 %v2489_v60, %v2269_v19  ;;  %v1513_v56 = vpop.f32.mrb[3].mxu0  ;;  %v2811_v57 = vadd.f32 %v2810_v17, %v1533_v54 }
 0x182   : > { %v1579_v58 = vadd.f32 %v1572_v49, %v1571_v52  ;;  %1557 = vst [vmem:[%s318_s8 + $0x38] sm:$0xff] %v2809_v53  ;;  %v2803_v59 = vadd.f32 %v1513_v56, %v821_v34  ;;  %v1578_v18 = vmul.f32 %v2809_v53, %v2809_v53 }
 0x183   : > { %1553 = vst [vmem:[%s318_s8 + $0x18] sm:$0xff] %v2802_v55  ;;  %1556 = vst [vmem:[%s318_s8 + $0x30] sm:$0xff] %v2811_v57  ;;  %v1574_v63 = vmul.f32 %v2802_v55, %v2802_v55  ;;  %v1577_v12 = vmul.f32 %v2811_v57, %v2811_v57 }
 0x184   : > { %1552 = vst [vmem:[%s318_s8 + $0x10] sm:$0xff] %v2803_v59  ;;  %v1559_v61 = vadd.f32 %v2803_v59, %v1558_v51  ;;  %v1573_v62 = vmul.f32 %v2803_v59, %v2803_v59 }
 0x186   : > { %v1560_v0 = vadd.f32 %v2802_v55, %v1559_v61  ;;  %v1580_v1 = vadd.f32 %v1579_v58, %v1573_v62 }
 0x188   : > { %v1581_v5 = vadd.f32 %v1580_v1, %v1574_v63  ;;  %v1561_v8 = vadd.f32 %v2807_v47, %v1560_v0 }
 0x18a   : > { %v1562_v4 = vadd.f32 %v2805_v44, %v1561_v8  ;;  %v1582_v11 = vadd.f32 %v1581_v5, %v1575_v2 }
 0x18c   : > { %v1563_v6 = vadd.f32 %v2811_v57, %v1562_v4  ;;  %v1583_v13 = vadd.f32 %v1582_v11, %v1576_v10 }
 0x18e   : > { %v1564_v14 = vadd.f32 %v2809_v53, %v1563_v6  ;;  %v1584_v16 = vadd.f32 %v1583_v13, %v1577_v12 }
 0x190   : > { %v1565_v20 = vrot.slane %v1564_v14, 4  ;;  %v1585_v22 = vadd.f32 %v1584_v16, %v1578_v18 }
 0x192   : > { %v1566_v23 = vadd.f32 %v1565_v20, %v1564_v14  ;;  %v1586_v24 = vrot.slane %v1585_v22, 4 }
 0x194   : > { %v1567_v26 = vrot.slane %v1566_v23, 2  ;;  %v1587_v7 = vadd.f32 %v1586_v24, %v1585_v22 }
 0x196   : > { %v1568_v25 = vadd.f32 %v1567_v26, %v1566_v23  ;;  %v1588_v29 = vrot.slane %v1587_v7, 2 }
 0x198   : > { %v1569_v30 = vrot.slane %v1568_v25, 1  ;;  %v1589_v3 = vadd.f32 %v1588_v29, %v1587_v7 }
 0x19a   : > { %v1590_v28 = vrot.slane %v1589_v3, 1  ;;  %v1570_v9 = vadd.f32 %v1569_v30, %v1568_v25 }
 0x19c   : > { %v1591_v32 = vadd.f32 %v1590_v28, %v1589_v3 }
 0x19e   : > { %v1593_v19 = vsel %vm1592_vm0, %v1570_v9, %v1591_v32 }
 0x19f   : > { %1594 = vst [vmem:[%s322_s14] sm:$0x3] %v1593_v19 }
 0x1a0 PF: > { %s17_s21 = sadd.s32 1, %s2879_s21  }
 0x1a1   : > { %p14_p4 = scmp.ge.s32.totalorder %s17_s21, 4  }
 0x1a3   :  { %16 = sbr.rel (!%p14_p4) target bundleno = 1 (0x1), region = 101 }

// kernel: bottleneck_forward.13
= control target key start
LH: loop header
LB: loop body
LE: loop exit
PB: predicated region body
PF: predicated region fallthrough
CT: control target
= control target key end

     0   :  { %s360_s0 = inlined_call_operand.vmem [shape: f32[128,128], index: 0, kind: input, shape index: {}, may-alias: {0,4}]   ;;  %s361_s1 = inlined_call_operand.vmem [shape: f32[1,128], index: 1, kind: input, shape index: {}]   ;;  %s362_s2 = inlined_call_operand.vmem [shape: f32[1,128], index: 2, kind: input, shape index: {}]   ;;  %s363_s3 = inlined_call_operand.vmem [shape: f32[128,128], index: 3, kind: input, shape index: {}]   ;;  %s364_s4 = inlined_call_operand.vmem [shape: f32[128,128], index: 4, kind: output, shape index: {}, may-alias: {0,4}]  }
   0x1   :  { %v17_v0 = vld [vmem:[%s360_s0] sm:$0xff]  ;;  %v18_v4 = vld [vmem:[%s360_s0 + $0x8] sm:$0xff]  ;;  %v19_v7 = vld [vmem:[%s360_s0 + $0x10] sm:$0xff] }
   0x2   :  { %v180_v1 = vld [vmem:[%s361_s1] ss:$0 sm:$0xff]  ;;  %v20_v8 = vld [vmem:[%s360_s0 + $0x18] sm:$0xff]  ;;  %v80_v10 = vld [vmem:[%s363_s3 + $0x8] sm:$0xff] }
   0x3   :  { %v185_v2 = vld [vmem:[%s362_s2] ss:$0 sm:$0xff]  ;;  %v40_v3 = vmul.f32 %v180_v1, %v17_v0  ;;  %v41_v6 = vmul.f32 %v180_v1, %v18_v4  ;;  %v42_v11 = vmul.f32 %v180_v1, %v19_v7  ;;  %v81_v12 = vld [vmem:[%s363_s3 + $0x10] sm:$0xff]  ;;  %v43_v13 = vmul.f32 %v180_v1, %v20_v8  ;;  %v82_v16 = vld [vmem:[%s363_s3 + $0x18] sm:$0xff] }
   0x4   :  { %v79_v5 = vld [vmem:[%s363_s3] sm:$0xff]  ;;  %v22_v18 = vld [vmem:[%s360_s0 + $0x28] sm:$0xff]  ;;  %v23_v19 = vld [vmem:[%s360_s0 + $0x30] sm:$0xff] }
   0x5   :  { %v63_v9 = vadd.f32 %v185_v2, %v40_v3  ;;  %v21_v14 = vld [vmem:[%s360_s0 + $0x20] sm:$0xff]  ;;  %v64_v15 = vadd.f32 %v185_v2, %v41_v6  ;;  %v65_v21 = vadd.f32 %v185_v2, %v42_v11  ;;  %v66_v22 = vadd.f32 %v185_v2, %v43_v13  ;;  %v24_v25 = vld [vmem:[%s360_s0 + $0x38] sm:$0xff]  ;;  %v84_v28 = vld [vmem:[%s363_s3 + $0x28] sm:$0xff] }
   0x6   :  { %v44_v17 = vmul.f32 %v180_v1, %v21_v14  ;;  %v83_v23 = vld [vmem:[%s363_s3 + $0x20] sm:$0xff]  ;;  %v45_v24 = vmul.f32 %v180_v1, %v22_v18  ;;  %v46_v29 = vmul.f32 %v180_v1, %v23_v19  ;;  %v47_v30 = vmul.f32 %v180_v1, %v24_v25  ;;  %v85_v36 = vld [vmem:[%s363_s3 + $0x30] sm:$0xff]  ;;  %v86_v37 = vld [vmem:[%s363_s3 + $0x38] sm:$0xff] }
   0x7   :  { %v95_v20 = vadd.f32 %v79_v5, %v63_v9  ;;  %v96_v26 = vadd.f32 %v80_v10, %v64_v15  ;;  %v25_v31 = vld [vmem:[%s360_s0 + $0x40] sm:$0xff]  ;;  %v97_v33 = vadd.f32 %v81_v12, %v65_v21  ;;  %v98_v34 = vadd.f32 %v82_v16, %v66_v22  ;;  %v26_v38 = vld [vmem:[%s360_s0 + $0x48] sm:$0xff]  ;;  %v27_v43 = vld [vmem:[%s360_s0 + $0x50] sm:$0xff] }
   0x8   :  { %v67_v27 = vadd.f32 %v185_v2, %v44_v17  ;;  %v68_v35 = vadd.f32 %v185_v2, %v45_v24  ;;  %v69_v41 = vadd.f32 %v185_v2, %v46_v29  ;;  %v70_v42 = vadd.f32 %v185_v2, %v47_v30  ;;  %v28_v44 = vld [vmem:[%s360_s0 + $0x58] sm:$0xff]  ;;  %v87_v53 = vld [vmem:[%s363_s3 + $0x40] sm:$0xff]  ;;  %v88_v58 = vld [vmem:[%s363_s3 + $0x48] sm:$0xff] }
   0x9   :  { %v111_v32 = vmax.f32 %v95_v20, 0.0  ;;  %v112_v39 = vmax.f32 %v96_v26, 0.0  ;;  %v113_v45 = vmax.f32 %v97_v33, 0.0  ;;  %v114_v46 = vmax.f32 %v98_v34, 0.0  ;;  %v89_v4 = vld [vmem:[%s363_s3 + $0x50] sm:$0xff]  ;;  %v90_v5 = vld [vmem:[%s363_s3 + $0x58] sm:$0xff] }
   0xa   :  { %v99_v40 = vadd.f32 %v83_v23, %v67_v27  ;;  %v100_v47 = vadd.f32 %v84_v28, %v68_v35  ;;  %v48_v48 = vmul.f32 %v180_v1, %v25_v31  ;;  %v101_v51 = vadd.f32 %v85_v36, %v69_v41  ;;  %v91_v10 = vld [vmem:[%s363_s3 + $0x60] sm:$0xff]  ;;  %v92_v14 = vld [vmem:[%s363_s3 + $0x68] sm:$0xff]  ;;  %v93_v21 = vld [vmem:[%s363_s3 + $0x70] sm:$0xff] }
   0xb   :  { %127 = vst [vmem:[%s364_s4] sm:$0xff] %v111_v32  ;;  %v102_v52 = vadd.f32 %v86_v37, %v70_v42  ;;  %v49_v54 = vmul.f32 %v180_v1, %v26_v38  ;;  %v50_v59 = vmul.f32 %v180_v1, %v27_v43  ;;  %v51_v60 = vmul.f32 %v180_v1, %v28_v44  ;;  %v94_v22 = vld [vmem:[%s363_s3 + $0x78] sm:$0xff] }
   0xc   :  { %v115_v50 = vmax.f32 %v99_v40, 0.0  ;;  %v116_v56 = vmax.f32 %v100_v47, 0.0  ;;  %v71_v57 = vadd.f32 %v185_v2, %v48_v48  ;;  %v117_v63 = vmax.f32 %v101_v51, 0.0 }
   0xd   :  { %v118_v0 = vmax.f32 %v102_v52, 0.0  ;;  %v72_v3 = vadd.f32 %v185_v2, %v49_v54  ;;  %v73_v8 = vadd.f32 %v185_v2, %v50_v59  ;;  %v74_v9 = vadd.f32 %v185_v2, %v51_v60 }
   0xe   :  { %v103_v7 = vadd.f32 %v87_v53, %v71_v57 }
   0xf   :  { %v104_v12 = vadd.f32 %v88_v58, %v72_v3  ;;  %v105_v18 = vadd.f32 %v89_v4, %v73_v8  ;;  %v106_v19 = vadd.f32 %v90_v5, %v74_v9 }
  0x10   :  { %v119_v17 = vmax.f32 %v103_v7, 0.0 }
  0x11   :  { %v120_v23 = vmax.f32 %v104_v12, 0.0  ;;  %v122_v27 = vmax.f32 %v106_v19, 0.0 }
  0x12   :  { %v29_v49 = vld [vmem:[%s360_s0 + $0x60] sm:$0xff] }
  0x13   :  { %128 = vst [vmem:[%s364_s4 + $0x8] sm:$0xff] %v112_v39  ;;  %v52_v6 = vmul.f32 %v180_v1, %v29_v49 }
  0x15   :  { %v75_v13 = vadd.f32 %v185_v2, %v52_v6 }
  0x17   :  { %v107_v24 = vadd.f32 %v91_v10, %v75_v13 }
  0x19   :  { %v123_v29 = vmax.f32 %v107_v24, 0.0 }
  0x1a   :  { %v30_v55 = vld [vmem:[%s360_s0 + $0x68] sm:$0xff] }
  0x1b   :  { %129 = vst [vmem:[%s364_s4 + $0x10] sm:$0xff] %v113_v45  ;;  %130 = vst [vmem:[%s364_s4 + $0x18] sm:$0xff] %v114_v46  ;;  %v53_v11 = vmul.f32 %v180_v1, %v30_v55 }
  0x1d   :  { %v76_v20 = vadd.f32 %v185_v2, %v53_v11 }
  0x1f   :  { %v108_v28 = vadd.f32 %v92_v14, %v76_v20 }
  0x22   :  { %v31_v61 = vld [vmem:[%s360_s0 + $0x70] sm:$0xff]  ;;  %v32_v62 = vld [vmem:[%s360_s0 + $0x78] sm:$0xff] }
  0x23   :  { %131 = vst [vmem:[%s364_s4 + $0x20] sm:$0xff] %v115_v50  ;;  %132 = vst [vmem:[%s364_s4 + $0x28] sm:$0xff] %v116_v56  ;;  %v54_v15 = vmul.f32 %v180_v1, %v31_v61  ;;  %v55_v16 = vmul.f32 %v180_v1, %v32_v62  ;;  %v121_v1 = vmax.f32 %v105_v18, 0.0 }
  0x24   :  { %133 = vst [vmem:[%s364_s4 + $0x30] sm:$0xff] %v117_v63  ;;  %134 = vst [vmem:[%s364_s4 + $0x38] sm:$0xff] %v118_v0 }
  0x25   :  { %v77_v25 = vadd.f32 %v185_v2, %v54_v15  ;;  %v78_v26 = vadd.f32 %v185_v2, %v55_v16  ;;  %135 = vst [vmem:[%s364_s4 + $0x40] sm:$0xff] %v119_v17  ;;  %136 = vst [vmem:[%s364_s4 + $0x48] sm:$0xff] %v120_v23  ;;  %v124_v2 = vmax.f32 %v108_v28, 0.0 }
  0x26   :  { %137 = vst [vmem:[%s364_s4 + $0x50] sm:$0xff] %v121_v1  ;;  %138 = vst [vmem:[%s364_s4 + $0x58] sm:$0xff] %v122_v27 }
  0x27   :  { %v109_v30 = vadd.f32 %v93_v21, %v77_v25  ;;  %v110_v31 = vadd.f32 %v94_v22, %v78_v26  ;;  %139 = vst [vmem:[%s364_s4 + $0x60] sm:$0xff] %v123_v29  ;;  %140 = vst [vmem:[%s364_s4 + $0x68] sm:$0xff] %v124_v2 }
  0x29   :  { %v125_v32 = vmax.f32 %v109_v30, 0.0  ;;  %v126_v33 = vmax.f32 %v110_v31, 0.0 }
  0x2b   :  { %141 = vst [vmem:[%s364_s4 + $0x70] sm:$0xff] %v125_v32  ;;  %142 = vst [vmem:[%s364_s4 + $0x78] sm:$0xff] %v126_v33 }

// kernel: bottleneck_forward.11
= control target key start
LH: loop header
LB: loop body
LE: loop exit
PB: predicated region body
PF: predicated region fallthrough
CT: control target
= control target key end

     0   :  { %vm351_vm0 = vcmask 1040384   ;;  %s665_s1 = inlined_call_operand.vmem [shape: f32[128,128], index: 1, kind: input, shape index: {}]   ;;  %s666_s0 = inlined_call_operand.vmem [shape: f32[128,128], index: 0, kind: input, shape index: {}]   ;;  %s667_s2 = inlined_call_operand.vmem [shape: f32[128,128], index: 2, kind: output, shape index: {0}]   ;;  %s668_s3 = inlined_call_operand.vmem [shape: f32[1,2,128], index: 3, kind: output, shape index: {1}]  }
   0x1   :  { %v65_v0 = vld [vmem:[%s665_s1] sm:$0xff]  ;;  %v66_v1 = vld [vmem:[%s665_s1 + $0x8] sm:$0xff]  ;;  %v67_v2 = vld [vmem:[%s665_s1 + $0x10] sm:$0xff] }
   0x2   :  { %v450_v3 = vpack.c.bf16 %v66_v1, %v65_v0  ;;  %v68_v4 = vld [vmem:[%s665_s1 + $0x18] sm:$0xff]  ;;  %v69_v6 = vld [vmem:[%s665_s1 + $0x20] sm:$0xff]  ;;  %v70_v7 = vld [vmem:[%s665_s1 + $0x28] sm:$0xff] }
   0x3   :  { %v454_v5 = vpack.c.bf16 %v68_v4, %v67_v2  ;;  %v458_v8 = vpack.c.bf16 %v70_v7, %v69_v6  ;;  %v49_v9 = vld [vmem:[%s666_s0] sm:$0xff]  ;;  %v71_v10 = vld [vmem:[%s665_s1 + $0x30] sm:$0xff]  ;;  %v72_v11 = vld [vmem:[%s665_s1 + $0x38] sm:$0xff] }
   0x4   :  { %451 = vmatprep.subr.bf16.mxu0 %v450_v3  ;;  %482 = vmatprep.subr.bf16.mxu1 %v450_v3  ;;  %v57_v12 = vld [vmem:[%s666_s0 + $0x40] sm:$0xff]  ;;  %v462_v13 = vpack.c.bf16 %v72_v11, %v71_v10  ;;  %v74_v15 = vld [vmem:[%s665_s1 + $0x48] sm:$0xff]  ;;  %v75_v17 = vld [vmem:[%s665_s1 + $0x50] sm:$0xff] }
   0x5   :  { %453 = vmatpush3.bf16.msra.mxu0 %v450_v3  ;;  %490 = vmatpush3.bf16.msra.mxu1 %v450_v3  ;;  %v73_v14 = vld [vmem:[%s665_s1 + $0x40] sm:$0xff]  ;;  %v76_v18 = vld [vmem:[%s665_s1 + $0x58] sm:$0xff]  ;;  %v78_v21 = vld [vmem:[%s665_s1 + $0x68] sm:$0xff] }
   0x6   :  { %455 = vmatprep.subr.bf16.mxu0 %v454_v5  ;;  %483 = vmatprep.subr.bf16.mxu1 %v454_v5  ;;  %v466_v16 = vpack.c.bf16 %v74_v15, %v73_v14  ;;  %v470_v19 = vpack.c.bf16 %v76_v18, %v75_v17  ;;  %v77_v20 = vld [vmem:[%s665_s1 + $0x60] sm:$0xff]  ;;  %v79_v23 = vld [vmem:[%s665_s1 + $0x70] sm:$0xff]  ;;  %v80_v24 = vld [vmem:[%s665_s1 + $0x78] sm:$0xff] }
   0x7   :  { %426 = vmatprep.mubr.f32.mxu0 %v49_v9  ;;  %438 = vmatprep.mubr.f32.mxu1 %v57_v12  ;;  %v474_v22 = vpack.c.bf16 %v78_v21, %v77_v20  ;;  %v478_v25 = vpack.c.bf16 %v80_v24, %v79_v23  ;;  %v50_v26 = vld [vmem:[%s666_s0 + $0x8] sm:$0xff]  ;;  %v51_v28 = vld [vmem:[%s666_s0 + $0x10] sm:$0xff]  ;;  %v52_v30 = vld [vmem:[%s666_s0 + $0x18] sm:$0xff] }
   0x8   :  { %v58_v27 = vld [vmem:[%s666_s0 + $0x48] sm:$0xff]  ;;  %v59_v29 = vld [vmem:[%s666_s0 + $0x50] sm:$0xff]  ;;  %v60_v31 = vld [vmem:[%s666_s0 + $0x58] sm:$0xff] }
   0x9   :  { %457 = vmatpush3.bf16.msra.mxu0 %v454_v5  ;;  %491 = vmatpush3.bf16.msra.mxu1 %v454_v5  ;;  %v53_v32 = vld [vmem:[%s666_s0 + $0x20] sm:$0xff]  ;;  %v54_v34 = vld [vmem:[%s666_s0 + $0x28] sm:$0xff]  ;;  %v55_v36 = vld [vmem:[%s666_s0 + $0x30] sm:$0xff] }
   0xa   :  { %459 = vmatprep.subr.bf16.mxu0 %v458_v8  ;;  %484 = vmatprep.subr.bf16.mxu1 %v458_v8  ;;  %v61_v33 = vld [vmem:[%s666_s0 + $0x60] sm:$0xff]  ;;  %v62_v35 = vld [vmem:[%s666_s0 + $0x68] sm:$0xff]  ;;  %v63_v37 = vld [vmem:[%s666_s0 + $0x70] sm:$0xff] }
   0xb   :  { %v56_v38 = vld [vmem:[%s666_s0 + $0x38] sm:$0xff] }
   0xc   :  { %v64_v39 = vld [vmem:[%s666_s0 + $0x78] sm:$0xff] }
   0xd   :  { %461 = vmatpush3.bf16.msra.mxu0 %v458_v8  ;;  %492 = vmatpush3.bf16.msra.mxu1 %v458_v8 }
   0xe   :  { %463 = vmatprep.subr.bf16.mxu0 %v462_v13  ;;  %485 = vmatprep.subr.bf16.mxu1 %v462_v13 }
  0x11   :  { %465 = vmatpush3.bf16.msra.mxu0 %v462_v13  ;;  %493 = vmatpush3.bf16.msra.mxu1 %v462_v13 }
  0x12   :  { %467 = vmatprep.subr.bf16.mxu0 %v466_v16  ;;  %486 = vmatprep.subr.bf16.mxu1 %v466_v16 }
  0x15   :  { %469 = vmatpush3.bf16.msra.mxu0 %v466_v16  ;;  %494 = vmatpush3.bf16.msra.mxu1 %v466_v16 }
  0x16   :  { %471 = vmatprep.subr.bf16.mxu0 %v470_v19  ;;  %487 = vmatprep.subr.bf16.mxu1 %v470_v19 }
  0x19   :  { %473 = vmatpush3.bf16.msra.mxu0 %v470_v19  ;;  %495 = vmatpush3.bf16.msra.mxu1 %v470_v19 }
  0x1a   :  { %475 = vmatprep.subr.bf16.mxu0 %v474_v22  ;;  %488 = vmatprep.subr.bf16.mxu1 %v474_v22 }
  0x1d   :  { %477 = vmatpush3.bf16.msra.mxu0 %v474_v22  ;;  %496 = vmatpush3.bf16.msra.mxu1 %v474_v22 }
  0x1e   :  { %479 = vmatprep.subr.bf16.mxu0 %v478_v25  ;;  %489 = vmatprep.subr.bf16.mxu1 %v478_v25 }
  0x21   :  { %481 = vmatpush3.bf16.msra.mxu0 %v478_v25  ;;  %497 = vmatpush3.bf16.msra.mxu1 %v478_v25 }
  0x24   :  { %427 = vmatmul.mubr.f32.vlgmr.msra.gmra.mrb[0].mxu0 %v50_v26  ;;  %439 = vmatmul.mubr.f32.vlgmr.msra.gmra.mrb[0].mxu1 %v58_v27 }
  0x25   :  { %429 = vmatprep.mubr.f32.mxu0 %v51_v28  ;;  %441 = vmatprep.mubr.f32.mxu1 %v59_v29 }
  0x28   :  { %430 = vmatmul.mubr.f32.gmra.mrb[2].mxu0 %v52_v30  ;;  %442 = vmatmul.mubr.f32.gmra.mrb[2].mxu1 %v60_v31 }
  0x29   :  { %432 = vmatprep.mubr.f32.mxu0 %v53_v32  ;;  %444 = vmatprep.mubr.f32.mxu1 %v61_v33 }
  0x2c   :  { %433 = vmatmul.mubr.f32.gmra.mrb[4].mxu0 %v54_v34  ;;  %445 = vmatmul.mubr.f32.gmra.mrb[4].mxu1 %v62_v35 }
  0x2d   :  { %435 = vmatprep.mubr.f32.mxu0 %v55_v36  ;;  %447 = vmatprep.mubr.f32.mxu1 %v63_v37 }
  0x30   :  { %436 = vmatmul.mubr.f32.gmra.mrb[6].mxu0 %v56_v38  ;;  %448 = vmatmul.mubr.f32.gmra.mrb[6].mxu1 %v64_v39 }
  0xf7   :  { %v428_v40 = vpop.f32.mrb[0].mxu0  ;;  %v440_v41 = vpop.f32.mrb[0].mxu1 }
  0xf8   :  { %278 = vst [vmem:[%s667_s2 + $0x8] sm:$0xff] %v428_v40  ;;  %v315_v42 = vmul.f32 %v428_v40, %v428_v40  ;;  %v147_v43 = vpop.f32.mrb[1].mxu0  ;;  %286 = vst [vmem:[%s667_s2 + $0x48] sm:$0xff] %v440_v41  ;;  %v187_v44 = vpop.f32.mrb[1].mxu1  ;;  %v323_v16 = vmul.f32 %v440_v41, %v440_v41 }
  0xf9   :  { %277 = vst [vmem:[%s667_s2] sm:$0xff] %v147_v43  ;;  %v293_v45 = vadd.f32 %v428_v40, %v147_v43  ;;  %v314_v46 = vmul.f32 %v147_v43, %v147_v43  ;;  %285 = vst [vmem:[%s667_s2 + $0x40] sm:$0xff] %v187_v44  ;;  %v322_v13 = vmul.f32 %v187_v44, %v187_v44 }
  0xfb   :  { %v330_v47 = vadd.f32 %v315_v42, %v314_v46  ;;  %v431_v48 = vpop.f32.mrb[2].mxu0  ;;  %v443_v49 = vpop.f32.mrb[2].mxu1 }
  0xfc   :  { %280 = vst [vmem:[%s667_s2 + $0x18] sm:$0xff] %v431_v48  ;;  %v157_v50 = vpop.f32.mrb[3].mxu0  ;;  %288 = vst [vmem:[%s667_s2 + $0x58] sm:$0xff] %v443_v49  ;;  %v197_v51 = vpop.f32.mrb[3].mxu1  ;;  %v317_v54 = vmul.f32 %v431_v48, %v431_v48  ;;  %v325_v22 = vmul.f32 %v443_v49, %v443_v49 }
  0xfd   :  { %279 = vst [vmem:[%s667_s2 + $0x10] sm:$0xff] %v157_v50  ;;  %v294_v52 = vadd.f32 %v293_v45, %v157_v50  ;;  %v316_v53 = vmul.f32 %v157_v50, %v157_v50  ;;  %287 = vst [vmem:[%s667_s2 + $0x50] sm:$0xff] %v197_v51  ;;  %v324_v19 = vmul.f32 %v197_v51, %v197_v51 }
  0xff   :  { %v331_v55 = vadd.f32 %v330_v47, %v316_v53  ;;  %v434_v56 = vpop.f32.mrb[4].mxu0  ;;  %v295_v57 = vadd.f32 %v431_v48, %v294_v52  ;;  %v446_v58 = vpop.f32.mrb[4].mxu1 }
 0x100   :  { %282 = vst [vmem:[%s667_s2 + $0x28] sm:$0xff] %v434_v56  ;;  %v167_v59 = vpop.f32.mrb[5].mxu0  ;;  %290 = vst [vmem:[%s667_s2 + $0x68] sm:$0xff] %v446_v58  ;;  %v207_v60 = vpop.f32.mrb[5].mxu1  ;;  %v319_v0 = vmul.f32 %v434_v56, %v434_v56  ;;  %v327_v28 = vmul.f32 %v446_v58, %v446_v58 }
 0x101   :  { %281 = vst [vmem:[%s667_s2 + $0x20] sm:$0xff] %v167_v59  ;;  %v296_v61 = vadd.f32 %v295_v57, %v167_v59  ;;  %v318_v62 = vmul.f32 %v167_v59, %v167_v59  ;;  %v332_v63 = vadd.f32 %v331_v55, %v317_v54  ;;  %289 = vst [vmem:[%s667_s2 + $0x60] sm:$0xff] %v207_v60 }
 0x102   :  { %v326_v25 = vmul.f32 %v207_v60, %v207_v60 }
 0x103   :  { %v333_v1 = vadd.f32 %v332_v63, %v318_v62  ;;  %v437_v2 = vpop.f32.mrb[6].mxu0  ;;  %v297_v3 = vadd.f32 %v434_v56, %v296_v61  ;;  %v449_v4 = vpop.f32.mrb[6].mxu1 }
 0x104   :  { %284 = vst [vmem:[%s667_s2 + $0x38] sm:$0xff] %v437_v2  ;;  %v177_v5 = vpop.f32.mrb[7].mxu0  ;;  %292 = vst [vmem:[%s667_s2 + $0x78] sm:$0xff] %v449_v4  ;;  %v217_v6 = vpop.f32.mrb[7].mxu1  ;;  %v321_v10 = vmul.f32 %v437_v2, %v437_v2  ;;  %v329_v34 = vmul.f32 %v449_v4, %v449_v4 }
 0x105   :  { %283 = vst [vmem:[%s667_s2 + $0x30] sm:$0xff] %v177_v5  ;;  %v298_v7 = vadd.f32 %v297_v3, %v177_v5  ;;  %v320_v8 = vmul.f32 %v177_v5, %v177_v5  ;;  %v334_v9 = vadd.f32 %v333_v1, %v319_v0  ;;  %291 = vst [vmem:[%s667_s2 + $0x70] sm:$0xff] %v217_v6 }
 0x106   :  { %v328_v31 = vmul.f32 %v217_v6, %v217_v6 }
 0x107   :  { %v299_v11 = vadd.f32 %v437_v2, %v298_v7  ;;  %v335_v12 = vadd.f32 %v334_v9, %v320_v8 }
 0x109   :  { %v336_v14 = vadd.f32 %v335_v12, %v321_v10  ;;  %v300_v15 = vadd.f32 %v299_v11, %v187_v44 }
 0x10b   :  { %v337_v17 = vadd.f32 %v336_v14, %v322_v13  ;;  %v301_v18 = vadd.f32 %v440_v41, %v300_v15 }
 0x10d   :  { %v302_v20 = vadd.f32 %v301_v18, %v197_v51  ;;  %v338_v21 = vadd.f32 %v337_v17, %v323_v16 }
 0x10f   :  { %v339_v23 = vadd.f32 %v338_v21, %v324_v19  ;;  %v303_v24 = vadd.f32 %v443_v49, %v302_v20 }
 0x111   :  { %v304_v26 = vadd.f32 %v303_v24, %v207_v60  ;;  %v340_v27 = vadd.f32 %v339_v23, %v325_v22 }
 0x113   :  { %v341_v29 = vadd.f32 %v340_v27, %v326_v25  ;;  %v305_v30 = vadd.f32 %v446_v58, %v304_v26 }
 0x115   :  { %v306_v32 = vadd.f32 %v305_v30, %v217_v6  ;;  %v342_v33 = vadd.f32 %v341_v29, %v327_v28 }
 0x117   :  { %v307_v35 = vadd.f32 %v449_v4, %v306_v32  ;;  %v343_v36 = vadd.f32 %v342_v33, %v328_v31 }
 0x119   :  { %v308_v37 = vrot.slane %v307_v35, 4  ;;  %v344_v38 = vadd.f32 %v343_v36, %v329_v34 }
 0x11b   :  { %v309_v39 = vadd.f32 %v308_v37, %v307_v35  ;;  %v345_v40 = vrot.slane %v344_v38, 4 }
 0x11d   :  { %v310_v41 = vrot.slane %v309_v39, 2  ;;  %v346_v42 = vadd.f32 %v345_v40, %v344_v38 }
 0x11f   :  { %v311_v43 = vadd.f32 %v310_v41, %v309_v39  ;;  %v347_v44 = vrot.slane %v346_v42, 2 }
 0x121   :  { %v312_v45 = vrot.slane %v311_v43, 1  ;;  %v348_v46 = vadd.f32 %v347_v44, %v346_v42 }
 0x123   :  { %v349_v47 = vrot.slane %v348_v46, 1  ;;  %v313_v48 = vadd.f32 %v312_v45, %v311_v43 }
 0x125   :  { %v350_v49 = vadd.f32 %v349_v47, %v348_v46 }
 0x127   :  { %v352_v50 = vsel %vm351_vm0, %v313_v48, %v350_v49 }
 0x128   :  { %353 = vst [vmem:[%s668_s3] sm:$0x3] %v352_v50 }

// kernel: bottleneck_forward.12
= control target key start
LH: loop header
LB: loop body
LE: loop exit
PB: predicated region body
PF: predicated region fallthrough
CT: control target
= control target key end

     0   :  { %s711_s0 = inlined_call_operand.vmem [shape: f32[128,128], index: 0, kind: input, shape index: {}]   ;;  %s712_s1 = inlined_call_operand.vmem [shape: f32[128,128], index: 1, kind: input, shape index: {}]   ;;  %s713_s2 = inlined_call_operand.vmem [shape: f32[128,128], index: 2, kind: output, shape index: {0}]   ;;  %s714_s3 = inlined_call_operand.hbm [shape: f32[1,2,128], index: 3, kind: output, shape index: {1}]  }
   0x1   :  { %v66_v0 = vld [vmem:[%s712_s1] sm:$0xff]  ;;  %v67_v1 = vld [vmem:[%s712_s1 + $0x8] sm:$0xff]  ;;  %v68_v2 = vld [vmem:[%s712_s1 + $0x10] sm:$0xff] }
   0x2   :  { %v461_v3 = vpack.c.bf16 %v67_v1, %v66_v0  ;;  %v69_v4 = vld [vmem:[%s712_s1 + $0x18] sm:$0xff]  ;;  %v70_v6 = vld [vmem:[%s712_s1 + $0x20] sm:$0xff]  ;;  %v71_v7 = vld [vmem:[%s712_s1 + $0x28] sm:$0xff] }
   0x3   :  { %v465_v5 = vpack.c.bf16 %v69_v4, %v68_v2  ;;  %v469_v8 = vpack.c.bf16 %v71_v7, %v70_v6  ;;  %v50_v9 = vld [vmem:[%s711_s0] sm:$0xff]  ;;  %v72_v10 = vld [vmem:[%s712_s1 + $0x30] sm:$0xff]  ;;  %v73_v11 = vld [vmem:[%s712_s1 + $0x38] sm:$0xff] }
   0x4   :  { %462 = vmatprep.subr.bf16.mxu0 %v461_v3  ;;  %493 = vmatprep.subr.bf16.mxu1 %v461_v3  ;;  %v58_v12 = vld [vmem:[%s711_s0 + $0x40] sm:$0xff]  ;;  %v473_v13 = vpack.c.bf16 %v73_v11, %v72_v10  ;;  %v75_v15 = vld [vmem:[%s712_s1 + $0x48] sm:$0xff] }
   0x5   :  { %464 = vmatpush3.bf16.msra.mxu0 %v461_v3  ;;  %501 = vmatpush3.bf16.msra.mxu1 %v461_v3  ;;  %v74_v14 = vld [vmem:[%s712_s1 + $0x40] sm:$0xff] }
   0x6   :  { %466 = vmatprep.subr.bf16.mxu0 %v465_v5  ;;  %494 = vmatprep.subr.bf16.mxu1 %v465_v5 }
   0x7   :  { %437 = vmatprep.mubr.f32.mxu0 %v50_v9  ;;  %449 = vmatprep.mubr.f32.mxu1 %v58_v12 }
   0x9   :  { %468 = vmatpush3.bf16.msra.mxu0 %v465_v5  ;;  %502 = vmatpush3.bf16.msra.mxu1 %v465_v5 }
   0xa   :  { %470 = vmatprep.subr.bf16.mxu0 %v469_v8  ;;  %495 = vmatprep.subr.bf16.mxu1 %v469_v8 }
   0xb   :  { %9 = vsyncpa [#allocation4], 0  ;;  %v477_v16 = vpack.c.bf16 %v75_v15, %v74_v14  ;;  %v76_v17 = vld [vmem:[%s712_s1 + $0x50] sm:$0xff]  ;;  %v77_v18 = vld [vmem:[%s712_s1 + $0x58] sm:$0xff]  ;;  %vm352_vm0 = vcmask 1040384  }
   0xc   :  { %v481_v19 = vpack.c.bf16 %v77_v18, %v76_v17  ;;  %v78_v20 = vld [vmem:[%s712_s1 + $0x60] sm:$0xff]  ;;  %v79_v21 = vld [vmem:[%s712_s1 + $0x68] sm:$0xff]  ;;  %v80_v23 = vld [vmem:[%s712_s1 + $0x70] sm:$0xff] }
   0xd   :  { %472 = vmatpush3.bf16.msra.mxu0 %v469_v8  ;;  %503 = vmatpush3.bf16.msra.mxu1 %v469_v8  ;;  %v485_v22 = vpack.c.bf16 %v79_v21, %v78_v20  ;;  %v81_v24 = vld [vmem:[%s712_s1 + $0x78] sm:$0xff]  ;;  %v51_v26 = vld [vmem:[%s711_s0 + $0x8] sm:$0xff]  ;;  %v52_v28 = vld [vmem:[%s711_s0 + $0x10] sm:$0xff] }
   0xe   :  { %474 = vmatprep.subr.bf16.mxu0 %v473_v13  ;;  %496 = vmatprep.subr.bf16.mxu1 %v473_v13  ;;  %v489_v25 = vpack.c.bf16 %v81_v24, %v80_v23  ;;  %v59_v27 = vld [vmem:[%s711_s0 + $0x48] sm:$0xff]  ;;  %v60_v29 = vld [vmem:[%s711_s0 + $0x50] sm:$0xff]  ;;  %v53_v30 = vld [vmem:[%s711_s0 + $0x18] sm:$0xff] }
   0xf   :  { %v61_v31 = vld [vmem:[%s711_s0 + $0x58] sm:$0xff]  ;;  %v54_v32 = vld [vmem:[%s711_s0 + $0x20] sm:$0xff]  ;;  %v55_v34 = vld [vmem:[%s711_s0 + $0x28] sm:$0xff] }
  0x10   :  { %v62_v33 = vld [vmem:[%s711_s0 + $0x60] sm:$0xff]  ;;  %v63_v35 = vld [vmem:[%s711_s0 + $0x68] sm:$0xff]  ;;  %v56_v36 = vld [vmem:[%s711_s0 + $0x30] sm:$0xff] }
  0x11   :  { %476 = vmatpush3.bf16.msra.mxu0 %v473_v13  ;;  %504 = vmatpush3.bf16.msra.mxu1 %v473_v13  ;;  %v64_v37 = vld [vmem:[%s711_s0 + $0x70] sm:$0xff]  ;;  %v57_v38 = vld [vmem:[%s711_s0 + $0x38] sm:$0xff] }
  0x12   :  { %478 = vmatprep.subr.bf16.mxu0 %v477_v16  ;;  %497 = vmatprep.subr.bf16.mxu1 %v477_v16  ;;  %v65_v39 = vld [vmem:[%s711_s0 + $0x78] sm:$0xff] }
  0x15   :  { %480 = vmatpush3.bf16.msra.mxu0 %v477_v16  ;;  %505 = vmatpush3.bf16.msra.mxu1 %v477_v16 }
  0x16   :  { %482 = vmatprep.subr.bf16.mxu0 %v481_v19  ;;  %498 = vmatprep.subr.bf16.mxu1 %v481_v19 }
  0x19   :  { %484 = vmatpush3.bf16.msra.mxu0 %v481_v19  ;;  %506 = vmatpush3.bf16.msra.mxu1 %v481_v19 }
  0x1a   :  { %486 = vmatprep.subr.bf16.mxu0 %v485_v22  ;;  %499 = vmatprep.subr.bf16.mxu1 %v485_v22 }
  0x1d   :  { %488 = vmatpush3.bf16.msra.mxu0 %v485_v22  ;;  %507 = vmatpush3.bf16.msra.mxu1 %v485_v22 }
  0x1e   :  { %490 = vmatprep.subr.bf16.mxu0 %v489_v25  ;;  %500 = vmatprep.subr.bf16.mxu1 %v489_v25 }
  0x21   :  { %492 = vmatpush3.bf16.msra.mxu0 %v489_v25  ;;  %508 = vmatpush3.bf16.msra.mxu1 %v489_v25 }
  0x24   :  { %438 = vmatmul.mubr.f32.vlgmr.msra.gmra.mrb[0].mxu0 %v51_v26  ;;  %450 = vmatmul.mubr.f32.vlgmr.msra.gmra.mrb[0].mxu1 %v59_v27 }
  0x25   :  { %440 = vmatprep.mubr.f32.mxu0 %v52_v28  ;;  %452 = vmatprep.mubr.f32.mxu1 %v60_v29 }
  0x28   :  { %441 = vmatmul.mubr.f32.gmra.mrb[2].mxu0 %v53_v30  ;;  %453 = vmatmul.mubr.f32.gmra.mrb[2].mxu1 %v61_v31 }
  0x29   :  { %443 = vmatprep.mubr.f32.mxu0 %v54_v32  ;;  %455 = vmatprep.mubr.f32.mxu1 %v62_v33 }
  0x2c   :  { %444 = vmatmul.mubr.f32.gmra.mrb[4].mxu0 %v55_v34  ;;  %456 = vmatmul.mubr.f32.gmra.mrb[4].mxu1 %v63_v35 }
  0x2d   :  { %446 = vmatprep.mubr.f32.mxu0 %v56_v36  ;;  %458 = vmatprep.mubr.f32.mxu1 %v64_v37 }
  0x30   :  { %447 = vmatmul.mubr.f32.gmra.mrb[6].mxu0 %v57_v38  ;;  %459 = vmatmul.mubr.f32.gmra.mrb[6].mxu1 %v65_v39 }
  0xf7   :  { %v439_v40 = vpop.f32.mrb[0].mxu0  ;;  %v451_v41 = vpop.f32.mrb[0].mxu1 }
  0xf8   :  { %279 = vst [vmem:[%s713_s2 + $0x8] sm:$0xff] %v439_v40  ;;  %v316_v42 = vmul.f32 %v439_v40, %v439_v40  ;;  %v148_v43 = vpop.f32.mrb[1].mxu0  ;;  %287 = vst [vmem:[%s713_s2 + $0x48] sm:$0xff] %v451_v41  ;;  %v188_v44 = vpop.f32.mrb[1].mxu1  ;;  %v324_v16 = vmul.f32 %v451_v41, %v451_v41 }
  0xf9   :  { %278 = vst [vmem:[%s713_s2] sm:$0xff] %v148_v43  ;;  %v294_v45 = vadd.f32 %v439_v40, %v148_v43  ;;  %v315_v46 = vmul.f32 %v148_v43, %v148_v43  ;;  %286 = vst [vmem:[%s713_s2 + $0x40] sm:$0xff] %v188_v44  ;;  %v323_v13 = vmul.f32 %v188_v44, %v188_v44 }
  0xfb   :  { %v331_v47 = vadd.f32 %v316_v42, %v315_v46  ;;  %v442_v48 = vpop.f32.mrb[2].mxu0  ;;  %v454_v49 = vpop.f32.mrb[2].mxu1 }
  0xfc   :  { %281 = vst [vmem:[%s713_s2 + $0x18] sm:$0xff] %v442_v48  ;;  %v158_v50 = vpop.f32.mrb[3].mxu0  ;;  %289 = vst [vmem:[%s713_s2 + $0x58] sm:$0xff] %v454_v49  ;;  %v198_v51 = vpop.f32.mrb[3].mxu1  ;;  %v318_v54 = vmul.f32 %v442_v48, %v442_v48  ;;  %v326_v22 = vmul.f32 %v454_v49, %v454_v49 }
  0xfd   :  { %280 = vst [vmem:[%s713_s2 + $0x10] sm:$0xff] %v158_v50  ;;  %v295_v52 = vadd.f32 %v294_v45, %v158_v50  ;;  %v317_v53 = vmul.f32 %v158_v50, %v158_v50  ;;  %288 = vst [vmem:[%s713_s2 + $0x50] sm:$0xff] %v198_v51  ;;  %v325_v19 = vmul.f32 %v198_v51, %v198_v51 }
  0xff   :  { %v332_v55 = vadd.f32 %v331_v47, %v317_v53  ;;  %v445_v56 = vpop.f32.mrb[4].mxu0  ;;  %v296_v57 = vadd.f32 %v442_v48, %v295_v52  ;;  %v457_v58 = vpop.f32.mrb[4].mxu1 }
 0x100   :  { %283 = vst [vmem:[%s713_s2 + $0x28] sm:$0xff] %v445_v56  ;;  %v168_v59 = vpop.f32.mrb[5].mxu0  ;;  %291 = vst [vmem:[%s713_s2 + $0x68] sm:$0xff] %v457_v58  ;;  %v208_v60 = vpop.f32.mrb[5].mxu1  ;;  %v320_v0 = vmul.f32 %v445_v56, %v445_v56  ;;  %v328_v28 = vmul.f32 %v457_v58, %v457_v58 }
 0x101   :  { %282 = vst [vmem:[%s713_s2 + $0x20] sm:$0xff] %v168_v59  ;;  %v297_v61 = vadd.f32 %v296_v57, %v168_v59  ;;  %v319_v62 = vmul.f32 %v168_v59, %v168_v59  ;;  %v333_v63 = vadd.f32 %v332_v55, %v318_v54  ;;  %290 = vst [vmem:[%s713_s2 + $0x60] sm:$0xff] %v208_v60 }
 0x102   :  { %v327_v25 = vmul.f32 %v208_v60, %v208_v60 }
 0x103   :  { %v334_v1 = vadd.f32 %v333_v63, %v319_v62  ;;  %v448_v2 = vpop.f32.mrb[6].mxu0  ;;  %v298_v3 = vadd.f32 %v445_v56, %v297_v61  ;;  %v460_v4 = vpop.f32.mrb[6].mxu1 }
 0x104   :  { %285 = vst [vmem:[%s713_s2 + $0x38] sm:$0xff] %v448_v2  ;;  %v178_v5 = vpop.f32.mrb[7].mxu0  ;;  %293 = vst [vmem:[%s713_s2 + $0x78] sm:$0xff] %v460_v4  ;;  %v218_v6 = vpop.f32.mrb[7].mxu1  ;;  %v322_v10 = vmul.f32 %v448_v2, %v448_v2  ;;  %v330_v34 = vmul.f32 %v460_v4, %v460_v4 }
 0x105   :  { %284 = vst [vmem:[%s713_s2 + $0x30] sm:$0xff] %v178_v5  ;;  %v299_v7 = vadd.f32 %v298_v3, %v178_v5  ;;  %v321_v8 = vmul.f32 %v178_v5, %v178_v5  ;;  %v335_v9 = vadd.f32 %v334_v1, %v320_v0  ;;  %292 = vst [vmem:[%s713_s2 + $0x70] sm:$0xff] %v218_v6  ;;  %s534_s2 = smov [#allocation3]  }
 0x106   :  { %v329_v31 = vmul.f32 %v218_v6, %v218_v6  ;;  %s363_s24 = sshll.u32 %s534_s2, 4  ;;  %s364_s24 = int_to_ptr.vmem [resolvable:$true] %s363_s24 }
 0x107   :  { %v300_v11 = vadd.f32 %v448_v2, %v299_v7  ;;  %v336_v12 = vadd.f32 %v335_v9, %v321_v8  ;;  %s510_s1 = scalar_lea.vmem %s364_s24, 32  ;;  %p515_p1 = scmp.lt.s32.totalorder %s364_s24, %s364_s24 }
 0x108   :  { %p511_p0 = scmp.ne.s32.totalorder %s364_s24, %s510_s1  ;;  %p516_p2 = scmp.lt.s32.totalorder %s510_s1, %s510_s1 }
 0x109   :  { %v337_v14 = vadd.f32 %v336_v12, %v322_v10  ;;  %v301_v15 = vadd.f32 %v300_v11, %v188_v44 }
 0x10a   :  { %p517_p3 = por %p516_p2, %p515_p1 }
 0x10b   :  { %v338_v17 = vadd.f32 %v337_v14, %v323_v13  ;;  %v302_v18 = vadd.f32 %v451_v41, %v301_v15 }
 0x10c   :  { %p518_p4 = pnand %p517_p3, %p511_p0 }
 0x10d   :  { %v303_v20 = vadd.f32 %v302_v18, %v198_v51  ;;  %v339_v21 = vadd.f32 %v338_v17, %v324_v16 }
 0x10f   :  { %v340_v23 = vadd.f32 %v339_v21, %v325_v19  ;;  %v304_v24 = vadd.f32 %v454_v49, %v303_v20 }
 0x111   :  { %v305_v26 = vadd.f32 %v304_v24, %v208_v60  ;;  %v341_v27 = vadd.f32 %v340_v23, %v326_v22 }
 0x113   :  { %v342_v29 = vadd.f32 %v341_v27, %v327_v25  ;;  %v306_v30 = vadd.f32 %v457_v58, %v305_v26 }
 0x115   :  { %v307_v32 = vadd.f32 %v306_v30, %v218_v6  ;;  %v343_v33 = vadd.f32 %v342_v29, %v328_v28 }
 0x117   :  { %v308_v35 = vadd.f32 %v460_v4, %v307_v32  ;;  %v344_v36 = vadd.f32 %v343_v33, %v329_v31 }
 0x119   :  { %v309_v37 = vrot.slane %v308_v35, 4  ;;  %v345_v38 = vadd.f32 %v344_v36, %v330_v34 }
 0x11b   :  { %v310_v39 = vadd.f32 %v309_v37, %v308_v35  ;;  %v346_v40 = vrot.slane %v345_v38, 4 }
 0x11d   :  { %v311_v41 = vrot.slane %v310_v39, 2  ;;  %v347_v42 = vadd.f32 %v346_v40, %v345_v38 }
 0x11f   :  { %v312_v43 = vadd.f32 %v311_v41, %v310_v39  ;;  %v348_v44 = vrot.slane %v347_v42, 2 }
 0x121   :  { %v313_v45 = vrot.slane %v312_v43, 1  ;;  %v349_v46 = vadd.f32 %v348_v44, %v347_v42 }
 0x123   :  { %v350_v47 = vrot.slane %v349_v46, 1  ;;  %v314_v48 = vadd.f32 %v313_v45, %v312_v43 }
 0x125   :  { %v351_v49 = vadd.f32 %v350_v47, %v349_v46 }
 0x127   :  { %v353_v50 = vsel %vm352_vm0, %v314_v48, %v351_v49 }
 0x128   :  { %354 = vst [vmem:[#allocation3] sm:$0x3] %v353_v50 }
 0x129   :  { %521 = shalt.err (!%p518_p4)
}
 0x12a   :  { %s522_s26 = scalar_lea.hbm %s714_s3, 32 }
 0x12b   :  { %p523_p5 = scmp.ne.s32.totalorder %s714_s3, %s522_s26  ;;  %p526_p6 = scmp.lt.u32.totalorder %s522_s26, %s714_s3 }
 0x12d   :  { %p528_p7 = pnand %p526_p6, %p523_p5 }
 0x12f   :  { %531 = shalt.err (!%p528_p7)
}
 0x130   :  { %366 = dma.vmem_to_hbm [thread:$0]  %s364_s24, 32, %s714_s3, [#allocation4]  }
 0x131   :  { %532 = dma.done.wait [#allocation4], 32  }
 0x132   :  { %533 = vsyncadd [#allocation4], 4294967264 }
 0x133   :  { %372 = vsyncpa [#allocation4], 1 }

</bundles_post_ra>
